<compile_context>
chip_gen: v5e
topology: v5e:2x2
jax: 0.10.0
libtpu: 0.0.40
codegen_flags: <defaults>
</compile_context>

<pallas_src>
import functools
import math

import jax
import jax.numpy as jnp
from jax.experimental import pallas as pl
from jax.experimental.pallas import tpu as pltpu

NEG_INF = -1e30          # stands in for float('-inf'); exp() underflows to 0 identically
LN_EPS = 1e-5            # nn.Transformer default layer_norm_eps
_APPROX_SOFTMAX_RECIP = False   # True -> EUP approximate reciprocal (perf build)


# ------------------------------ in-kernel helpers ------------------------------ #

def _layernorm(z, g, b, eps=LN_EPS):
    # PyTorch LayerNorm: biased variance.
    mean = jnp.mean(z, axis=-1, keepdims=True)
    c = z - mean
    var = jnp.mean(c * c, axis=-1, keepdims=True)
    return c * jax.lax.rsqrt(var + eps) * g + b


def _softmax_rows(s):
    s = s - jnp.max(s, axis=-1, keepdims=True)
    p = jnp.exp(s)
    denom = jnp.sum(p, axis=-1, keepdims=True)
    if _APPROX_SOFTMAX_RECIP:
        return p * pl.reciprocal(denom, approx=True)
    return p / denom


def _mha(q, k, v, wo, bo, *, nhead, scale, bias=None):
    """Multi-head attention on already-projected q (Lq,D), k/v (Lk,D).

    Heads are split along lanes; per-head contexts are concatenated back into a
    single (Lq, D) buffer so the output projection is ONE MXU matmul (review item 2).
    """
    _, D = q.shape
    dh = D // nhead
    ctx = []
    for h in range(nhead):                      # static loop; nhead is small
        q_h = q[:, h * dh:(h + 1) * dh]
        k_h = k[:, h * dh:(h + 1) * dh]
        v_h = v[:, h * dh:(h + 1) * dh]
        s = jnp.einsum("qd,kd->qk", q_h, k_h,
                       preferred_element_type=jnp.float32) * scale
        if bias is not None:
            s = s + bias
        p = _softmax_rows(s)
        ctx.append(jnp.dot(p, v_h, preferred_element_type=jnp.float32))
    ctx = jnp.concatenate(ctx, axis=-1)          # (Lq, D) heads packed along lanes
    return jnp.dot(ctx, wo, preferred_element_type=jnp.float32) + bo


# ------------------------------ fused forward kernel --------------------------- #

def _fused_forward_kernel(
        # activations / constants
        src_ref, tgt_ref, pe_s_ref, pe_t_ref, causal_ref,
        # input projections
        enc_w_ref, enc_b_ref, dec_w_ref, dec_b_ref,
        # stacked encoder layer params (leading axis = layer)
        e_wqkv_ref, e_bqkv_ref, e_wo_ref, e_bo_ref, e_ln1g_ref, e_ln1b_ref,
        e_w1_ref, e_b1_ref, e_w2_ref, e_b2_ref, e_ln2g_ref, e_ln2b_ref,
        # stacked decoder layer params (leading axis = layer)
        d_sa_wqkv_ref, d_sa_bqkv_ref, d_sa_wo_ref, d_sa_bo_ref, d_ln1g_ref, d_ln1b_ref,
        d_ca_wq_ref, d_ca_bq_ref, d_ca_wkv_ref, d_ca_bkv_ref, d_ca_wo_ref, d_ca_bo_ref,
        d_ln2g_ref, d_ln2b_ref,
        d_w1_ref, d_b1_ref, d_w2_ref, d_b2_ref, d_ln3g_ref, d_ln3b_ref,
        # final norms / output head
        enc_lng_ref, enc_lnb_ref, dec_lng_ref, dec_lnb_ref, fc_w_ref, fc_b_ref,
        # output
        out_ref,
        *, nhead, num_enc, num_dec, d_model):
    D = d_model
    scale_embed = math.sqrt(D)
    attn_scale = 1.0 / math.sqrt(D // nhead)

    # ---- embeddings: input projection * sqrt(D) + positional encoding (dropout=id) ----
    mem = (jnp.dot(src_ref[...], enc_w_ref[...],
                   preferred_element_type=jnp.float32) + enc_b_ref[...]) * scale_embed \
          + pe_s_ref[...]
    out = (jnp.dot(tgt_ref[...], dec_w_ref[...],
                   preferred_element_type=jnp.float32) + dec_b_ref[...]) * scale_embed \
          + pe_t_ref[...]

    causal = causal_ref[...]                      # hoisted additive tgt mask (T, T)

    # ---- encoder stack (post-norm) ----
    for l in range(num_enc):                      # static unrolled loop
        x = mem
        qkv = jnp.dot(x, e_wqkv_ref[l],
                      preferred_element_type=jnp.float32) + e_bqkv_ref[l]
        attn = _mha(qkv[:, :D], qkv[:, D:2 * D], qkv[:, 2 * D:],
                    e_wo_ref[l], e_bo_ref[l], nhead=nhead, scale=attn_scale)
        x = _layernorm(x + attn, e_ln1g_ref[l], e_ln1b_ref[l])
        h = jnp.maximum(jnp.dot(x, e_w1_ref[l],
                                preferred_element_type=jnp.float32) + e_b1_ref[l], 0.0)
        f = jnp.dot(h, e_w2_ref[l], preferred_element_type=jnp.float32) + e_b2_ref[l]
        mem = _layernorm(x + f, e_ln2g_ref[l], e_ln2b_ref[l])
    mem = _layernorm(mem, enc_lng_ref[...], enc_lnb_ref[...])    # encoder final norm

    # ---- decoder stack (post-norm, causal self-attn, cross-attn over memory) ----
    for l in range(num_dec):
        x = out
        qkv = jnp.dot(x, d_sa_wqkv_ref[l],
                      preferred_element_type=jnp.float32) + d_sa_bqkv_ref[l]
        attn = _mha(qkv[:, :D], qkv[:, D:2 * D], qkv[:, 2 * D:],
                    d_sa_wo_ref[l], d_sa_bo_ref[l],
                    nhead=nhead, scale=attn_scale, bias=causal)
        x = _layernorm(x + attn, d_ln1g_ref[l], d_ln1b_ref[l])

        q = jnp.dot(x, d_ca_wq_ref[l],
                    preferred_element_type=jnp.float32) + d_ca_bq_ref[l]
        kv = jnp.dot(mem, d_ca_wkv_ref[l],
                     preferred_element_type=jnp.float32) + d_ca_bkv_ref[l]
        attn = _mha(q, kv[:, :D], kv[:, D:], d_ca_wo_ref[l], d_ca_bo_ref[l],
                    nhead=nhead, scale=attn_scale)
        x = _layernorm(x + attn, d_ln2g_ref[l], d_ln2b_ref[l])

        h = jnp.maximum(jnp.dot(x, d_w1_ref[l],
                                preferred_element_type=jnp.float32) + d_b1_ref[l], 0.0)
        f = jnp.dot(h, d_w2_ref[l], preferred_element_type=jnp.float32) + d_b2_ref[l]
        out = _layernorm(x + f, d_ln3g_ref[l], d_ln3b_ref[l])
    out = _layernorm(out, dec_lng_ref[...], dec_lnb_ref[...])    # decoder final norm

    # ---- output head ----
    out_ref[...] = jnp.dot(out, fc_w_ref[...],
                           preferred_element_type=jnp.float32) + fc_b_ref[...]


# ------------------------------------ forward ---------------------------------- #

def forward(params, src, tgt, cfg):
    """src, tgt: (B, L, num_features) batch-first (as passed to the PyTorch forward)."""
    B, S, F = src.shape
    T = tgt.shape[1]
    D = cfg["d_model"]
    H = cfg["nhead"]
    NE = cfg["num_encoder_layers"]
    ND = cfg["num_decoder_layers"]
    assert D % H == 0

    pe = params["pe"]
    assert S <= pe.shape[0] and T <= pe.shape[0], "sequence longer than PE table"

    src2 = src.astype(jnp.float32).reshape(B * S, F)
    tgt2 = tgt.astype(jnp.float32).reshape(B * T, F)
    pe_s = pe[:S]
    pe_t = pe[:T]

    # Hoisted causal (square subsequent) mask as an additive bias — built ONCE here.
    rows = jnp.arange(T, dtype=jnp.int32)[:, None]
    cols = jnp.arange(T, dtype=jnp.int32)[None, :]
    causal = jnp.where(cols > rows, NEG_INF, 0.0).astype(jnp.float32)

    el = params["enc_layers"]
    dl = params["dec_layers"]

    inputs = [
        src2, tgt2, pe_s, pe_t, causal,
        params["enc_w"], params["enc_b"], params["dec_w"], params["dec_b"],
        el["wqkv"], el["bqkv"], el["wo"], el["bo"], el["ln1_g"], el["ln1_b"],
        el["w1"], el["b1"], el["w2"], el["b2"], el["ln2_g"], el["ln2_b"],
        dl["sa_wqkv"], dl["sa_bqkv"], dl["sa_wo"], dl["sa_bo"], dl["ln1_g"], dl["ln1_b"],
        dl["ca_wq"], dl["ca_bq"], dl["ca_wkv"], dl["ca_bkv"], dl["ca_wo"], dl["ca_bo"],
        dl["ln2_g"], dl["ln2_b"],
        dl["w1"], dl["b1"], dl["w2"], dl["b2"], dl["ln3_g"], dl["ln3_b"],
        params["enc_ln_g"], params["enc_ln_b"], params["dec_ln_g"], params["dec_ln_b"],
        params["fc_w"], params["fc_b"],
    ]

    def batch_spec(rows_, cols_):
        # one batch element's rows per grid step
        return pl.BlockSpec((rows_, cols_), lambda b: (b, 0))

    def const_spec(a):
        # whole array, same block every grid step (weights never re-fetched)
        nd = a.ndim
        return pl.BlockSpec(a.shape, lambda b, _n=nd: (0,) * _n)

    in_specs = [batch_spec(S, F), batch_spec(T, F)] + [const_spec(a) for a in inputs[2:]]

    y = pl.pallas_call(
        functools.partial(_fused_forward_kernel,
                          nhead=H, num_enc=NE, num_dec=ND, d_model=D),
        out_shape=jax.ShapeDtypeStruct((B * T, F), jnp.float32),
        grid=(B,),
        in_specs=in_specs,
        out_specs=batch_spec(T, F),
        # batch axis is independent -> feeds both TensorCores on v7x;
        # on single-TC v5e/v6e it is just B sequential steps of the one fused kernel.
        compiler_params=pltpu.CompilerParams(dimension_semantics=("parallel",)),
    )(*inputs)
    return y.reshape(B, T, F)


# --------------------------------- parameter init ------------------------------- #

def init_params(key, cfg, max_len=64):
    F = cfg["num_features"]
    D = cfg["d_model"]
    DFF = cfg["dim_feedforward"]
    NE = cfg["num_encoder_layers"]
    ND = cfg["num_decoder_layers"]

    keys = iter(jax.random.split(key, 64))

    def w(shape, scale=0.05):
        return scale * jax.random.normal(next(keys), shape, jnp.float32)

    def zeros(shape):
        return jnp.zeros(shape, jnp.float32)

    def ones(shape):
        return jnp.ones(shape, jnp.float32)

    enc_layers = dict(
        wqkv=w((NE, D, 3 * D)), bqkv=zeros((NE, 1, 3 * D)),
        wo=w((NE, D, D)), bo=zeros((NE, 1, D)),
        ln1_g=ones((NE, 1, D)), ln1_b=zeros((NE, 1, D)),
        w1=w((NE, D, DFF)), b1=zeros((NE, 1, DFF)),
        w2=w((NE, DFF, D)), b2=zeros((NE, 1, D)),
        ln2_g=ones((NE, 1, D)), ln2_b=zeros((NE, 1, D)),
    )
    dec_layers = dict(
        sa_wqkv=w((ND, D, 3 * D)), sa_bqkv=zeros((ND, 1, 3 * D)),
        sa_wo=w((ND, D, D)), sa_bo=zeros((ND, 1, D)),
        ln1_g=ones((ND, 1, D)), ln1_b=zeros((ND, 1, D)),
        ca_wq=w((ND, D, D)), ca_bq=zeros((ND, 1, D)),
        ca_wkv=w((ND, D, 2 * D)), ca_bkv=zeros((ND, 1, 2 * D)),
        ca_wo=w((ND, D, D)), ca_bo=zeros((ND, 1, D)),
        ln2_g=ones((ND, 1, D)), ln2_b=zeros((ND, 1, D)),
        w1=w((ND, D, DFF)), b1=zeros((ND, 1, DFF)),
        w2=w((ND, DFF, D)), b2=zeros((ND, 1, D)),
        ln3_g=ones((ND, 1, D)), ln3_b=zeros((ND, 1, D)),
    )

    # sinusoidal positional-encoding table (same formula as PositionalEncoding)
    pos = jnp.arange(max_len, dtype=jnp.float32)[:, None]
    div = jnp.exp(jnp.arange(0, D, 2, dtype=jnp.float32) * (-math.log(10000.0) / D))
    pe = jnp.zeros((max_len, D), jnp.float32)
    pe = pe.at[:, 0::2].set(jnp.sin(pos * div))
    pe = pe.at[:, 1::2].set(jnp.cos(pos * div))

    return dict(
        enc_w=w((F, D)), enc_b=zeros((1, D)),
        dec_w=w((F, D)), dec_b=zeros((1, D)),
        pe=pe,
        enc_layers=enc_layers, dec_layers=dec_layers,
        enc_ln_g=ones((1, D)), enc_ln_b=zeros((1, D)),
        dec_ln_g=ones((1, D)), dec_ln_b=zeros((1, D)),
        fc_w=w((D, F)), fc_b=zeros((1, F)),
    )


# -------------------------------------- main ------------------------------------ #

if __name__ == "__main__":
    cfg = dict(num_features=4, d_model=32, nhead=4,
               num_encoder_layers=2, num_decoder_layers=2,
               dim_feedforward=64)

    key = jax.random.PRNGKey(0)
    kp, ks, kt = jax.random.split(key, 3)

    params = init_params(kp, cfg)

    B, S, T = 2, 8, 8
    src = jax.random.normal(ks, (B, S, cfg["num_features"]), jnp.float32)
    tgt = jax.random.normal(kt, (B, T, cfg["num_features"]), jnp.float32)

    fwd = jax.jit(lambda p, s, t: forward(p, s, t, cfg))
    out = jax.block_until_ready(fwd(params, src, tgt))

    assert out.shape == (B, T, cfg["num_features"]), out.shape
    assert bool(jnp.all(jnp.isfinite(out)))
    print("KERNEL_OK")
</pallas_src>

<mosaic_0001>
module attributes {stable_mosaic.version = 11 : i64} {
  func.func @_fused_forward_kernel(%arg0: i32, %arg1: memref<8x4xf32, #tpu.memory_space<vmem>>, %arg2: memref<8x4xf32, #tpu.memory_space<vmem>>, %arg3: memref<8x32xf32, #tpu.memory_space<vmem>>, %arg4: memref<8x32xf32, #tpu.memory_space<vmem>>, %arg5: memref<8x8xf32, #tpu.memory_space<vmem>>, %arg6: memref<4x32xf32, #tpu.memory_space<vmem>>, %arg7: memref<1x32xf32, #tpu.memory_space<vmem>>, %arg8: memref<4x32xf32, #tpu.memory_space<vmem>>, %arg9: memref<1x32xf32, #tpu.memory_space<vmem>>, %arg10: memref<2x32x96xf32, #tpu.memory_space<vmem>>, %arg11: memref<2x1x96xf32, #tpu.memory_space<vmem>>, %arg12: memref<2x32x32xf32, #tpu.memory_space<vmem>>, %arg13: memref<2x1x32xf32, #tpu.memory_space<vmem>>, %arg14: memref<2x1x32xf32, #tpu.memory_space<vmem>>, %arg15: memref<2x1x32xf32, #tpu.memory_space<vmem>>, %arg16: memref<2x32x64xf32, #tpu.memory_space<vmem>>, %arg17: memref<2x1x64xf32, #tpu.memory_space<vmem>>, %arg18: memref<2x64x32xf32, #tpu.memory_space<vmem>>, %arg19: memref<2x1x32xf32, #tpu.memory_space<vmem>>, %arg20: memref<2x1x32xf32, #tpu.memory_space<vmem>>, %arg21: memref<2x1x32xf32, #tpu.memory_space<vmem>>, %arg22: memref<2x32x96xf32, #tpu.memory_space<vmem>>, %arg23: memref<2x1x96xf32, #tpu.memory_space<vmem>>, %arg24: memref<2x32x32xf32, #tpu.memory_space<vmem>>, %arg25: memref<2x1x32xf32, #tpu.memory_space<vmem>>, %arg26: memref<2x1x32xf32, #tpu.memory_space<vmem>>, %arg27: memref<2x1x32xf32, #tpu.memory_space<vmem>>, %arg28: memref<2x32x32xf32, #tpu.memory_space<vmem>>, %arg29: memref<2x1x32xf32, #tpu.memory_space<vmem>>, %arg30: memref<2x32x64xf32, #tpu.memory_space<vmem>>, %arg31: memref<2x1x64xf32, #tpu.memory_space<vmem>>, %arg32: memref<2x32x32xf32, #tpu.memory_space<vmem>>, %arg33: memref<2x1x32xf32, #tpu.memory_space<vmem>>, %arg34: memref<2x1x32xf32, #tpu.memory_space<vmem>>, %arg35: memref<2x1x32xf32, #tpu.memory_space<vmem>>, %arg36: memref<2x32x64xf32, #tpu.memory_space<vmem>>, %arg37: memref<2x1x64xf32, #tpu.memory_space<vmem>>, %arg38: memref<2x64x32xf32, #tpu.memory_space<vmem>>, %arg39: memref<2x1x32xf32, #tpu.memory_space<vmem>>, %arg40: memref<2x1x32xf32, #tpu.memory_space<vmem>>, %arg41: memref<2x1x32xf32, #tpu.memory_space<vmem>>, %arg42: memref<1x32xf32, #tpu.memory_space<vmem>>, %arg43: memref<1x32xf32, #tpu.memory_space<vmem>>, %arg44: memref<1x32xf32, #tpu.memory_space<vmem>>, %arg45: memref<1x32xf32, #tpu.memory_space<vmem>>, %arg46: memref<32x4xf32, #tpu.memory_space<vmem>>, %arg47: memref<1x4xf32, #tpu.memory_space<vmem>>, %arg48: memref<8x4xf32, #tpu.memory_space<vmem>>) attributes {dimension_semantics = [#tpu.dimension_semantics<parallel>], iteration_bounds = array<i64: 2>, scalar_prefetch = 0 : i64, scratch_operands = 0 : i64, tpu.core_type = #tpu.core_type<tc>, window_params = [{transform_indices = @transform_0, window_bounds = array<i64: 8, 4>}, {transform_indices = @transform_1, window_bounds = array<i64: 8, 4>}, {pipeline_mode = #tpu.pipeline_mode<synchronous>, transform_indices = @transform_2, window_bounds = array<i64: 8, 32>}, {pipeline_mode = #tpu.pipeline_mode<synchronous>, transform_indices = @transform_3, window_bounds = array<i64: 8, 32>}, {pipeline_mode = #tpu.pipeline_mode<synchronous>, transform_indices = @transform_4, window_bounds = array<i64: 8, 8>}, {pipeline_mode = #tpu.pipeline_mode<synchronous>, transform_indices = @transform_5, window_bounds = array<i64: 4, 32>}, {pipeline_mode = #tpu.pipeline_mode<synchronous>, transform_indices = @transform_6, window_bounds = array<i64: 1, 32>}, {pipeline_mode = #tpu.pipeline_mode<synchronous>, transform_indices = @transform_7, window_bounds = array<i64: 4, 32>}, {pipeline_mode = #tpu.pipeline_mode<synchronous>, transform_indices = @transform_8, window_bounds = array<i64: 1, 32>}, {pipeline_mode = #tpu.pipeline_mode<synchronous>, transform_indices = @transform_9, window_bounds = array<i64: 2, 32, 96>}, {pipeline_mode = #tpu.pipeline_mode<synchronous>, transform_indices = @transform_10, window_bounds = array<i64: 2, 1, 96>}, {pipeline_mode = #tpu.pipeline_mode<synchronous>, transform_indices = @transform_11, window_bounds = array<i64: 2, 32, 32>}, {pipeline_mode = #tpu.pipeline_mode<synchronous>, transform_indices = @transform_12, window_bounds = array<i64: 2, 1, 32>}, {pipeline_mode = #tpu.pipeline_mode<synchronous>, transform_indices = @transform_13, window_bounds = array<i64: 2, 1, 32>}, {pipeline_mode = #tpu.pipeline_mode<synchronous>, transform_indices = @transform_14, window_bounds = array<i64: 2, 1, 32>}, {pipeline_mode = #tpu.pipeline_mode<synchronous>, transform_indices = @transform_15, window_bounds = array<i64: 2, 32, 64>}, {pipeline_mode = #tpu.pipeline_mode<synchronous>, transform_indices = @transform_16, window_bounds = array<i64: 2, 1, 64>}, {pipeline_mode = #tpu.pipeline_mode<synchronous>, transform_indices = @transform_17, window_bounds = array<i64: 2, 64, 32>}, {pipeline_mode = #tpu.pipeline_mode<synchronous>, transform_indices = @transform_18, window_bounds = array<i64: 2, 1, 32>}, {pipeline_mode = #tpu.pipeline_mode<synchronous>, transform_indices = @transform_19, window_bounds = array<i64: 2, 1, 32>}, {pipeline_mode = #tpu.pipeline_mode<synchronous>, transform_indices = @transform_20, window_bounds = array<i64: 2, 1, 32>}, {pipeline_mode = #tpu.pipeline_mode<synchronous>, transform_indices = @transform_21, window_bounds = array<i64: 2, 32, 96>}, {pipeline_mode = #tpu.pipeline_mode<synchronous>, transform_indices = @transform_22, window_bounds = array<i64: 2, 1, 96>}, {pipeline_mode = #tpu.pipeline_mode<synchronous>, transform_indices = @transform_23, window_bounds = array<i64: 2, 32, 32>}, {pipeline_mode = #tpu.pipeline_mode<synchronous>, transform_indices = @transform_24, window_bounds = array<i64: 2, 1, 32>}, {pipeline_mode = #tpu.pipeline_mode<synchronous>, transform_indices = @transform_25, window_bounds = array<i64: 2, 1, 32>}, {pipeline_mode = #tpu.pipeline_mode<synchronous>, transform_indices = @transform_26, window_bounds = array<i64: 2, 1, 32>}, {pipeline_mode = #tpu.pipeline_mode<synchronous>, transform_indices = @transform_27, window_bounds = array<i64: 2, 32, 32>}, {pipeline_mode = #tpu.pipeline_mode<synchronous>, transform_indices = @transform_28, window_bounds = array<i64: 2, 1, 32>}, {pipeline_mode = #tpu.pipeline_mode<synchronous>, transform_indices = @transform_29, window_bounds = array<i64: 2, 32, 64>}, {pipeline_mode = #tpu.pipeline_mode<synchronous>, transform_indices = @transform_30, window_bounds = array<i64: 2, 1, 64>}, {pipeline_mode = #tpu.pipeline_mode<synchronous>, transform_indices = @transform_31, window_bounds = array<i64: 2, 32, 32>}, {pipeline_mode = #tpu.pipeline_mode<synchronous>, transform_indices = @transform_32, window_bounds = array<i64: 2, 1, 32>}, {pipeline_mode = #tpu.pipeline_mode<synchronous>, transform_indices = @transform_33, window_bounds = array<i64: 2, 1, 32>}, {pipeline_mode = #tpu.pipeline_mode<synchronous>, transform_indices = @transform_34, window_bounds = array<i64: 2, 1, 32>}, {pipeline_mode = #tpu.pipeline_mode<synchronous>, transform_indices = @transform_35, window_bounds = array<i64: 2, 32, 64>}, {pipeline_mode = #tpu.pipeline_mode<synchronous>, transform_indices = @transform_36, window_bounds = array<i64: 2, 1, 64>}, {pipeline_mode = #tpu.pipeline_mode<synchronous>, transform_indices = @transform_37, window_bounds = array<i64: 2, 64, 32>}, {pipeline_mode = #tpu.pipeline_mode<synchronous>, transform_indices = @transform_38, window_bounds = array<i64: 2, 1, 32>}, {pipeline_mode = #tpu.pipeline_mode<synchronous>, transform_indices = @transform_39, window_bounds = array<i64: 2, 1, 32>}, {pipeline_mode = #tpu.pipeline_mode<synchronous>, transform_indices = @transform_40, window_bounds = array<i64: 2, 1, 32>}, {pipeline_mode = #tpu.pipeline_mode<synchronous>, transform_indices = @transform_41, window_bounds = array<i64: 1, 32>}, {pipeline_mode = #tpu.pipeline_mode<synchronous>, transform_indices = @transform_42, window_bounds = array<i64: 1, 32>}, {pipeline_mode = #tpu.pipeline_mode<synchronous>, transform_indices = @transform_43, window_bounds = array<i64: 1, 32>}, {pipeline_mode = #tpu.pipeline_mode<synchronous>, transform_indices = @transform_44, window_bounds = array<i64: 1, 32>}, {pipeline_mode = #tpu.pipeline_mode<synchronous>, transform_indices = @transform_45, window_bounds = array<i64: 32, 4>}, {pipeline_mode = #tpu.pipeline_mode<synchronous>, transform_indices = @transform_46, window_bounds = array<i64: 1, 4>}, {transform_indices = @transform_47, window_bounds = array<i64: 8, 4>}]} {
    %c0 = arith.constant 0 : index
    %c0_0 = arith.constant 0 : index
    %0 = vector.load %arg1[%c0, %c0_0] : memref<8x4xf32, #tpu.memory_space<vmem>>, vector<8x4xf32>
    %c0_1 = arith.constant 0 : index
    %c0_2 = arith.constant 0 : index
    %1 = vector.load %arg6[%c0_1, %c0_2] : memref<4x32xf32, #tpu.memory_space<vmem>>, vector<4x32xf32>
    %cst = arith.constant dense<0.000000e+00> : vector<8x32xf32>
    %2 = tpu.matmul %0, %1, %cst {dimension_numbers = #tpu.dot_dimension_numbers<[1], [0], [0], [1], [0, 0, 1, 1], [], []>} : vector<8x4xf32>, vector<4x32xf32>, vector<8x32xf32> -> vector<8x32xf32>
    %c0_3 = arith.constant 0 : index
    %c0_4 = arith.constant 0 : index
    %3 = vector.load %arg7[%c0_3, %c0_4] : memref<1x32xf32, #tpu.memory_space<vmem>>, vector<1x32xf32>
    %4 = vector.broadcast %3 : vector<1x32xf32> to vector<8x32xf32>
    %5 = arith.addf %2, %4 : vector<8x32xf32>
    %cst_5 = arith.constant 5.65685415 : f32
    %6 = vector.broadcast %cst_5 : f32 to vector<8x32xf32>
    %7 = arith.mulf %5, %6 : vector<8x32xf32>
    %c0_6 = arith.constant 0 : index
    %c0_7 = arith.constant 0 : index
    %8 = vector.load %arg3[%c0_6, %c0_7] : memref<8x32xf32, #tpu.memory_space<vmem>>, vector<8x32xf32>
    %9 = arith.addf %7, %8 : vector<8x32xf32>
    %c0_8 = arith.constant 0 : index
    %c0_9 = arith.constant 0 : index
    %10 = vector.load %arg2[%c0_8, %c0_9] : memref<8x4xf32, #tpu.memory_space<vmem>>, vector<8x4xf32>
    %c0_10 = arith.constant 0 : index
    %c0_11 = arith.constant 0 : index
    %11 = vector.load %arg8[%c0_10, %c0_11] : memref<4x32xf32, #tpu.memory_space<vmem>>, vector<4x32xf32>
    %cst_12 = arith.constant dense<0.000000e+00> : vector<8x32xf32>
    %12 = tpu.matmul %10, %11, %cst_12 {dimension_numbers = #tpu.dot_dimension_numbers<[1], [0], [0], [1], [0, 0, 1, 1], [], []>} : vector<8x4xf32>, vector<4x32xf32>, vector<8x32xf32> -> vector<8x32xf32>
    %c0_13 = arith.constant 0 : index
    %c0_14 = arith.constant 0 : index
    %13 = vector.load %arg9[%c0_13, %c0_14] : memref<1x32xf32, #tpu.memory_space<vmem>>, vector<1x32xf32>
    %14 = vector.broadcast %13 : vector<1x32xf32> to vector<8x32xf32>
    %15 = arith.addf %12, %14 : vector<8x32xf32>
    %cst_15 = arith.constant 5.65685415 : f32
    %16 = vector.broadcast %cst_15 : f32 to vector<8x32xf32>
    %17 = arith.mulf %15, %16 : vector<8x32xf32>
    %c0_16 = arith.constant 0 : index
    %c0_17 = arith.constant 0 : index
    %18 = vector.load %arg4[%c0_16, %c0_17] : memref<8x32xf32, #tpu.memory_space<vmem>>, vector<8x32xf32>
    %19 = arith.addf %17, %18 : vector<8x32xf32>
    %c0_18 = arith.constant 0 : index
    %c0_19 = arith.constant 0 : index
    %20 = vector.load %arg5[%c0_18, %c0_19] : memref<8x8xf32, #tpu.memory_space<vmem>>, vector<8x8xf32>
    %c0_20 = arith.constant 0 : index
    %c0_21 = arith.constant 0 : index
    %c0_22 = arith.constant 0 : index
    %21 = vector.load %arg10[%c0_20, %c0_21, %c0_22] : memref<2x32x96xf32, #tpu.memory_space<vmem>>, vector<1x32x96xf32>
    %22 = vector.shape_cast %21 : vector<1x32x96xf32> to vector<32x96xf32>
    %cst_23 = arith.constant dense<0.000000e+00> : vector<8x96xf32>
    %23 = tpu.matmul %9, %22, %cst_23 {dimension_numbers = #tpu.dot_dimension_numbers<[1], [0], [0], [1], [0, 0, 1, 1], [], []>} : vector<8x32xf32>, vector<32x96xf32>, vector<8x96xf32> -> vector<8x96xf32>
    %c0_24 = arith.constant 0 : index
    %c0_25 = arith.constant 0 : index
    %c0_26 = arith.constant 0 : index
    %24 = vector.load %arg11[%c0_24, %c0_25, %c0_26] : memref<2x1x96xf32, #tpu.memory_space<vmem>>, vector<1x1x96xf32>
    %25 = vector.shape_cast %24 : vector<1x1x96xf32> to vector<1x96xf32>
    %26 = vector.broadcast %25 : vector<1x96xf32> to vector<8x96xf32>
    %27 = arith.addf %23, %26 : vector<8x96xf32>
    %28 = vector.extract_strided_slice %27 {offsets = [0, 0], sizes = [8, 32], strides = [1, 1]} : vector<8x96xf32> to vector<8x32xf32>
    %29 = vector.extract_strided_slice %27 {offsets = [0, 32], sizes = [8, 32], strides = [1, 1]} : vector<8x96xf32> to vector<8x32xf32>
    %30 = vector.extract_strided_slice %27 {offsets = [0, 64], sizes = [8, 32], strides = [1, 1]} : vector<8x96xf32> to vector<8x32xf32>
    %c0_27 = arith.constant 0 : index
    %c0_28 = arith.constant 0 : index
    %c0_29 = arith.constant 0 : index
    %31 = vector.load %arg12[%c0_27, %c0_28, %c0_29] : memref<2x32x32xf32, #tpu.memory_space<vmem>>, vector<1x32x32xf32>
    %32 = vector.shape_cast %31 : vector<1x32x32xf32> to vector<32x32xf32>
    %c0_30 = arith.constant 0 : index
    %c0_31 = arith.constant 0 : index
    %c0_32 = arith.constant 0 : index
    %33 = vector.load %arg13[%c0_30, %c0_31, %c0_32] : memref<2x1x32xf32, #tpu.memory_space<vmem>>, vector<1x1x32xf32>
    %34 = vector.shape_cast %33 : vector<1x1x32xf32> to vector<1x32xf32>
    %35 = vector.extract_strided_slice %28 {offsets = [0, 0], sizes = [8, 8], strides = [1, 1]} : vector<8x32xf32> to vector<8x8xf32>
    %36 = vector.extract_strided_slice %29 {offsets = [0, 0], sizes = [8, 8], strides = [1, 1]} : vector<8x32xf32> to vector<8x8xf32>
    %37 = vector.extract_strided_slice %30 {offsets = [0, 0], sizes = [8, 8], strides = [1, 1]} : vector<8x32xf32> to vector<8x8xf32>
    "tpu.trace_start"() <{level = 10 : i32, message = "qd,kd->qk"}> : () -> ()
    %cst_33 = arith.constant dense<0.000000e+00> : vector<8x8xf32>
    %38 = tpu.matmul %35, %36, %cst_33 {dimension_numbers = #tpu.dot_dimension_numbers<[1], [1], [0], [0], [0, 0, 1, 0], [], []>} : vector<8x8xf32>, vector<8x8xf32>, vector<8x8xf32> -> vector<8x8xf32>
    "tpu.trace_stop"() : () -> ()
    %cst_34 = arith.constant 0.353553385 : f32
    %39 = vector.broadcast %cst_34 : f32 to vector<8x8xf32>
    %40 = arith.mulf %38, %39 : vector<8x8xf32>
    %cst_35 = arith.constant dense<0xFF800000> : vector<8xf32>
    %41 = vector.multi_reduction <maximumf>, %40, %cst_35 [1] : vector<8x8xf32> to vector<8xf32>
    %42 = vector.shape_cast %41 : vector<8xf32> to vector<8x1xf32>
    %43 = vector.broadcast %42 : vector<8x1xf32> to vector<8x8xf32>
    %44 = arith.subf %40, %43 : vector<8x8xf32>
    %45 = math.exp %44 : vector<8x8xf32>
    %cst_36 = arith.constant dense<0.000000e+00> : vector<8xf32>
    %46 = vector.multi_reduction <add>, %45, %cst_36 [1] : vector<8x8xf32> to vector<8xf32>
    %47 = vector.shape_cast %46 : vector<8xf32> to vector<8x1xf32>
    %48 = vector.broadcast %47 : vector<8x1xf32> to vector<8x8xf32>
    %49 = arith.divf %45, %48 : vector<8x8xf32>
    %cst_37 = arith.constant dense<0.000000e+00> : vector<8x8xf32>
    %50 = tpu.matmul %49, %37, %cst_37 {dimension_numbers = #tpu.dot_dimension_numbers<[1], [0], [0], [1], [0, 0, 1, 1], [], []>} : vector<8x8xf32>, vector<8x8xf32>, vector<8x8xf32> -> vector<8x8xf32>
    %51 = vector.extract_strided_slice %28 {offsets = [0, 8], sizes = [8, 8], strides = [1, 1]} : vector<8x32xf32> to vector<8x8xf32>
    %52 = vector.extract_strided_slice %29 {offsets = [0, 8], sizes = [8, 8], strides = [1, 1]} : vector<8x32xf32> to vector<8x8xf32>
    %53 = vector.extract_strided_slice %30 {offsets = [0, 8], sizes = [8, 8], strides = [1, 1]} : vector<8x32xf32> to vector<8x8xf32>
    "tpu.trace_start"() <{level = 10 : i32, message = "qd,kd->qk"}> : () -> ()
    %cst_38 = arith.constant dense<0.000000e+00> : vector<8x8xf32>
    %54 = tpu.matmul %51, %52, %cst_38 {dimension_numbers = #tpu.dot_dimension_numbers<[1], [1], [0], [0], [0, 0, 1, 0], [], []>} : vector<8x8xf32>, vector<8x8xf32>, vector<8x8xf32> -> vector<8x8xf32>
    "tpu.trace_stop"() : () -> ()
    %cst_39 = arith.constant 0.353553385 : f32
    %55 = vector.broadcast %cst_39 : f32 to vector<8x8xf32>
    %56 = arith.mulf %54, %55 : vector<8x8xf32>
    %cst_40 = arith.constant dense<0xFF800000> : vector<8xf32>
    %57 = vector.multi_reduction <maximumf>, %56, %cst_40 [1] : vector<8x8xf32> to vector<8xf32>
    %58 = vector.shape_cast %57 : vector<8xf32> to vector<8x1xf32>
    %59 = vector.broadcast %58 : vector<8x1xf32> to vector<8x8xf32>
    %60 = arith.subf %56, %59 : vector<8x8xf32>
    %61 = math.exp %60 : vector<8x8xf32>
    %cst_41 = arith.constant dense<0.000000e+00> : vector<8xf32>
    %62 = vector.multi_reduction <add>, %61, %cst_41 [1] : vector<8x8xf32> to vector<8xf32>
    %63 = vector.shape_cast %62 : vector<8xf32> to vector<8x1xf32>
    %64 = vector.broadcast %63 : vector<8x1xf32> to vector<8x8xf32>
    %65 = arith.divf %61, %64 : vector<8x8xf32>
    %cst_42 = arith.constant dense<0.000000e+00> : vector<8x8xf32>
    %66 = tpu.matmul %65, %53, %cst_42 {dimension_numbers = #tpu.dot_dimension_numbers<[1], [0], [0], [1], [0, 0, 1, 1], [], []>} : vector<8x8xf32>, vector<8x8xf32>, vector<8x8xf32> -> vector<8x8xf32>
    %67 = vector.extract_strided_slice %28 {offsets = [0, 16], sizes = [8, 8], strides = [1, 1]} : vector<8x32xf32> to vector<8x8xf32>
    %68 = vector.extract_strided_slice %29 {offsets = [0, 16], sizes = [8, 8], strides = [1, 1]} : vector<8x32xf32> to vector<8x8xf32>
    %69 = vector.extract_strided_slice %30 {offsets = [0, 16], sizes = [8, 8], strides = [1, 1]} : vector<8x32xf32> to vector<8x8xf32>
    "tpu.trace_start"() <{level = 10 : i32, message = "qd,kd->qk"}> : () -> ()
    %cst_43 = arith.constant dense<0.000000e+00> : vector<8x8xf32>
    %70 = tpu.matmul %67, %68, %cst_43 {dimension_numbers = #tpu.dot_dimension_numbers<[1], [1], [0], [0], [0, 0, 1, 0], [], []>} : vector<8x8xf32>, vector<8x8xf32>, vector<8x8xf32> -> vector<8x8xf32>
    "tpu.trace_stop"() : () -> ()
    %cst_44 = arith.constant 0.353553385 : f32
    %71 = vector.broadcast %cst_44 : f32 to vector<8x8xf32>
    %72 = arith.mulf %70, %71 : vector<8x8xf32>
    %cst_45 = arith.constant dense<0xFF800000> : vector<8xf32>
    %73 = vector.multi_reduction <maximumf>, %72, %cst_45 [1] : vector<8x8xf32> to vector<8xf32>
    %74 = vector.shape_cast %73 : vector<8xf32> to vector<8x1xf32>
    %75 = vector.broadcast %74 : vector<8x1xf32> to vector<8x8xf32>
    %76 = arith.subf %72, %75 : vector<8x8xf32>
    %77 = math.exp %76 : vector<8x8xf32>
    %cst_46 = arith.constant dense<0.000000e+00> : vector<8xf32>
    %78 = vector.multi_reduction <add>, %77, %cst_46 [1] : vector<8x8xf32> to vector<8xf32>
    %79 = vector.shape_cast %78 : vector<8xf32> to vector<8x1xf32>
    %80 = vector.broadcast %79 : vector<8x1xf32> to vector<8x8xf32>
    %81 = arith.divf %77, %80 : vector<8x8xf32>
    %cst_47 = arith.constant dense<0.000000e+00> : vector<8x8xf32>
    %82 = tpu.matmul %81, %69, %cst_47 {dimension_numbers = #tpu.dot_dimension_numbers<[1], [0], [0], [1], [0, 0, 1, 1], [], []>} : vector<8x8xf32>, vector<8x8xf32>, vector<8x8xf32> -> vector<8x8xf32>
    %83 = vector.extract_strided_slice %28 {offsets = [0, 24], sizes = [8, 8], strides = [1, 1]} : vector<8x32xf32> to vector<8x8xf32>
    %84 = vector.extract_strided_slice %29 {offsets = [0, 24], sizes = [8, 8], strides = [1, 1]} : vector<8x32xf32> to vector<8x8xf32>
    %85 = vector.extract_strided_slice %30 {offsets = [0, 24], sizes = [8, 8], strides = [1, 1]} : vector<8x32xf32> to vector<8x8xf32>
    "tpu.trace_start"() <{level = 10 : i32, message = "qd,kd->qk"}> : () -> ()
    %cst_48 = arith.constant dense<0.000000e+00> : vector<8x8xf32>
    %86 = tpu.matmul %83, %84, %cst_48 {dimension_numbers = #tpu.dot_dimension_numbers<[1], [1], [0], [0], [0, 0, 1, 0], [], []>} : vector<8x8xf32>, vector<8x8xf32>, vector<8x8xf32> -> vector<8x8xf32>
    "tpu.trace_stop"() : () -> ()
    %cst_49 = arith.constant 0.353553385 : f32
    %87 = vector.broadcast %cst_49 : f32 to vector<8x8xf32>
    %88 = arith.mulf %86, %87 : vector<8x8xf32>
    %cst_50 = arith.constant dense<0xFF800000> : vector<8xf32>
    %89 = vector.multi_reduction <maximumf>, %88, %cst_50 [1] : vector<8x8xf32> to vector<8xf32>
    %90 = vector.shape_cast %89 : vector<8xf32> to vector<8x1xf32>
    %91 = vector.broadcast %90 : vector<8x1xf32> to vector<8x8xf32>
    %92 = arith.subf %88, %91 : vector<8x8xf32>
    %93 = math.exp %92 : vector<8x8xf32>
    %cst_51 = arith.constant dense<0.000000e+00> : vector<8xf32>
    %94 = vector.multi_reduction <add>, %93, %cst_51 [1] : vector<8x8xf32> to vector<8xf32>
    %95 = vector.shape_cast %94 : vector<8xf32> to vector<8x1xf32>
    %96 = vector.broadcast %95 : vector<8x1xf32> to vector<8x8xf32>
    %97 = arith.divf %93, %96 : vector<8x8xf32>
    %cst_52 = arith.constant dense<0.000000e+00> : vector<8x8xf32>
    %98 = tpu.matmul %97, %85, %cst_52 {dimension_numbers = #tpu.dot_dimension_numbers<[1], [0], [0], [1], [0, 0, 1, 1], [], []>} : vector<8x8xf32>, vector<8x8xf32>, vector<8x8xf32> -> vector<8x8xf32>
    %99 = tpu.concatenate %50, %66, %82, %98 in 1 : vector<8x8xf32>, vector<8x8xf32>, vector<8x8xf32>, vector<8x8xf32> -> vector<8x32xf32>
    %cst_53 = arith.constant dense<0.000000e+00> : vector<8x32xf32>
    %100 = tpu.matmul %99, %32, %cst_53 {dimension_numbers = #tpu.dot_dimension_numbers<[1], [0], [0], [1], [0, 0, 1, 1], [], []>} : vector<8x32xf32>, vector<32x32xf32>, vector<8x32xf32> -> vector<8x32xf32>
    %101 = vector.broadcast %34 : vector<1x32xf32> to vector<8x32xf32>
    %102 = arith.addf %100, %101 : vector<8x32xf32>
    %103 = arith.addf %9, %102 : vector<8x32xf32>
    %c0_54 = arith.constant 0 : index
    %c0_55 = arith.constant 0 : index
    %c0_56 = arith.constant 0 : index
    %104 = vector.load %arg14[%c0_54, %c0_55, %c0_56] : memref<2x1x32xf32, #tpu.memory_space<vmem>>, vector<1x1x32xf32>
    %105 = vector.shape_cast %104 : vector<1x1x32xf32> to vector<1x32xf32>
    %c0_57 = arith.constant 0 : index
    %c0_58 = arith.constant 0 : index
    %c0_59 = arith.constant 0 : index
    %106 = vector.load %arg15[%c0_57, %c0_58, %c0_59] : memref<2x1x32xf32, #tpu.memory_space<vmem>>, vector<1x1x32xf32>
    %107 = vector.shape_cast %106 : vector<1x1x32xf32> to vector<1x32xf32>
    %cst_60 = arith.constant dense<0.000000e+00> : vector<8xf32>
    %108 = vector.multi_reduction <add>, %103, %cst_60 [1] : vector<8x32xf32> to vector<8xf32>
    %109 = vector.shape_cast %108 : vector<8xf32> to vector<8x1xf32>
    %cst_61 = arith.constant 3.200000e+01 : f32
    %110 = vector.broadcast %cst_61 : f32 to vector<8x1xf32>
    %111 = arith.divf %109, %110 : vector<8x1xf32>
    %112 = vector.broadcast %111 : vector<8x1xf32> to vector<8x32xf32>
    %113 = arith.subf %103, %112 : vector<8x32xf32>
    %114 = arith.mulf %113, %113 : vector<8x32xf32>
    %cst_62 = arith.constant dense<0.000000e+00> : vector<8xf32>
    %115 = vector.multi_reduction <add>, %114, %cst_62 [1] : vector<8x32xf32> to vector<8xf32>
    %116 = vector.shape_cast %115 : vector<8xf32> to vector<8x1xf32>
    %cst_63 = arith.constant 3.200000e+01 : f32
    %117 = vector.broadcast %cst_63 : f32 to vector<8x1xf32>
    %118 = arith.divf %116, %117 : vector<8x1xf32>
    %cst_64 = arith.constant 9.99999974E-6 : f32
    %119 = vector.broadcast %cst_64 : f32 to vector<8x1xf32>
    %120 = arith.addf %118, %119 : vector<8x1xf32>
    %121 = math.rsqrt %120 : vector<8x1xf32>
    %122 = vector.broadcast %121 : vector<8x1xf32> to vector<8x32xf32>
    %123 = arith.mulf %113, %122 : vector<8x32xf32>
    %124 = vector.broadcast %105 : vector<1x32xf32> to vector<8x32xf32>
    %125 = arith.mulf %123, %124 : vector<8x32xf32>
    %126 = vector.broadcast %107 : vector<1x32xf32> to vector<8x32xf32>
    %127 = arith.addf %125, %126 : vector<8x32xf32>
    %c0_65 = arith.constant 0 : index
    %c0_66 = arith.constant 0 : index
    %c0_67 = arith.constant 0 : index
    %128 = vector.load %arg16[%c0_65, %c0_66, %c0_67] : memref<2x32x64xf32, #tpu.memory_space<vmem>>, vector<1x32x64xf32>
    %129 = vector.shape_cast %128 : vector<1x32x64xf32> to vector<32x64xf32>
    %cst_68 = arith.constant dense<0.000000e+00> : vector<8x64xf32>
    %130 = tpu.matmul %127, %129, %cst_68 {dimension_numbers = #tpu.dot_dimension_numbers<[1], [0], [0], [1], [0, 0, 1, 1], [], []>} : vector<8x32xf32>, vector<32x64xf32>, vector<8x64xf32> -> vector<8x64xf32>
    %c0_69 = arith.constant 0 : index
    %c0_70 = arith.constant 0 : index
    %c0_71 = arith.constant 0 : index
    %131 = vector.load %arg17[%c0_69, %c0_70, %c0_71] : memref<2x1x64xf32, #tpu.memory_space<vmem>>, vector<1x1x64xf32>
    %132 = vector.shape_cast %131 : vector<1x1x64xf32> to vector<1x64xf32>
    %133 = vector.broadcast %132 : vector<1x64xf32> to vector<8x64xf32>
    %134 = arith.addf %130, %133 : vector<8x64xf32>
    %cst_72 = arith.constant 0.000000e+00 : f32
    %135 = vector.broadcast %cst_72 : f32 to vector<8x64xf32>
    %136 = arith.maximumf %134, %135 : vector<8x64xf32>
    %c0_73 = arith.constant 0 : index
    %c0_74 = arith.constant 0 : index
    %c0_75 = arith.constant 0 : index
    %137 = vector.load %arg18[%c0_73, %c0_74, %c0_75] : memref<2x64x32xf32, #tpu.memory_space<vmem>>, vector<1x64x32xf32>
    %138 = vector.shape_cast %137 : vector<1x64x32xf32> to vector<64x32xf32>
    %cst_76 = arith.constant dense<0.000000e+00> : vector<8x32xf32>
    %139 = tpu.matmul %136, %138, %cst_76 {dimension_numbers = #tpu.dot_dimension_numbers<[1], [0], [0], [1], [0, 0, 1, 1], [], []>} : vector<8x64xf32>, vector<64x32xf32>, vector<8x32xf32> -> vector<8x32xf32>
    %c0_77 = arith.constant 0 : index
    %c0_78 = arith.constant 0 : index
    %c0_79 = arith.constant 0 : index
    %140 = vector.load %arg19[%c0_77, %c0_78, %c0_79] : memref<2x1x32xf32, #tpu.memory_space<vmem>>, vector<1x1x32xf32>
    %141 = vector.shape_cast %140 : vector<1x1x32xf32> to vector<1x32xf32>
    %142 = vector.broadcast %141 : vector<1x32xf32> to vector<8x32xf32>
    %143 = arith.addf %139, %142 : vector<8x32xf32>
    %144 = arith.addf %127, %143 : vector<8x32xf32>
    %c0_80 = arith.constant 0 : index
    %c0_81 = arith.constant 0 : index
    %c0_82 = arith.constant 0 : index
    %145 = vector.load %arg20[%c0_80, %c0_81, %c0_82] : memref<2x1x32xf32, #tpu.memory_space<vmem>>, vector<1x1x32xf32>
    %146 = vector.shape_cast %145 : vector<1x1x32xf32> to vector<1x32xf32>
    %c0_83 = arith.constant 0 : index
    %c0_84 = arith.constant 0 : index
    %c0_85 = arith.constant 0 : index
    %147 = vector.load %arg21[%c0_83, %c0_84, %c0_85] : memref<2x1x32xf32, #tpu.memory_space<vmem>>, vector<1x1x32xf32>
    %148 = vector.shape_cast %147 : vector<1x1x32xf32> to vector<1x32xf32>
    %cst_86 = arith.constant dense<0.000000e+00> : vector<8xf32>
    %149 = vector.multi_reduction <add>, %144, %cst_86 [1] : vector<8x32xf32> to vector<8xf32>
    %150 = vector.shape_cast %149 : vector<8xf32> to vector<8x1xf32>
    %cst_87 = arith.constant 3.200000e+01 : f32
    %151 = vector.broadcast %cst_87 : f32 to vector<8x1xf32>
    %152 = arith.divf %150, %151 : vector<8x1xf32>
    %153 = vector.broadcast %152 : vector<8x1xf32> to vector<8x32xf32>
    %154 = arith.subf %144, %153 : vector<8x32xf32>
    %155 = arith.mulf %154, %154 : vector<8x32xf32>
    %cst_88 = arith.constant dense<0.000000e+00> : vector<8xf32>
    %156 = vector.multi_reduction <add>, %155, %cst_88 [1] : vector<8x32xf32> to vector<8xf32>
    %157 = vector.shape_cast %156 : vector<8xf32> to vector<8x1xf32>
    %cst_89 = arith.constant 3.200000e+01 : f32
    %158 = vector.broadcast %cst_89 : f32 to vector<8x1xf32>
    %159 = arith.divf %157, %158 : vector<8x1xf32>
    %cst_90 = arith.constant 9.99999974E-6 : f32
    %160 = vector.broadcast %cst_90 : f32 to vector<8x1xf32>
    %161 = arith.addf %159, %160 : vector<8x1xf32>
    %162 = math.rsqrt %161 : vector<8x1xf32>
    %163 = vector.broadcast %162 : vector<8x1xf32> to vector<8x32xf32>
    %164 = arith.mulf %154, %163 : vector<8x32xf32>
    %165 = vector.broadcast %146 : vector<1x32xf32> to vector<8x32xf32>
    %166 = arith.mulf %164, %165 : vector<8x32xf32>
    %167 = vector.broadcast %148 : vector<1x32xf32> to vector<8x32xf32>
    %168 = arith.addf %166, %167 : vector<8x32xf32>
    %c1 = arith.constant 1 : index
    %c0_91 = arith.constant 0 : index
    %c0_92 = arith.constant 0 : index
    %169 = vector.load %arg10[%c1, %c0_91, %c0_92] : memref<2x32x96xf32, #tpu.memory_space<vmem>>, vector<1x32x96xf32>
    %170 = vector.shape_cast %169 : vector<1x32x96xf32> to vector<32x96xf32>
    %cst_93 = arith.constant dense<0.000000e+00> : vector<8x96xf32>
    %171 = tpu.matmul %168, %170, %cst_93 {dimension_numbers = #tpu.dot_dimension_numbers<[1], [0], [0], [1], [0, 0, 1, 1], [], []>} : vector<8x32xf32>, vector<32x96xf32>, vector<8x96xf32> -> vector<8x96xf32>
    %c1_94 = arith.constant 1 : index
    %c0_95 = arith.constant 0 : index
    %c0_96 = arith.constant 0 : index
    %172 = vector.load %arg11[%c1_94, %c0_95, %c0_96] : memref<2x1x96xf32, #tpu.memory_space<vmem>>, vector<1x1x96xf32>
    %173 = vector.shape_cast %172 : vector<1x1x96xf32> to vector<1x96xf32>
    %174 = vector.broadcast %173 : vector<1x96xf32> to vector<8x96xf32>
    %175 = arith.addf %171, %174 : vector<8x96xf32>
    %176 = vector.extract_strided_slice %175 {offsets = [0, 0], sizes = [8, 32], strides = [1, 1]} : vector<8x96xf32> to vector<8x32xf32>
    %177 = vector.extract_strided_slice %175 {offsets = [0, 32], sizes = [8, 32], strides = [1, 1]} : vector<8x96xf32> to vector<8x32xf32>
    %178 = vector.extract_strided_slice %175 {offsets = [0, 64], sizes = [8, 32], strides = [1, 1]} : vector<8x96xf32> to vector<8x32xf32>
    %c1_97 = arith.constant 1 : index
    %c0_98 = arith.constant 0 : index
    %c0_99 = arith.constant 0 : index
    %179 = vector.load %arg12[%c1_97, %c0_98, %c0_99] : memref<2x32x32xf32, #tpu.memory_space<vmem>>, vector<1x32x32xf32>
    %180 = vector.shape_cast %179 : vector<1x32x32xf32> to vector<32x32xf32>
    %c1_100 = arith.constant 1 : index
    %c0_101 = arith.constant 0 : index
    %c0_102 = arith.constant 0 : index
    %181 = vector.load %arg13[%c1_100, %c0_101, %c0_102] : memref<2x1x32xf32, #tpu.memory_space<vmem>>, vector<1x1x32xf32>
    %182 = vector.shape_cast %181 : vector<1x1x32xf32> to vector<1x32xf32>
    %183 = vector.extract_strided_slice %176 {offsets = [0, 0], sizes = [8, 8], strides = [1, 1]} : vector<8x32xf32> to vector<8x8xf32>
    %184 = vector.extract_strided_slice %177 {offsets = [0, 0], sizes = [8, 8], strides = [1, 1]} : vector<8x32xf32> to vector<8x8xf32>
    %185 = vector.extract_strided_slice %178 {offsets = [0, 0], sizes = [8, 8], strides = [1, 1]} : vector<8x32xf32> to vector<8x8xf32>
    "tpu.trace_start"() <{level = 10 : i32, message = "qd,kd->qk"}> : () -> ()
    %cst_103 = arith.constant dense<0.000000e+00> : vector<8x8xf32>
    %186 = tpu.matmul %183, %184, %cst_103 {dimension_numbers = #tpu.dot_dimension_numbers<[1], [1], [0], [0], [0, 0, 1, 0], [], []>} : vector<8x8xf32>, vector<8x8xf32>, vector<8x8xf32> -> vector<8x8xf32>
    "tpu.trace_stop"() : () -> ()
    %cst_104 = arith.constant 0.353553385 : f32
    %187 = vector.broadcast %cst_104 : f32 to vector<8x8xf32>
    %188 = arith.mulf %186, %187 : vector<8x8xf32>
    %cst_105 = arith.constant dense<0xFF800000> : vector<8xf32>
    %189 = vector.multi_reduction <maximumf>, %188, %cst_105 [1] : vector<8x8xf32> to vector<8xf32>
    %190 = vector.shape_cast %189 : vector<8xf32> to vector<8x1xf32>
    %191 = vector.broadcast %190 : vector<8x1xf32> to vector<8x8xf32>
    %192 = arith.subf %188, %191 : vector<8x8xf32>
    %193 = math.exp %192 : vector<8x8xf32>
    %cst_106 = arith.constant dense<0.000000e+00> : vector<8xf32>
    %194 = vector.multi_reduction <add>, %193, %cst_106 [1] : vector<8x8xf32> to vector<8xf32>
    %195 = vector.shape_cast %194 : vector<8xf32> to vector<8x1xf32>
    %196 = vector.broadcast %195 : vector<8x1xf32> to vector<8x8xf32>
    %197 = arith.divf %193, %196 : vector<8x8xf32>
    %cst_107 = arith.constant dense<0.000000e+00> : vector<8x8xf32>
    %198 = tpu.matmul %197, %185, %cst_107 {dimension_numbers = #tpu.dot_dimension_numbers<[1], [0], [0], [1], [0, 0, 1, 1], [], []>} : vector<8x8xf32>, vector<8x8xf32>, vector<8x8xf32> -> vector<8x8xf32>
    %199 = vector.extract_strided_slice %176 {offsets = [0, 8], sizes = [8, 8], strides = [1, 1]} : vector<8x32xf32> to vector<8x8xf32>
    %200 = vector.extract_strided_slice %177 {offsets = [0, 8], sizes = [8, 8], strides = [1, 1]} : vector<8x32xf32> to vector<8x8xf32>
    %201 = vector.extract_strided_slice %178 {offsets = [0, 8], sizes = [8, 8], strides = [1, 1]} : vector<8x32xf32> to vector<8x8xf32>
    "tpu.trace_start"() <{level = 10 : i32, message = "qd,kd->qk"}> : () -> ()
    %cst_108 = arith.constant dense<0.000000e+00> : vector<8x8xf32>
    %202 = tpu.matmul %199, %200, %cst_108 {dimension_numbers = #tpu.dot_dimension_numbers<[1], [1], [0], [0], [0, 0, 1, 0], [], []>} : vector<8x8xf32>, vector<8x8xf32>, vector<8x8xf32> -> vector<8x8xf32>
    "tpu.trace_stop"() : () -> ()
    %cst_109 = arith.constant 0.353553385 : f32
    %203 = vector.broadcast %cst_109 : f32 to vector<8x8xf32>
    %204 = arith.mulf %202, %203 : vector<8x8xf32>
    %cst_110 = arith.constant dense<0xFF800000> : vector<8xf32>
    %205 = vector.multi_reduction <maximumf>, %204, %cst_110 [1] : vector<8x8xf32> to vector<8xf32>
    %206 = vector.shape_cast %205 : vector<8xf32> to vector<8x1xf32>
    %207 = vector.broadcast %206 : vector<8x1xf32> to vector<8x8xf32>
    %208 = arith.subf %204, %207 : vector<8x8xf32>
    %209 = math.exp %208 : vector<8x8xf32>
    %cst_111 = arith.constant dense<0.000000e+00> : vector<8xf32>
    %210 = vector.multi_reduction <add>, %209, %cst_111 [1] : vector<8x8xf32> to vector<8xf32>
    %211 = vector.shape_cast %210 : vector<8xf32> to vector<8x1xf32>
    %212 = vector.broadcast %211 : vector<8x1xf32> to vector<8x8xf32>
    %213 = arith.divf %209, %212 : vector<8x8xf32>
    %cst_112 = arith.constant dense<0.000000e+00> : vector<8x8xf32>
    %214 = tpu.matmul %213, %201, %cst_112 {dimension_numbers = #tpu.dot_dimension_numbers<[1], [0], [0], [1], [0, 0, 1, 1], [], []>} : vector<8x8xf32>, vector<8x8xf32>, vector<8x8xf32> -> vector<8x8xf32>
    %215 = vector.extract_strided_slice %176 {offsets = [0, 16], sizes = [8, 8], strides = [1, 1]} : vector<8x32xf32> to vector<8x8xf32>
    %216 = vector.extract_strided_slice %177 {offsets = [0, 16], sizes = [8, 8], strides = [1, 1]} : vector<8x32xf32> to vector<8x8xf32>
    %217 = vector.extract_strided_slice %178 {offsets = [0, 16], sizes = [8, 8], strides = [1, 1]} : vector<8x32xf32> to vector<8x8xf32>
    "tpu.trace_start"() <{level = 10 : i32, message = "qd,kd->qk"}> : () -> ()
    %cst_113 = arith.constant dense<0.000000e+00> : vector<8x8xf32>
    %218 = tpu.matmul %215, %216, %cst_113 {dimension_numbers = #tpu.dot_dimension_numbers<[1], [1], [0], [0], [0, 0, 1, 0], [], []>} : vector<8x8xf32>, vector<8x8xf32>, vector<8x8xf32> -> vector<8x8xf32>
    "tpu.trace_stop"() : () -> ()
    %cst_114 = arith.constant 0.353553385 : f32
    %219 = vector.broadcast %cst_114 : f32 to vector<8x8xf32>
    %220 = arith.mulf %218, %219 : vector<8x8xf32>
    %cst_115 = arith.constant dense<0xFF800000> : vector<8xf32>
    %221 = vector.multi_reduction <maximumf>, %220, %cst_115 [1] : vector<8x8xf32> to vector<8xf32>
    %222 = vector.shape_cast %221 : vector<8xf32> to vector<8x1xf32>
    %223 = vector.broadcast %222 : vector<8x1xf32> to vector<8x8xf32>
    %224 = arith.subf %220, %223 : vector<8x8xf32>
    %225 = math.exp %224 : vector<8x8xf32>
    %cst_116 = arith.constant dense<0.000000e+00> : vector<8xf32>
    %226 = vector.multi_reduction <add>, %225, %cst_116 [1] : vector<8x8xf32> to vector<8xf32>
    %227 = vector.shape_cast %226 : vector<8xf32> to vector<8x1xf32>
    %228 = vector.broadcast %227 : vector<8x1xf32> to vector<8x8xf32>
    %229 = arith.divf %225, %228 : vector<8x8xf32>
    %cst_117 = arith.constant dense<0.000000e+00> : vector<8x8xf32>
    %230 = tpu.matmul %229, %217, %cst_117 {dimension_numbers = #tpu.dot_dimension_numbers<[1], [0], [0], [1], [0, 0, 1, 1], [], []>} : vector<8x8xf32>, vector<8x8xf32>, vector<8x8xf32> -> vector<8x8xf32>
    %231 = vector.extract_strided_slice %176 {offsets = [0, 24], sizes = [8, 8], strides = [1, 1]} : vector<8x32xf32> to vector<8x8xf32>
    %232 = vector.extract_strided_slice %177 {offsets = [0, 24], sizes = [8, 8], strides = [1, 1]} : vector<8x32xf32> to vector<8x8xf32>
    %233 = vector.extract_strided_slice %178 {offsets = [0, 24], sizes = [8, 8], strides = [1, 1]} : vector<8x32xf32> to vector<8x8xf32>
    "tpu.trace_start"() <{level = 10 : i32, message = "qd,kd->qk"}> : () -> ()
    %cst_118 = arith.constant dense<0.000000e+00> : vector<8x8xf32>
    %234 = tpu.matmul %231, %232, %cst_118 {dimension_numbers = #tpu.dot_dimension_numbers<[1], [1], [0], [0], [0, 0, 1, 0], [], []>} : vector<8x8xf32>, vector<8x8xf32>, vector<8x8xf32> -> vector<8x8xf32>
    "tpu.trace_stop"() : () -> ()
    %cst_119 = arith.constant 0.353553385 : f32
    %235 = vector.broadcast %cst_119 : f32 to vector<8x8xf32>
    %236 = arith.mulf %234, %235 : vector<8x8xf32>
    %cst_120 = arith.constant dense<0xFF800000> : vector<8xf32>
    %237 = vector.multi_reduction <maximumf>, %236, %cst_120 [1] : vector<8x8xf32> to vector<8xf32>
    %238 = vector.shape_cast %237 : vector<8xf32> to vector<8x1xf32>
    %239 = vector.broadcast %238 : vector<8x1xf32> to vector<8x8xf32>
    %240 = arith.subf %236, %239 : vector<8x8xf32>
    %241 = math.exp %240 : vector<8x8xf32>
    %cst_121 = arith.constant dense<0.000000e+00> : vector<8xf32>
    %242 = vector.multi_reduction <add>, %241, %cst_121 [1] : vector<8x8xf32> to vector<8xf32>
    %243 = vector.shape_cast %242 : vector<8xf32> to vector<8x1xf32>
    %244 = vector.broadcast %243 : vector<8x1xf32> to vector<8x8xf32>
    %245 = arith.divf %241, %244 : vector<8x8xf32>
    %cst_122 = arith.constant dense<0.000000e+00> : vector<8x8xf32>
    %246 = tpu.matmul %245, %233, %cst_122 {dimension_numbers = #tpu.dot_dimension_numbers<[1], [0], [0], [1], [0, 0, 1, 1], [], []>} : vector<8x8xf32>, vector<8x8xf32>, vector<8x8xf32> -> vector<8x8xf32>
    %247 = tpu.concatenate %198, %214, %230, %246 in 1 : vector<8x8xf32>, vector<8x8xf32>, vector<8x8xf32>, vector<8x8xf32> -> vector<8x32xf32>
    %cst_123 = arith.constant dense<0.000000e+00> : vector<8x32xf32>
    %248 = tpu.matmul %247, %180, %cst_123 {dimension_numbers = #tpu.dot_dimension_numbers<[1], [0], [0], [1], [0, 0, 1, 1], [], []>} : vector<8x32xf32>, vector<32x32xf32>, vector<8x32xf32> -> vector<8x32xf32>
    %249 = vector.broadcast %182 : vector<1x32xf32> to vector<8x32xf32>
    %250 = arith.addf %248, %249 : vector<8x32xf32>
    %251 = arith.addf %168, %250 : vector<8x32xf32>
    %c1_124 = arith.constant 1 : index
    %c0_125 = arith.constant 0 : index
    %c0_126 = arith.constant 0 : index
    %252 = vector.load %arg14[%c1_124, %c0_125, %c0_126] : memref<2x1x32xf32, #tpu.memory_space<vmem>>, vector<1x1x32xf32>
    %253 = vector.shape_cast %252 : vector<1x1x32xf32> to vector<1x32xf32>
    %c1_127 = arith.constant 1 : index
    %c0_128 = arith.constant 0 : index
    %c0_129 = arith.constant 0 : index
    %254 = vector.load %arg15[%c1_127, %c0_128, %c0_129] : memref<2x1x32xf32, #tpu.memory_space<vmem>>, vector<1x1x32xf32>
    %255 = vector.shape_cast %254 : vector<1x1x32xf32> to vector<1x32xf32>
    %cst_130 = arith.constant dense<0.000000e+00> : vector<8xf32>
    %256 = vector.multi_reduction <add>, %251, %cst_130 [1] : vector<8x32xf32> to vector<8xf32>
    %257 = vector.shape_cast %256 : vector<8xf32> to vector<8x1xf32>
    %cst_131 = arith.constant 3.200000e+01 : f32
    %258 = vector.broadcast %cst_131 : f32 to vector<8x1xf32>
    %259 = arith.divf %257, %258 : vector<8x1xf32>
    %260 = vector.broadcast %259 : vector<8x1xf32> to vector<8x32xf32>
    %261 = arith.subf %251, %260 : vector<8x32xf32>
    %262 = arith.mulf %261, %261 : vector<8x32xf32>
    %cst_132 = arith.constant dense<0.000000e+00> : vector<8xf32>
    %263 = vector.multi_reduction <add>, %262, %cst_132 [1] : vector<8x32xf32> to vector<8xf32>
    %264 = vector.shape_cast %263 : vector<8xf32> to vector<8x1xf32>
    %cst_133 = arith.constant 3.200000e+01 : f32
    %265 = vector.broadcast %cst_133 : f32 to vector<8x1xf32>
    %266 = arith.divf %264, %265 : vector<8x1xf32>
    %cst_134 = arith.constant 9.99999974E-6 : f32
    %267 = vector.broadcast %cst_134 : f32 to vector<8x1xf32>
    %268 = arith.addf %266, %267 : vector<8x1xf32>
    %269 = math.rsqrt %268 : vector<8x1xf32>
    %270 = vector.broadcast %269 : vector<8x1xf32> to vector<8x32xf32>
    %271 = arith.mulf %261, %270 : vector<8x32xf32>
    %272 = vector.broadcast %253 : vector<1x32xf32> to vector<8x32xf32>
    %273 = arith.mulf %271, %272 : vector<8x32xf32>
    %274 = vector.broadcast %255 : vector<1x32xf32> to vector<8x32xf32>
    %275 = arith.addf %273, %274 : vector<8x32xf32>
    %c1_135 = arith.constant 1 : index
    %c0_136 = arith.constant 0 : index
    %c0_137 = arith.constant 0 : index
    %276 = vector.load %arg16[%c1_135, %c0_136, %c0_137] : memref<2x32x64xf32, #tpu.memory_space<vmem>>, vector<1x32x64xf32>
    %277 = vector.shape_cast %276 : vector<1x32x64xf32> to vector<32x64xf32>
    %cst_138 = arith.constant dense<0.000000e+00> : vector<8x64xf32>
    %278 = tpu.matmul %275, %277, %cst_138 {dimension_numbers = #tpu.dot_dimension_numbers<[1], [0], [0], [1], [0, 0, 1, 1], [], []>} : vector<8x32xf32>, vector<32x64xf32>, vector<8x64xf32> -> vector<8x64xf32>
    %c1_139 = arith.constant 1 : index
    %c0_140 = arith.constant 0 : index
    %c0_141 = arith.constant 0 : index
    %279 = vector.load %arg17[%c1_139, %c0_140, %c0_141] : memref<2x1x64xf32, #tpu.memory_space<vmem>>, vector<1x1x64xf32>
    %280 = vector.shape_cast %279 : vector<1x1x64xf32> to vector<1x64xf32>
    %281 = vector.broadcast %280 : vector<1x64xf32> to vector<8x64xf32>
    %282 = arith.addf %278, %281 : vector<8x64xf32>
    %cst_142 = arith.constant 0.000000e+00 : f32
    %283 = vector.broadcast %cst_142 : f32 to vector<8x64xf32>
    %284 = arith.maximumf %282, %283 : vector<8x64xf32>
    %c1_143 = arith.constant 1 : index
    %c0_144 = arith.constant 0 : index
    %c0_145 = arith.constant 0 : index
    %285 = vector.load %arg18[%c1_143, %c0_144, %c0_145] : memref<2x64x32xf32, #tpu.memory_space<vmem>>, vector<1x64x32xf32>
    %286 = vector.shape_cast %285 : vector<1x64x32xf32> to vector<64x32xf32>
    %cst_146 = arith.constant dense<0.000000e+00> : vector<8x32xf32>
    %287 = tpu.matmul %284, %286, %cst_146 {dimension_numbers = #tpu.dot_dimension_numbers<[1], [0], [0], [1], [0, 0, 1, 1], [], []>} : vector<8x64xf32>, vector<64x32xf32>, vector<8x32xf32> -> vector<8x32xf32>
    %c1_147 = arith.constant 1 : index
    %c0_148 = arith.constant 0 : index
    %c0_149 = arith.constant 0 : index
    %288 = vector.load %arg19[%c1_147, %c0_148, %c0_149] : memref<2x1x32xf32, #tpu.memory_space<vmem>>, vector<1x1x32xf32>
    %289 = vector.shape_cast %288 : vector<1x1x32xf32> to vector<1x32xf32>
    %290 = vector.broadcast %289 : vector<1x32xf32> to vector<8x32xf32>
    %291 = arith.addf %287, %290 : vector<8x32xf32>
    %292 = arith.addf %275, %291 : vector<8x32xf32>
    %c1_150 = arith.constant 1 : index
    %c0_151 = arith.constant 0 : index
    %c0_152 = arith.constant 0 : index
    %293 = vector.load %arg20[%c1_150, %c0_151, %c0_152] : memref<2x1x32xf32, #tpu.memory_space<vmem>>, vector<1x1x32xf32>
    %294 = vector.shape_cast %293 : vector<1x1x32xf32> to vector<1x32xf32>
    %c1_153 = arith.constant 1 : index
    %c0_154 = arith.constant 0 : index
    %c0_155 = arith.constant 0 : index
    %295 = vector.load %arg21[%c1_153, %c0_154, %c0_155] : memref<2x1x32xf32, #tpu.memory_space<vmem>>, vector<1x1x32xf32>
    %296 = vector.shape_cast %295 : vector<1x1x32xf32> to vector<1x32xf32>
    %cst_156 = arith.constant dense<0.000000e+00> : vector<8xf32>
    %297 = vector.multi_reduction <add>, %292, %cst_156 [1] : vector<8x32xf32> to vector<8xf32>
    %298 = vector.shape_cast %297 : vector<8xf32> to vector<8x1xf32>
    %cst_157 = arith.constant 3.200000e+01 : f32
    %299 = vector.broadcast %cst_157 : f32 to vector<8x1xf32>
    %300 = arith.divf %298, %299 : vector<8x1xf32>
    %301 = vector.broadcast %300 : vector<8x1xf32> to vector<8x32xf32>
    %302 = arith.subf %292, %301 : vector<8x32xf32>
    %303 = arith.mulf %302, %302 : vector<8x32xf32>
    %cst_158 = arith.constant dense<0.000000e+00> : vector<8xf32>
    %304 = vector.multi_reduction <add>, %303, %cst_158 [1] : vector<8x32xf32> to vector<8xf32>
    %305 = vector.shape_cast %304 : vector<8xf32> to vector<8x1xf32>
    %cst_159 = arith.constant 3.200000e+01 : f32
    %306 = vector.broadcast %cst_159 : f32 to vector<8x1xf32>
    %307 = arith.divf %305, %306 : vector<8x1xf32>
    %cst_160 = arith.constant 9.99999974E-6 : f32
    %308 = vector.broadcast %cst_160 : f32 to vector<8x1xf32>
    %309 = arith.addf %307, %308 : vector<8x1xf32>
    %310 = math.rsqrt %309 : vector<8x1xf32>
    %311 = vector.broadcast %310 : vector<8x1xf32> to vector<8x32xf32>
    %312 = arith.mulf %302, %311 : vector<8x32xf32>
    %313 = vector.broadcast %294 : vector<1x32xf32> to vector<8x32xf32>
    %314 = arith.mulf %312, %313 : vector<8x32xf32>
    %315 = vector.broadcast %296 : vector<1x32xf32> to vector<8x32xf32>
    %316 = arith.addf %314, %315 : vector<8x32xf32>
    %c0_161 = arith.constant 0 : index
    %c0_162 = arith.constant 0 : index
    %317 = vector.load %arg42[%c0_161, %c0_162] : memref<1x32xf32, #tpu.memory_space<vmem>>, vector<1x32xf32>
    %c0_163 = arith.constant 0 : index
    %c0_164 = arith.constant 0 : index
    %318 = vector.load %arg43[%c0_163, %c0_164] : memref<1x32xf32, #tpu.memory_space<vmem>>, vector<1x32xf32>
    %cst_165 = arith.constant dense<0.000000e+00> : vector<8xf32>
    %319 = vector.multi_reduction <add>, %316, %cst_165 [1] : vector<8x32xf32> to vector<8xf32>
    %320 = vector.shape_cast %319 : vector<8xf32> to vector<8x1xf32>
    %cst_166 = arith.constant 3.200000e+01 : f32
    %321 = vector.broadcast %cst_166 : f32 to vector<8x1xf32>
    %322 = arith.divf %320, %321 : vector<8x1xf32>
    %323 = vector.broadcast %322 : vector<8x1xf32> to vector<8x32xf32>
    %324 = arith.subf %316, %323 : vector<8x32xf32>
    %325 = arith.mulf %324, %324 : vector<8x32xf32>
    %cst_167 = arith.constant dense<0.000000e+00> : vector<8xf32>
    %326 = vector.multi_reduction <add>, %325, %cst_167 [1] : vector<8x32xf32> to vector<8xf32>
    %327 = vector.shape_cast %326 : vector<8xf32> to vector<8x1xf32>
    %cst_168 = arith.constant 3.200000e+01 : f32
    %328 = vector.broadcast %cst_168 : f32 to vector<8x1xf32>
    %329 = arith.divf %327, %328 : vector<8x1xf32>
    %cst_169 = arith.constant 9.99999974E-6 : f32
    %330 = vector.broadcast %cst_169 : f32 to vector<8x1xf32>
    %331 = arith.addf %329, %330 : vector<8x1xf32>
    %332 = math.rsqrt %331 : vector<8x1xf32>
    %333 = vector.broadcast %332 : vector<8x1xf32> to vector<8x32xf32>
    %334 = arith.mulf %324, %333 : vector<8x32xf32>
    %335 = vector.broadcast %317 : vector<1x32xf32> to vector<8x32xf32>
    %336 = arith.mulf %334, %335 : vector<8x32xf32>
    %337 = vector.broadcast %318 : vector<1x32xf32> to vector<8x32xf32>
    %338 = arith.addf %336, %337 : vector<8x32xf32>
    %c0_170 = arith.constant 0 : index
    %c0_171 = arith.constant 0 : index
    %c0_172 = arith.constant 0 : index
    %339 = vector.load %arg22[%c0_170, %c0_171, %c0_172] : memref<2x32x96xf32, #tpu.memory_space<vmem>>, vector<1x32x96xf32>
    %340 = vector.shape_cast %339 : vector<1x32x96xf32> to vector<32x96xf32>
    %cst_173 = arith.constant dense<0.000000e+00> : vector<8x96xf32>
    %341 = tpu.matmul %19, %340, %cst_173 {dimension_numbers = #tpu.dot_dimension_numbers<[1], [0], [0], [1], [0, 0, 1, 1], [], []>} : vector<8x32xf32>, vector<32x96xf32>, vector<8x96xf32> -> vector<8x96xf32>
    %c0_174 = arith.constant 0 : index
    %c0_175 = arith.constant 0 : index
    %c0_176 = arith.constant 0 : index
    %342 = vector.load %arg23[%c0_174, %c0_175, %c0_176] : memref<2x1x96xf32, #tpu.memory_space<vmem>>, vector<1x1x96xf32>
    %343 = vector.shape_cast %342 : vector<1x1x96xf32> to vector<1x96xf32>
    %344 = vector.broadcast %343 : vector<1x96xf32> to vector<8x96xf32>
    %345 = arith.addf %341, %344 : vector<8x96xf32>
    %346 = vector.extract_strided_slice %345 {offsets = [0, 0], sizes = [8, 32], strides = [1, 1]} : vector<8x96xf32> to vector<8x32xf32>
    %347 = vector.extract_strided_slice %345 {offsets = [0, 32], sizes = [8, 32], strides = [1, 1]} : vector<8x96xf32> to vector<8x32xf32>
    %348 = vector.extract_strided_slice %345 {offsets = [0, 64], sizes = [8, 32], strides = [1, 1]} : vector<8x96xf32> to vector<8x32xf32>
    %c0_177 = arith.constant 0 : index
    %c0_178 = arith.constant 0 : index
    %c0_179 = arith.constant 0 : index
    %349 = vector.load %arg24[%c0_177, %c0_178, %c0_179] : memref<2x32x32xf32, #tpu.memory_space<vmem>>, vector<1x32x32xf32>
    %350 = vector.shape_cast %349 : vector<1x32x32xf32> to vector<32x32xf32>
    %c0_180 = arith.constant 0 : index
    %c0_181 = arith.constant 0 : index
    %c0_182 = arith.constant 0 : index
    %351 = vector.load %arg25[%c0_180, %c0_181, %c0_182] : memref<2x1x32xf32, #tpu.memory_space<vmem>>, vector<1x1x32xf32>
    %352 = vector.shape_cast %351 : vector<1x1x32xf32> to vector<1x32xf32>
    %353 = vector.extract_strided_slice %346 {offsets = [0, 0], sizes = [8, 8], strides = [1, 1]} : vector<8x32xf32> to vector<8x8xf32>
    %354 = vector.extract_strided_slice %347 {offsets = [0, 0], sizes = [8, 8], strides = [1, 1]} : vector<8x32xf32> to vector<8x8xf32>
    %355 = vector.extract_strided_slice %348 {offsets = [0, 0], sizes = [8, 8], strides = [1, 1]} : vector<8x32xf32> to vector<8x8xf32>
    "tpu.trace_start"() <{level = 10 : i32, message = "qd,kd->qk"}> : () -> ()
    %cst_183 = arith.constant dense<0.000000e+00> : vector<8x8xf32>
    %356 = tpu.matmul %353, %354, %cst_183 {dimension_numbers = #tpu.dot_dimension_numbers<[1], [1], [0], [0], [0, 0, 1, 0], [], []>} : vector<8x8xf32>, vector<8x8xf32>, vector<8x8xf32> -> vector<8x8xf32>
    "tpu.trace_stop"() : () -> ()
    %cst_184 = arith.constant 0.353553385 : f32
    %357 = vector.broadcast %cst_184 : f32 to vector<8x8xf32>
    %358 = arith.mulf %356, %357 : vector<8x8xf32>
    %359 = arith.addf %358, %20 : vector<8x8xf32>
    %cst_185 = arith.constant dense<0xFF800000> : vector<8xf32>
    %360 = vector.multi_reduction <maximumf>, %359, %cst_185 [1] : vector<8x8xf32> to vector<8xf32>
    %361 = vector.shape_cast %360 : vector<8xf32> to vector<8x1xf32>
    %362 = vector.broadcast %361 : vector<8x1xf32> to vector<8x8xf32>
    %363 = arith.subf %359, %362 : vector<8x8xf32>
    %364 = math.exp %363 : vector<8x8xf32>
    %cst_186 = arith.constant dense<0.000000e+00> : vector<8xf32>
    %365 = vector.multi_reduction <add>, %364, %cst_186 [1] : vector<8x8xf32> to vector<8xf32>
    %366 = vector.shape_cast %365 : vector<8xf32> to vector<8x1xf32>
    %367 = vector.broadcast %366 : vector<8x1xf32> to vector<8x8xf32>
    %368 = arith.divf %364, %367 : vector<8x8xf32>
    %cst_187 = arith.constant dense<0.000000e+00> : vector<8x8xf32>
    %369 = tpu.matmul %368, %355, %cst_187 {dimension_numbers = #tpu.dot_dimension_numbers<[1], [0], [0], [1], [0, 0, 1, 1], [], []>} : vector<8x8xf32>, vector<8x8xf32>, vector<8x8xf32> -> vector<8x8xf32>
    %370 = vector.extract_strided_slice %346 {offsets = [0, 8], sizes = [8, 8], strides = [1, 1]} : vector<8x32xf32> to vector<8x8xf32>
    %371 = vector.extract_strided_slice %347 {offsets = [0, 8], sizes = [8, 8], strides = [1, 1]} : vector<8x32xf32> to vector<8x8xf32>
    %372 = vector.extract_strided_slice %348 {offsets = [0, 8], sizes = [8, 8], strides = [1, 1]} : vector<8x32xf32> to vector<8x8xf32>
    "tpu.trace_start"() <{level = 10 : i32, message = "qd,kd->qk"}> : () -> ()
    %cst_188 = arith.constant dense<0.000000e+00> : vector<8x8xf32>
    %373 = tpu.matmul %370, %371, %cst_188 {dimension_numbers = #tpu.dot_dimension_numbers<[1], [1], [0], [0], [0, 0, 1, 0], [], []>} : vector<8x8xf32>, vector<8x8xf32>, vector<8x8xf32> -> vector<8x8xf32>
    "tpu.trace_stop"() : () -> ()
    %cst_189 = arith.constant 0.353553385 : f32
    %374 = vector.broadcast %cst_189 : f32 to vector<8x8xf32>
    %375 = arith.mulf %373, %374 : vector<8x8xf32>
    %376 = arith.addf %375, %20 : vector<8x8xf32>
    %cst_190 = arith.constant dense<0xFF800000> : vector<8xf32>
    %377 = vector.multi_reduction <maximumf>, %376, %cst_190 [1] : vector<8x8xf32> to vector<8xf32>
    %378 = vector.shape_cast %377 : vector<8xf32> to vector<8x1xf32>
    %379 = vector.broadcast %378 : vector<8x1xf32> to vector<8x8xf32>
    %380 = arith.subf %376, %379 : vector<8x8xf32>
    %381 = math.exp %380 : vector<8x8xf32>
    %cst_191 = arith.constant dense<0.000000e+00> : vector<8xf32>
    %382 = vector.multi_reduction <add>, %381, %cst_191 [1] : vector<8x8xf32> to vector<8xf32>
    %383 = vector.shape_cast %382 : vector<8xf32> to vector<8x1xf32>
    %384 = vector.broadcast %383 : vector<8x1xf32> to vector<8x8xf32>
    %385 = arith.divf %381, %384 : vector<8x8xf32>
    %cst_192 = arith.constant dense<0.000000e+00> : vector<8x8xf32>
    %386 = tpu.matmul %385, %372, %cst_192 {dimension_numbers = #tpu.dot_dimension_numbers<[1], [0], [0], [1], [0, 0, 1, 1], [], []>} : vector<8x8xf32>, vector<8x8xf32>, vector<8x8xf32> -> vector<8x8xf32>
    %387 = vector.extract_strided_slice %346 {offsets = [0, 16], sizes = [8, 8], strides = [1, 1]} : vector<8x32xf32> to vector<8x8xf32>
    %388 = vector.extract_strided_slice %347 {offsets = [0, 16], sizes = [8, 8], strides = [1, 1]} : vector<8x32xf32> to vector<8x8xf32>
    %389 = vector.extract_strided_slice %348 {offsets = [0, 16], sizes = [8, 8], strides = [1, 1]} : vector<8x32xf32> to vector<8x8xf32>
    "tpu.trace_start"() <{level = 10 : i32, message = "qd,kd->qk"}> : () -> ()
    %cst_193 = arith.constant dense<0.000000e+00> : vector<8x8xf32>
    %390 = tpu.matmul %387, %388, %cst_193 {dimension_numbers = #tpu.dot_dimension_numbers<[1], [1], [0], [0], [0, 0, 1, 0], [], []>} : vector<8x8xf32>, vector<8x8xf32>, vector<8x8xf32> -> vector<8x8xf32>
    "tpu.trace_stop"() : () -> ()
    %cst_194 = arith.constant 0.353553385 : f32
    %391 = vector.broadcast %cst_194 : f32 to vector<8x8xf32>
    %392 = arith.mulf %390, %391 : vector<8x8xf32>
    %393 = arith.addf %392, %20 : vector<8x8xf32>
    %cst_195 = arith.constant dense<0xFF800000> : vector<8xf32>
    %394 = vector.multi_reduction <maximumf>, %393, %cst_195 [1] : vector<8x8xf32> to vector<8xf32>
    %395 = vector.shape_cast %394 : vector<8xf32> to vector<8x1xf32>
    %396 = vector.broadcast %395 : vector<8x1xf32> to vector<8x8xf32>
    %397 = arith.subf %393, %396 : vector<8x8xf32>
    %398 = math.exp %397 : vector<8x8xf32>
    %cst_196 = arith.constant dense<0.000000e+00> : vector<8xf32>
    %399 = vector.multi_reduction <add>, %398, %cst_196 [1] : vector<8x8xf32> to vector<8xf32>
    %400 = vector.shape_cast %399 : vector<8xf32> to vector<8x1xf32>
    %401 = vector.broadcast %400 : vector<8x1xf32> to vector<8x8xf32>
    %402 = arith.divf %398, %401 : vector<8x8xf32>
    %cst_197 = arith.constant dense<0.000000e+00> : vector<8x8xf32>
    %403 = tpu.matmul %402, %389, %cst_197 {dimension_numbers = #tpu.dot_dimension_numbers<[1], [0], [0], [1], [0, 0, 1, 1], [], []>} : vector<8x8xf32>, vector<8x8xf32>, vector<8x8xf32> -> vector<8x8xf32>
    %404 = vector.extract_strided_slice %346 {offsets = [0, 24], sizes = [8, 8], strides = [1, 1]} : vector<8x32xf32> to vector<8x8xf32>
    %405 = vector.extract_strided_slice %347 {offsets = [0, 24], sizes = [8, 8], strides = [1, 1]} : vector<8x32xf32> to vector<8x8xf32>
    %406 = vector.extract_strided_slice %348 {offsets = [0, 24], sizes = [8, 8], strides = [1, 1]} : vector<8x32xf32> to vector<8x8xf32>
    "tpu.trace_start"() <{level = 10 : i32, message = "qd,kd->qk"}> : () -> ()
    %cst_198 = arith.constant dense<0.000000e+00> : vector<8x8xf32>
    %407 = tpu.matmul %404, %405, %cst_198 {dimension_numbers = #tpu.dot_dimension_numbers<[1], [1], [0], [0], [0, 0, 1, 0], [], []>} : vector<8x8xf32>, vector<8x8xf32>, vector<8x8xf32> -> vector<8x8xf32>
    "tpu.trace_stop"() : () -> ()
    %cst_199 = arith.constant 0.353553385 : f32
    %408 = vector.broadcast %cst_199 : f32 to vector<8x8xf32>
    %409 = arith.mulf %407, %408 : vector<8x8xf32>
    %410 = arith.addf %409, %20 : vector<8x8xf32>
    %cst_200 = arith.constant dense<0xFF800000> : vector<8xf32>
    %411 = vector.multi_reduction <maximumf>, %410, %cst_200 [1] : vector<8x8xf32> to vector<8xf32>
    %412 = vector.shape_cast %411 : vector<8xf32> to vector<8x1xf32>
    %413 = vector.broadcast %412 : vector<8x1xf32> to vector<8x8xf32>
    %414 = arith.subf %410, %413 : vector<8x8xf32>
    %415 = math.exp %414 : vector<8x8xf32>
    %cst_201 = arith.constant dense<0.000000e+00> : vector<8xf32>
    %416 = vector.multi_reduction <add>, %415, %cst_201 [1] : vector<8x8xf32> to vector<8xf32>
    %417 = vector.shape_cast %416 : vector<8xf32> to vector<8x1xf32>
    %418 = vector.broadcast %417 : vector<8x1xf32> to vector<8x8xf32>
    %419 = arith.divf %415, %418 : vector<8x8xf32>
    %cst_202 = arith.constant dense<0.000000e+00> : vector<8x8xf32>
    %420 = tpu.matmul %419, %406, %cst_202 {dimension_numbers = #tpu.dot_dimension_numbers<[1], [0], [0], [1], [0, 0, 1, 1], [], []>} : vector<8x8xf32>, vector<8x8xf32>, vector<8x8xf32> -> vector<8x8xf32>
    %421 = tpu.concatenate %369, %386, %403, %420 in 1 : vector<8x8xf32>, vector<8x8xf32>, vector<8x8xf32>, vector<8x8xf32> -> vector<8x32xf32>
    %cst_203 = arith.constant dense<0.000000e+00> : vector<8x32xf32>
    %422 = tpu.matmul %421, %350, %cst_203 {dimension_numbers = #tpu.dot_dimension_numbers<[1], [0], [0], [1], [0, 0, 1, 1], [], []>} : vector<8x32xf32>, vector<32x32xf32>, vector<8x32xf32> -> vector<8x32xf32>
    %423 = vector.broadcast %352 : vector<1x32xf32> to vector<8x32xf32>
    %424 = arith.addf %422, %423 : vector<8x32xf32>
    %425 = arith.addf %19, %424 : vector<8x32xf32>
    %c0_204 = arith.constant 0 : index
    %c0_205 = arith.constant 0 : index
    %c0_206 = arith.constant 0 : index
    %426 = vector.load %arg26[%c0_204, %c0_205, %c0_206] : memref<2x1x32xf32, #tpu.memory_space<vmem>>, vector<1x1x32xf32>
    %427 = vector.shape_cast %426 : vector<1x1x32xf32> to vector<1x32xf32>
    %c0_207 = arith.constant 0 : index
    %c0_208 = arith.constant 0 : index
    %c0_209 = arith.constant 0 : index
    %428 = vector.load %arg27[%c0_207, %c0_208, %c0_209] : memref<2x1x32xf32, #tpu.memory_space<vmem>>, vector<1x1x32xf32>
    %429 = vector.shape_cast %428 : vector<1x1x32xf32> to vector<1x32xf32>
    %cst_210 = arith.constant dense<0.000000e+00> : vector<8xf32>
    %430 = vector.multi_reduction <add>, %425, %cst_210 [1] : vector<8x32xf32> to vector<8xf32>
    %431 = vector.shape_cast %430 : vector<8xf32> to vector<8x1xf32>
    %cst_211 = arith.constant 3.200000e+01 : f32
    %432 = vector.broadcast %cst_211 : f32 to vector<8x1xf32>
    %433 = arith.divf %431, %432 : vector<8x1xf32>
    %434 = vector.broadcast %433 : vector<8x1xf32> to vector<8x32xf32>
    %435 = arith.subf %425, %434 : vector<8x32xf32>
    %436 = arith.mulf %435, %435 : vector<8x32xf32>
    %cst_212 = arith.constant dense<0.000000e+00> : vector<8xf32>
    %437 = vector.multi_reduction <add>, %436, %cst_212 [1] : vector<8x32xf32> to vector<8xf32>
    %438 = vector.shape_cast %437 : vector<8xf32> to vector<8x1xf32>
    %cst_213 = arith.constant 3.200000e+01 : f32
    %439 = vector.broadcast %cst_213 : f32 to vector<8x1xf32>
    %440 = arith.divf %438, %439 : vector<8x1xf32>
    %cst_214 = arith.constant 9.99999974E-6 : f32
    %441 = vector.broadcast %cst_214 : f32 to vector<8x1xf32>
    %442 = arith.addf %440, %441 : vector<8x1xf32>
    %443 = math.rsqrt %442 : vector<8x1xf32>
    %444 = vector.broadcast %443 : vector<8x1xf32> to vector<8x32xf32>
    %445 = arith.mulf %435, %444 : vector<8x32xf32>
    %446 = vector.broadcast %427 : vector<1x32xf32> to vector<8x32xf32>
    %447 = arith.mulf %445, %446 : vector<8x32xf32>
    %448 = vector.broadcast %429 : vector<1x32xf32> to vector<8x32xf32>
    %449 = arith.addf %447, %448 : vector<8x32xf32>
    %c0_215 = arith.constant 0 : index
    %c0_216 = arith.constant 0 : index
    %c0_217 = arith.constant 0 : index
    %450 = vector.load %arg28[%c0_215, %c0_216, %c0_217] : memref<2x32x32xf32, #tpu.memory_space<vmem>>, vector<1x32x32xf32>
    %451 = vector.shape_cast %450 : vector<1x32x32xf32> to vector<32x32xf32>
    %cst_218 = arith.constant dense<0.000000e+00> : vector<8x32xf32>
    %452 = tpu.matmul %449, %451, %cst_218 {dimension_numbers = #tpu.dot_dimension_numbers<[1], [0], [0], [1], [0, 0, 1, 1], [], []>} : vector<8x32xf32>, vector<32x32xf32>, vector<8x32xf32> -> vector<8x32xf32>
    %c0_219 = arith.constant 0 : index
    %c0_220 = arith.constant 0 : index
    %c0_221 = arith.constant 0 : index
    %453 = vector.load %arg29[%c0_219, %c0_220, %c0_221] : memref<2x1x32xf32, #tpu.memory_space<vmem>>, vector<1x1x32xf32>
    %454 = vector.shape_cast %453 : vector<1x1x32xf32> to vector<1x32xf32>
    %455 = vector.broadcast %454 : vector<1x32xf32> to vector<8x32xf32>
    %456 = arith.addf %452, %455 : vector<8x32xf32>
    %c0_222 = arith.constant 0 : index
    %c0_223 = arith.constant 0 : index
    %c0_224 = arith.constant 0 : index
    %457 = vector.load %arg30[%c0_222, %c0_223, %c0_224] : memref<2x32x64xf32, #tpu.memory_space<vmem>>, vector<1x32x64xf32>
    %458 = vector.shape_cast %457 : vector<1x32x64xf32> to vector<32x64xf32>
    %cst_225 = arith.constant dense<0.000000e+00> : vector<8x64xf32>
    %459 = tpu.matmul %338, %458, %cst_225 {dimension_numbers = #tpu.dot_dimension_numbers<[1], [0], [0], [1], [0, 0, 1, 1], [], []>} : vector<8x32xf32>, vector<32x64xf32>, vector<8x64xf32> -> vector<8x64xf32>
    %c0_226 = arith.constant 0 : index
    %c0_227 = arith.constant 0 : index
    %c0_228 = arith.constant 0 : index
    %460 = vector.load %arg31[%c0_226, %c0_227, %c0_228] : memref<2x1x64xf32, #tpu.memory_space<vmem>>, vector<1x1x64xf32>
    %461 = vector.shape_cast %460 : vector<1x1x64xf32> to vector<1x64xf32>
    %462 = vector.broadcast %461 : vector<1x64xf32> to vector<8x64xf32>
    %463 = arith.addf %459, %462 : vector<8x64xf32>
    %464 = vector.extract_strided_slice %463 {offsets = [0, 0], sizes = [8, 32], strides = [1, 1]} : vector<8x64xf32> to vector<8x32xf32>
    %465 = vector.extract_strided_slice %463 {offsets = [0, 32], sizes = [8, 32], strides = [1, 1]} : vector<8x64xf32> to vector<8x32xf32>
    %c0_229 = arith.constant 0 : index
    %c0_230 = arith.constant 0 : index
    %c0_231 = arith.constant 0 : index
    %466 = vector.load %arg32[%c0_229, %c0_230, %c0_231] : memref<2x32x32xf32, #tpu.memory_space<vmem>>, vector<1x32x32xf32>
    %467 = vector.shape_cast %466 : vector<1x32x32xf32> to vector<32x32xf32>
    %c0_232 = arith.constant 0 : index
    %c0_233 = arith.constant 0 : index
    %c0_234 = arith.constant 0 : index
    %468 = vector.load %arg33[%c0_232, %c0_233, %c0_234] : memref<2x1x32xf32, #tpu.memory_space<vmem>>, vector<1x1x32xf32>
    %469 = vector.shape_cast %468 : vector<1x1x32xf32> to vector<1x32xf32>
    %470 = vector.extract_strided_slice %456 {offsets = [0, 0], sizes = [8, 8], strides = [1, 1]} : vector<8x32xf32> to vector<8x8xf32>
    %471 = vector.extract_strided_slice %464 {offsets = [0, 0], sizes = [8, 8], strides = [1, 1]} : vector<8x32xf32> to vector<8x8xf32>
    %472 = vector.extract_strided_slice %465 {offsets = [0, 0], sizes = [8, 8], strides = [1, 1]} : vector<8x32xf32> to vector<8x8xf32>
    "tpu.trace_start"() <{level = 10 : i32, message = "qd,kd->qk"}> : () -> ()
    %cst_235 = arith.constant dense<0.000000e+00> : vector<8x8xf32>
    %473 = tpu.matmul %470, %471, %cst_235 {dimension_numbers = #tpu.dot_dimension_numbers<[1], [1], [0], [0], [0, 0, 1, 0], [], []>} : vector<8x8xf32>, vector<8x8xf32>, vector<8x8xf32> -> vector<8x8xf32>
    "tpu.trace_stop"() : () -> ()
    %cst_236 = arith.constant 0.353553385 : f32
    %474 = vector.broadcast %cst_236 : f32 to vector<8x8xf32>
    %475 = arith.mulf %473, %474 : vector<8x8xf32>
    %cst_237 = arith.constant dense<0xFF800000> : vector<8xf32>
    %476 = vector.multi_reduction <maximumf>, %475, %cst_237 [1] : vector<8x8xf32> to vector<8xf32>
    %477 = vector.shape_cast %476 : vector<8xf32> to vector<8x1xf32>
    %478 = vector.broadcast %477 : vector<8x1xf32> to vector<8x8xf32>
    %479 = arith.subf %475, %478 : vector<8x8xf32>
    %480 = math.exp %479 : vector<8x8xf32>
    %cst_238 = arith.constant dense<0.000000e+00> : vector<8xf32>
    %481 = vector.multi_reduction <add>, %480, %cst_238 [1] : vector<8x8xf32> to vector<8xf32>
    %482 = vector.shape_cast %481 : vector<8xf32> to vector<8x1xf32>
    %483 = vector.broadcast %482 : vector<8x1xf32> to vector<8x8xf32>
    %484 = arith.divf %480, %483 : vector<8x8xf32>
    %cst_239 = arith.constant dense<0.000000e+00> : vector<8x8xf32>
    %485 = tpu.matmul %484, %472, %cst_239 {dimension_numbers = #tpu.dot_dimension_numbers<[1], [0], [0], [1], [0, 0, 1, 1], [], []>} : vector<8x8xf32>, vector<8x8xf32>, vector<8x8xf32> -> vector<8x8xf32>
    %486 = vector.extract_strided_slice %456 {offsets = [0, 8], sizes = [8, 8], strides = [1, 1]} : vector<8x32xf32> to vector<8x8xf32>
    %487 = vector.extract_strided_slice %464 {offsets = [0, 8], sizes = [8, 8], strides = [1, 1]} : vector<8x32xf32> to vector<8x8xf32>
    %488 = vector.extract_strided_slice %465 {offsets = [0, 8], sizes = [8, 8], strides = [1, 1]} : vector<8x32xf32> to vector<8x8xf32>
    "tpu.trace_start"() <{level = 10 : i32, message = "qd,kd->qk"}> : () -> ()
    %cst_240 = arith.constant dense<0.000000e+00> : vector<8x8xf32>
    %489 = tpu.matmul %486, %487, %cst_240 {dimension_numbers = #tpu.dot_dimension_numbers<[1], [1], [0], [0], [0, 0, 1, 0], [], []>} : vector<8x8xf32>, vector<8x8xf32>, vector<8x8xf32> -> vector<8x8xf32>
    "tpu.trace_stop"() : () -> ()
    %cst_241 = arith.constant 0.353553385 : f32
    %490 = vector.broadcast %cst_241 : f32 to vector<8x8xf32>
    %491 = arith.mulf %489, %490 : vector<8x8xf32>
    %cst_242 = arith.constant dense<0xFF800000> : vector<8xf32>
    %492 = vector.multi_reduction <maximumf>, %491, %cst_242 [1] : vector<8x8xf32> to vector<8xf32>
    %493 = vector.shape_cast %492 : vector<8xf32> to vector<8x1xf32>
    %494 = vector.broadcast %493 : vector<8x1xf32> to vector<8x8xf32>
    %495 = arith.subf %491, %494 : vector<8x8xf32>
    %496 = math.exp %495 : vector<8x8xf32>
    %cst_243 = arith.constant dense<0.000000e+00> : vector<8xf32>
    %497 = vector.multi_reduction <add>, %496, %cst_243 [1] : vector<8x8xf32> to vector<8xf32>
    %498 = vector.shape_cast %497 : vector<8xf32> to vector<8x1xf32>
    %499 = vector.broadcast %498 : vector<8x1xf32> to vector<8x8xf32>
    %500 = arith.divf %496, %499 : vector<8x8xf32>
    %cst_244 = arith.constant dense<0.000000e+00> : vector<8x8xf32>
    %501 = tpu.matmul %500, %488, %cst_244 {dimension_numbers = #tpu.dot_dimension_numbers<[1], [0], [0], [1], [0, 0, 1, 1], [], []>} : vector<8x8xf32>, vector<8x8xf32>, vector<8x8xf32> -> vector<8x8xf32>
    %502 = vector.extract_strided_slice %456 {offsets = [0, 16], sizes = [8, 8], strides = [1, 1]} : vector<8x32xf32> to vector<8x8xf32>
    %503 = vector.extract_strided_slice %464 {offsets = [0, 16], sizes = [8, 8], strides = [1, 1]} : vector<8x32xf32> to vector<8x8xf32>
    %504 = vector.extract_strided_slice %465 {offsets = [0, 16], sizes = [8, 8], strides = [1, 1]} : vector<8x32xf32> to vector<8x8xf32>
    "tpu.trace_start"() <{level = 10 : i32, message = "qd,kd->qk"}> : () -> ()
    %cst_245 = arith.constant dense<0.000000e+00> : vector<8x8xf32>
    %505 = tpu.matmul %502, %503, %cst_245 {dimension_numbers = #tpu.dot_dimension_numbers<[1], [1], [0], [0], [0, 0, 1, 0], [], []>} : vector<8x8xf32>, vector<8x8xf32>, vector<8x8xf32> -> vector<8x8xf32>
    "tpu.trace_stop"() : () -> ()
    %cst_246 = arith.constant 0.353553385 : f32
    %506 = vector.broadcast %cst_246 : f32 to vector<8x8xf32>
    %507 = arith.mulf %505, %506 : vector<8x8xf32>
    %cst_247 = arith.constant dense<0xFF800000> : vector<8xf32>
    %508 = vector.multi_reduction <maximumf>, %507, %cst_247 [1] : vector<8x8xf32> to vector<8xf32>
    %509 = vector.shape_cast %508 : vector<8xf32> to vector<8x1xf32>
    %510 = vector.broadcast %509 : vector<8x1xf32> to vector<8x8xf32>
    %511 = arith.subf %507, %510 : vector<8x8xf32>
    %512 = math.exp %511 : vector<8x8xf32>
    %cst_248 = arith.constant dense<0.000000e+00> : vector<8xf32>
    %513 = vector.multi_reduction <add>, %512, %cst_248 [1] : vector<8x8xf32> to vector<8xf32>
    %514 = vector.shape_cast %513 : vector<8xf32> to vector<8x1xf32>
    %515 = vector.broadcast %514 : vector<8x1xf32> to vector<8x8xf32>
    %516 = arith.divf %512, %515 : vector<8x8xf32>
    %cst_249 = arith.constant dense<0.000000e+00> : vector<8x8xf32>
    %517 = tpu.matmul %516, %504, %cst_249 {dimension_numbers = #tpu.dot_dimension_numbers<[1], [0], [0], [1], [0, 0, 1, 1], [], []>} : vector<8x8xf32>, vector<8x8xf32>, vector<8x8xf32> -> vector<8x8xf32>
    %518 = vector.extract_strided_slice %456 {offsets = [0, 24], sizes = [8, 8], strides = [1, 1]} : vector<8x32xf32> to vector<8x8xf32>
    %519 = vector.extract_strided_slice %464 {offsets = [0, 24], sizes = [8, 8], strides = [1, 1]} : vector<8x32xf32> to vector<8x8xf32>
    %520 = vector.extract_strided_slice %465 {offsets = [0, 24], sizes = [8, 8], strides = [1, 1]} : vector<8x32xf32> to vector<8x8xf32>
    "tpu.trace_start"() <{level = 10 : i32, message = "qd,kd->qk"}> : () -> ()
    %cst_250 = arith.constant dense<0.000000e+00> : vector<8x8xf32>
    %521 = tpu.matmul %518, %519, %cst_250 {dimension_numbers = #tpu.dot_dimension_numbers<[1], [1], [0], [0], [0, 0, 1, 0], [], []>} : vector<8x8xf32>, vector<8x8xf32>, vector<8x8xf32> -> vector<8x8xf32>
    "tpu.trace_stop"() : () -> ()
    %cst_251 = arith.constant 0.353553385 : f32
    %522 = vector.broadcast %cst_251 : f32 to vector<8x8xf32>
    %523 = arith.mulf %521, %522 : vector<8x8xf32>
    %cst_252 = arith.constant dense<0xFF800000> : vector<8xf32>
    %524 = vector.multi_reduction <maximumf>, %523, %cst_252 [1] : vector<8x8xf32> to vector<8xf32>
    %525 = vector.shape_cast %524 : vector<8xf32> to vector<8x1xf32>
    %526 = vector.broadcast %525 : vector<8x1xf32> to vector<8x8xf32>
    %527 = arith.subf %523, %526 : vector<8x8xf32>
    %528 = math.exp %527 : vector<8x8xf32>
    %cst_253 = arith.constant dense<0.000000e+00> : vector<8xf32>
    %529 = vector.multi_reduction <add>, %528, %cst_253 [1] : vector<8x8xf32> to vector<8xf32>
    %530 = vector.shape_cast %529 : vector<8xf32> to vector<8x1xf32>
    %531 = vector.broadcast %530 : vector<8x1xf32> to vector<8x8xf32>
    %532 = arith.divf %528, %531 : vector<8x8xf32>
    %cst_254 = arith.constant dense<0.000000e+00> : vector<8x8xf32>
    %533 = tpu.matmul %532, %520, %cst_254 {dimension_numbers = #tpu.dot_dimension_numbers<[1], [0], [0], [1], [0, 0, 1, 1], [], []>} : vector<8x8xf32>, vector<8x8xf32>, vector<8x8xf32> -> vector<8x8xf32>
    %534 = tpu.concatenate %485, %501, %517, %533 in 1 : vector<8x8xf32>, vector<8x8xf32>, vector<8x8xf32>, vector<8x8xf32> -> vector<8x32xf32>
    %cst_255 = arith.constant dense<0.000000e+00> : vector<8x32xf32>
    %535 = tpu.matmul %534, %467, %cst_255 {dimension_numbers = #tpu.dot_dimension_numbers<[1], [0], [0], [1], [0, 0, 1, 1], [], []>} : vector<8x32xf32>, vector<32x32xf32>, vector<8x32xf32> -> vector<8x32xf32>
    %536 = vector.broadcast %469 : vector<1x32xf32> to vector<8x32xf32>
    %537 = arith.addf %535, %536 : vector<8x32xf32>
    %538 = arith.addf %449, %537 : vector<8x32xf32>
    %c0_256 = arith.constant 0 : index
    %c0_257 = arith.constant 0 : index
    %c0_258 = arith.constant 0 : index
    %539 = vector.load %arg34[%c0_256, %c0_257, %c0_258] : memref<2x1x32xf32, #tpu.memory_space<vmem>>, vector<1x1x32xf32>
    %540 = vector.shape_cast %539 : vector<1x1x32xf32> to vector<1x32xf32>
    %c0_259 = arith.constant 0 : index
    %c0_260 = arith.constant 0 : index
    %c0_261 = arith.constant 0 : index
    %541 = vector.load %arg35[%c0_259, %c0_260, %c0_261] : memref<2x1x32xf32, #tpu.memory_space<vmem>>, vector<1x1x32xf32>
    %542 = vector.shape_cast %541 : vector<1x1x32xf32> to vector<1x32xf32>
    %cst_262 = arith.constant dense<0.000000e+00> : vector<8xf32>
    %543 = vector.multi_reduction <add>, %538, %cst_262 [1] : vector<8x32xf32> to vector<8xf32>
    %544 = vector.shape_cast %543 : vector<8xf32> to vector<8x1xf32>
    %cst_263 = arith.constant 3.200000e+01 : f32
    %545 = vector.broadcast %cst_263 : f32 to vector<8x1xf32>
    %546 = arith.divf %544, %545 : vector<8x1xf32>
    %547 = vector.broadcast %546 : vector<8x1xf32> to vector<8x32xf32>
    %548 = arith.subf %538, %547 : vector<8x32xf32>
    %549 = arith.mulf %548, %548 : vector<8x32xf32>
    %cst_264 = arith.constant dense<0.000000e+00> : vector<8xf32>
    %550 = vector.multi_reduction <add>, %549, %cst_264 [1] : vector<8x32xf32> to vector<8xf32>
    %551 = vector.shape_cast %550 : vector<8xf32> to vector<8x1xf32>
    %cst_265 = arith.constant 3.200000e+01 : f32
    %552 = vector.broadcast %cst_265 : f32 to vector<8x1xf32>
    %553 = arith.divf %551, %552 : vector<8x1xf32>
    %cst_266 = arith.constant 9.99999974E-6 : f32
    %554 = vector.broadcast %cst_266 : f32 to vector<8x1xf32>
    %555 = arith.addf %553, %554 : vector<8x1xf32>
    %556 = math.rsqrt %555 : vector<8x1xf32>
    %557 = vector.broadcast %556 : vector<8x1xf32> to vector<8x32xf32>
    %558 = arith.mulf %548, %557 : vector<8x32xf32>
    %559 = vector.broadcast %540 : vector<1x32xf32> to vector<8x32xf32>
    %560 = arith.mulf %558, %559 : vector<8x32xf32>
    %561 = vector.broadcast %542 : vector<1x32xf32> to vector<8x32xf32>
    %562 = arith.addf %560, %561 : vector<8x32xf32>
    %c0_267 = arith.constant 0 : index
    %c0_268 = arith.constant 0 : index
    %c0_269 = arith.constant 0 : index
    %563 = vector.load %arg36[%c0_267, %c0_268, %c0_269] : memref<2x32x64xf32, #tpu.memory_space<vmem>>, vector<1x32x64xf32>
    %564 = vector.shape_cast %563 : vector<1x32x64xf32> to vector<32x64xf32>
    %cst_270 = arith.constant dense<0.000000e+00> : vector<8x64xf32>
    %565 = tpu.matmul %562, %564, %cst_270 {dimension_numbers = #tpu.dot_dimension_numbers<[1], [0], [0], [1], [0, 0, 1, 1], [], []>} : vector<8x32xf32>, vector<32x64xf32>, vector<8x64xf32> -> vector<8x64xf32>
    %c0_271 = arith.constant 0 : index
    %c0_272 = arith.constant 0 : index
    %c0_273 = arith.constant 0 : index
    %566 = vector.load %arg37[%c0_271, %c0_272, %c0_273] : memref<2x1x64xf32, #tpu.memory_space<vmem>>, vector<1x1x64xf32>
    %567 = vector.shape_cast %566 : vector<1x1x64xf32> to vector<1x64xf32>
    %568 = vector.broadcast %567 : vector<1x64xf32> to vector<8x64xf32>
    %569 = arith.addf %565, %568 : vector<8x64xf32>
    %cst_274 = arith.constant 0.000000e+00 : f32
    %570 = vector.broadcast %cst_274 : f32 to vector<8x64xf32>
    %571 = arith.maximumf %569, %570 : vector<8x64xf32>
    %c0_275 = arith.constant 0 : index
    %c0_276 = arith.constant 0 : index
    %c0_277 = arith.constant 0 : index
    %572 = vector.load %arg38[%c0_275, %c0_276, %c0_277] : memref<2x64x32xf32, #tpu.memory_space<vmem>>, vector<1x64x32xf32>
    %573 = vector.shape_cast %572 : vector<1x64x32xf32> to vector<64x32xf32>
    %cst_278 = arith.constant dense<0.000000e+00> : vector<8x32xf32>
    %574 = tpu.matmul %571, %573, %cst_278 {dimension_numbers = #tpu.dot_dimension_numbers<[1], [0], [0], [1], [0, 0, 1, 1], [], []>} : vector<8x64xf32>, vector<64x32xf32>, vector<8x32xf32> -> vector<8x32xf32>
    %c0_279 = arith.constant 0 : index
    %c0_280 = arith.constant 0 : index
    %c0_281 = arith.constant 0 : index
    %575 = vector.load %arg39[%c0_279, %c0_280, %c0_281] : memref<2x1x32xf32, #tpu.memory_space<vmem>>, vector<1x1x32xf32>
    %576 = vector.shape_cast %575 : vector<1x1x32xf32> to vector<1x32xf32>
    %577 = vector.broadcast %576 : vector<1x32xf32> to vector<8x32xf32>
    %578 = arith.addf %574, %577 : vector<8x32xf32>
    %579 = arith.addf %562, %578 : vector<8x32xf32>
    %c0_282 = arith.constant 0 : index
    %c0_283 = arith.constant 0 : index
    %c0_284 = arith.constant 0 : index
    %580 = vector.load %arg40[%c0_282, %c0_283, %c0_284] : memref<2x1x32xf32, #tpu.memory_space<vmem>>, vector<1x1x32xf32>
    %581 = vector.shape_cast %580 : vector<1x1x32xf32> to vector<1x32xf32>
    %c0_285 = arith.constant 0 : index
    %c0_286 = arith.constant 0 : index
    %c0_287 = arith.constant 0 : index
    %582 = vector.load %arg41[%c0_285, %c0_286, %c0_287] : memref<2x1x32xf32, #tpu.memory_space<vmem>>, vector<1x1x32xf32>
    %583 = vector.shape_cast %582 : vector<1x1x32xf32> to vector<1x32xf32>
    %cst_288 = arith.constant dense<0.000000e+00> : vector<8xf32>
    %584 = vector.multi_reduction <add>, %579, %cst_288 [1] : vector<8x32xf32> to vector<8xf32>
    %585 = vector.shape_cast %584 : vector<8xf32> to vector<8x1xf32>
    %cst_289 = arith.constant 3.200000e+01 : f32
    %586 = vector.broadcast %cst_289 : f32 to vector<8x1xf32>
    %587 = arith.divf %585, %586 : vector<8x1xf32>
    %588 = vector.broadcast %587 : vector<8x1xf32> to vector<8x32xf32>
    %589 = arith.subf %579, %588 : vector<8x32xf32>
    %590 = arith.mulf %589, %589 : vector<8x32xf32>
    %cst_290 = arith.constant dense<0.000000e+00> : vector<8xf32>
    %591 = vector.multi_reduction <add>, %590, %cst_290 [1] : vector<8x32xf32> to vector<8xf32>
    %592 = vector.shape_cast %591 : vector<8xf32> to vector<8x1xf32>
    %cst_291 = arith.constant 3.200000e+01 : f32
    %593 = vector.broadcast %cst_291 : f32 to vector<8x1xf32>
    %594 = arith.divf %592, %593 : vector<8x1xf32>
    %cst_292 = arith.constant 9.99999974E-6 : f32
    %595 = vector.broadcast %cst_292 : f32 to vector<8x1xf32>
    %596 = arith.addf %594, %595 : vector<8x1xf32>
    %597 = math.rsqrt %596 : vector<8x1xf32>
    %598 = vector.broadcast %597 : vector<8x1xf32> to vector<8x32xf32>
    %599 = arith.mulf %589, %598 : vector<8x32xf32>
    %600 = vector.broadcast %581 : vector<1x32xf32> to vector<8x32xf32>
    %601 = arith.mulf %599, %600 : vector<8x32xf32>
    %602 = vector.broadcast %583 : vector<1x32xf32> to vector<8x32xf32>
    %603 = arith.addf %601, %602 : vector<8x32xf32>
    %c1_293 = arith.constant 1 : index
    %c0_294 = arith.constant 0 : index
    %c0_295 = arith.constant 0 : index
    %604 = vector.load %arg22[%c1_293, %c0_294, %c0_295] : memref<2x32x96xf32, #tpu.memory_space<vmem>>, vector<1x32x96xf32>
    %605 = vector.shape_cast %604 : vector<1x32x96xf32> to vector<32x96xf32>
    %cst_296 = arith.constant dense<0.000000e+00> : vector<8x96xf32>
    %606 = tpu.matmul %603, %605, %cst_296 {dimension_numbers = #tpu.dot_dimension_numbers<[1], [0], [0], [1], [0, 0, 1, 1], [], []>} : vector<8x32xf32>, vector<32x96xf32>, vector<8x96xf32> -> vector<8x96xf32>
    %c1_297 = arith.constant 1 : index
    %c0_298 = arith.constant 0 : index
    %c0_299 = arith.constant 0 : index
    %607 = vector.load %arg23[%c1_297, %c0_298, %c0_299] : memref<2x1x96xf32, #tpu.memory_space<vmem>>, vector<1x1x96xf32>
    %608 = vector.shape_cast %607 : vector<1x1x96xf32> to vector<1x96xf32>
    %609 = vector.broadcast %608 : vector<1x96xf32> to vector<8x96xf32>
    %610 = arith.addf %606, %609 : vector<8x96xf32>
    %611 = vector.extract_strided_slice %610 {offsets = [0, 0], sizes = [8, 32], strides = [1, 1]} : vector<8x96xf32> to vector<8x32xf32>
    %612 = vector.extract_strided_slice %610 {offsets = [0, 32], sizes = [8, 32], strides = [1, 1]} : vector<8x96xf32> to vector<8x32xf32>
    %613 = vector.extract_strided_slice %610 {offsets = [0, 64], sizes = [8, 32], strides = [1, 1]} : vector<8x96xf32> to vector<8x32xf32>
    %c1_300 = arith.constant 1 : index
    %c0_301 = arith.constant 0 : index
    %c0_302 = arith.constant 0 : index
    %614 = vector.load %arg24[%c1_300, %c0_301, %c0_302] : memref<2x32x32xf32, #tpu.memory_space<vmem>>, vector<1x32x32xf32>
    %615 = vector.shape_cast %614 : vector<1x32x32xf32> to vector<32x32xf32>
    %c1_303 = arith.constant 1 : index
    %c0_304 = arith.constant 0 : index
    %c0_305 = arith.constant 0 : index
    %616 = vector.load %arg25[%c1_303, %c0_304, %c0_305] : memref<2x1x32xf32, #tpu.memory_space<vmem>>, vector<1x1x32xf32>
    %617 = vector.shape_cast %616 : vector<1x1x32xf32> to vector<1x32xf32>
    %618 = vector.extract_strided_slice %611 {offsets = [0, 0], sizes = [8, 8], strides = [1, 1]} : vector<8x32xf32> to vector<8x8xf32>
    %619 = vector.extract_strided_slice %612 {offsets = [0, 0], sizes = [8, 8], strides = [1, 1]} : vector<8x32xf32> to vector<8x8xf32>
    %620 = vector.extract_strided_slice %613 {offsets = [0, 0], sizes = [8, 8], strides = [1, 1]} : vector<8x32xf32> to vector<8x8xf32>
    "tpu.trace_start"() <{level = 10 : i32, message = "qd,kd->qk"}> : () -> ()
    %cst_306 = arith.constant dense<0.000000e+00> : vector<8x8xf32>
    %621 = tpu.matmul %618, %619, %cst_306 {dimension_numbers = #tpu.dot_dimension_numbers<[1], [1], [0], [0], [0, 0, 1, 0], [], []>} : vector<8x8xf32>, vector<8x8xf32>, vector<8x8xf32> -> vector<8x8xf32>
    "tpu.trace_stop"() : () -> ()
    %cst_307 = arith.constant 0.353553385 : f32
    %622 = vector.broadcast %cst_307 : f32 to vector<8x8xf32>
    %623 = arith.mulf %621, %622 : vector<8x8xf32>
    %624 = arith.addf %623, %20 : vector<8x8xf32>
    %cst_308 = arith.constant dense<0xFF800000> : vector<8xf32>
    %625 = vector.multi_reduction <maximumf>, %624, %cst_308 [1] : vector<8x8xf32> to vector<8xf32>
    %626 = vector.shape_cast %625 : vector<8xf32> to vector<8x1xf32>
    %627 = vector.broadcast %626 : vector<8x1xf32> to vector<8x8xf32>
    %628 = arith.subf %624, %627 : vector<8x8xf32>
    %629 = math.exp %628 : vector<8x8xf32>
    %cst_309 = arith.constant dense<0.000000e+00> : vector<8xf32>
    %630 = vector.multi_reduction <add>, %629, %cst_309 [1] : vector<8x8xf32> to vector<8xf32>
    %631 = vector.shape_cast %630 : vector<8xf32> to vector<8x1xf32>
    %632 = vector.broadcast %631 : vector<8x1xf32> to vector<8x8xf32>
    %633 = arith.divf %629, %632 : vector<8x8xf32>
    %cst_310 = arith.constant dense<0.000000e+00> : vector<8x8xf32>
    %634 = tpu.matmul %633, %620, %cst_310 {dimension_numbers = #tpu.dot_dimension_numbers<[1], [0], [0], [1], [0, 0, 1, 1], [], []>} : vector<8x8xf32>, vector<8x8xf32>, vector<8x8xf32> -> vector<8x8xf32>
    %635 = vector.extract_strided_slice %611 {offsets = [0, 8], sizes = [8, 8], strides = [1, 1]} : vector<8x32xf32> to vector<8x8xf32>
    %636 = vector.extract_strided_slice %612 {offsets = [0, 8], sizes = [8, 8], strides = [1, 1]} : vector<8x32xf32> to vector<8x8xf32>
    %637 = vector.extract_strided_slice %613 {offsets = [0, 8], sizes = [8, 8], strides = [1, 1]} : vector<8x32xf32> to vector<8x8xf32>
    "tpu.trace_start"() <{level = 10 : i32, message = "qd,kd->qk"}> : () -> ()
    %cst_311 = arith.constant dense<0.000000e+00> : vector<8x8xf32>
    %638 = tpu.matmul %635, %636, %cst_311 {dimension_numbers = #tpu.dot_dimension_numbers<[1], [1], [0], [0], [0, 0, 1, 0], [], []>} : vector<8x8xf32>, vector<8x8xf32>, vector<8x8xf32> -> vector<8x8xf32>
    "tpu.trace_stop"() : () -> ()
    %cst_312 = arith.constant 0.353553385 : f32
    %639 = vector.broadcast %cst_312 : f32 to vector<8x8xf32>
    %640 = arith.mulf %638, %639 : vector<8x8xf32>
    %641 = arith.addf %640, %20 : vector<8x8xf32>
    %cst_313 = arith.constant dense<0xFF800000> : vector<8xf32>
    %642 = vector.multi_reduction <maximumf>, %641, %cst_313 [1] : vector<8x8xf32> to vector<8xf32>
    %643 = vector.shape_cast %642 : vector<8xf32> to vector<8x1xf32>
    %644 = vector.broadcast %643 : vector<8x1xf32> to vector<8x8xf32>
    %645 = arith.subf %641, %644 : vector<8x8xf32>
    %646 = math.exp %645 : vector<8x8xf32>
    %cst_314 = arith.constant dense<0.000000e+00> : vector<8xf32>
    %647 = vector.multi_reduction <add>, %646, %cst_314 [1] : vector<8x8xf32> to vector<8xf32>
    %648 = vector.shape_cast %647 : vector<8xf32> to vector<8x1xf32>
    %649 = vector.broadcast %648 : vector<8x1xf32> to vector<8x8xf32>
    %650 = arith.divf %646, %649 : vector<8x8xf32>
    %cst_315 = arith.constant dense<0.000000e+00> : vector<8x8xf32>
    %651 = tpu.matmul %650, %637, %cst_315 {dimension_numbers = #tpu.dot_dimension_numbers<[1], [0], [0], [1], [0, 0, 1, 1], [], []>} : vector<8x8xf32>, vector<8x8xf32>, vector<8x8xf32> -> vector<8x8xf32>
    %652 = vector.extract_strided_slice %611 {offsets = [0, 16], sizes = [8, 8], strides = [1, 1]} : vector<8x32xf32> to vector<8x8xf32>
    %653 = vector.extract_strided_slice %612 {offsets = [0, 16], sizes = [8, 8], strides = [1, 1]} : vector<8x32xf32> to vector<8x8xf32>
    %654 = vector.extract_strided_slice %613 {offsets = [0, 16], sizes = [8, 8], strides = [1, 1]} : vector<8x32xf32> to vector<8x8xf32>
    "tpu.trace_start"() <{level = 10 : i32, message = "qd,kd->qk"}> : () -> ()
    %cst_316 = arith.constant dense<0.000000e+00> : vector<8x8xf32>
    %655 = tpu.matmul %652, %653, %cst_316 {dimension_numbers = #tpu.dot_dimension_numbers<[1], [1], [0], [0], [0, 0, 1, 0], [], []>} : vector<8x8xf32>, vector<8x8xf32>, vector<8x8xf32> -> vector<8x8xf32>
    "tpu.trace_stop"() : () -> ()
    %cst_317 = arith.constant 0.353553385 : f32
    %656 = vector.broadcast %cst_317 : f32 to vector<8x8xf32>
    %657 = arith.mulf %655, %656 : vector<8x8xf32>
    %658 = arith.addf %657, %20 : vector<8x8xf32>
    %cst_318 = arith.constant dense<0xFF800000> : vector<8xf32>
    %659 = vector.multi_reduction <maximumf>, %658, %cst_318 [1] : vector<8x8xf32> to vector<8xf32>
    %660 = vector.shape_cast %659 : vector<8xf32> to vector<8x1xf32>
    %661 = vector.broadcast %660 : vector<8x1xf32> to vector<8x8xf32>
    %662 = arith.subf %658, %661 : vector<8x8xf32>
    %663 = math.exp %662 : vector<8x8xf32>
    %cst_319 = arith.constant dense<0.000000e+00> : vector<8xf32>
    %664 = vector.multi_reduction <add>, %663, %cst_319 [1] : vector<8x8xf32> to vector<8xf32>
    %665 = vector.shape_cast %664 : vector<8xf32> to vector<8x1xf32>
    %666 = vector.broadcast %665 : vector<8x1xf32> to vector<8x8xf32>
    %667 = arith.divf %663, %666 : vector<8x8xf32>
    %cst_320 = arith.constant dense<0.000000e+00> : vector<8x8xf32>
    %668 = tpu.matmul %667, %654, %cst_320 {dimension_numbers = #tpu.dot_dimension_numbers<[1], [0], [0], [1], [0, 0, 1, 1], [], []>} : vector<8x8xf32>, vector<8x8xf32>, vector<8x8xf32> -> vector<8x8xf32>
    %669 = vector.extract_strided_slice %611 {offsets = [0, 24], sizes = [8, 8], strides = [1, 1]} : vector<8x32xf32> to vector<8x8xf32>
    %670 = vector.extract_strided_slice %612 {offsets = [0, 24], sizes = [8, 8], strides = [1, 1]} : vector<8x32xf32> to vector<8x8xf32>
    %671 = vector.extract_strided_slice %613 {offsets = [0, 24], sizes = [8, 8], strides = [1, 1]} : vector<8x32xf32> to vector<8x8xf32>
    "tpu.trace_start"() <{level = 10 : i32, message = "qd,kd->qk"}> : () -> ()
    %cst_321 = arith.constant dense<0.000000e+00> : vector<8x8xf32>
    %672 = tpu.matmul %669, %670, %cst_321 {dimension_numbers = #tpu.dot_dimension_numbers<[1], [1], [0], [0], [0, 0, 1, 0], [], []>} : vector<8x8xf32>, vector<8x8xf32>, vector<8x8xf32> -> vector<8x8xf32>
    "tpu.trace_stop"() : () -> ()
    %cst_322 = arith.constant 0.353553385 : f32
    %673 = vector.broadcast %cst_322 : f32 to vector<8x8xf32>
    %674 = arith.mulf %672, %673 : vector<8x8xf32>
    %675 = arith.addf %674, %20 : vector<8x8xf32>
    %cst_323 = arith.constant dense<0xFF800000> : vector<8xf32>
    %676 = vector.multi_reduction <maximumf>, %675, %cst_323 [1] : vector<8x8xf32> to vector<8xf32>
    %677 = vector.shape_cast %676 : vector<8xf32> to vector<8x1xf32>
    %678 = vector.broadcast %677 : vector<8x1xf32> to vector<8x8xf32>
    %679 = arith.subf %675, %678 : vector<8x8xf32>
    %680 = math.exp %679 : vector<8x8xf32>
    %cst_324 = arith.constant dense<0.000000e+00> : vector<8xf32>
    %681 = vector.multi_reduction <add>, %680, %cst_324 [1] : vector<8x8xf32> to vector<8xf32>
    %682 = vector.shape_cast %681 : vector<8xf32> to vector<8x1xf32>
    %683 = vector.broadcast %682 : vector<8x1xf32> to vector<8x8xf32>
    %684 = arith.divf %680, %683 : vector<8x8xf32>
    %cst_325 = arith.constant dense<0.000000e+00> : vector<8x8xf32>
    %685 = tpu.matmul %684, %671, %cst_325 {dimension_numbers = #tpu.dot_dimension_numbers<[1], [0], [0], [1], [0, 0, 1, 1], [], []>} : vector<8x8xf32>, vector<8x8xf32>, vector<8x8xf32> -> vector<8x8xf32>
    %686 = tpu.concatenate %634, %651, %668, %685 in 1 : vector<8x8xf32>, vector<8x8xf32>, vector<8x8xf32>, vector<8x8xf32> -> vector<8x32xf32>
    %cst_326 = arith.constant dense<0.000000e+00> : vector<8x32xf32>
    %687 = tpu.matmul %686, %615, %cst_326 {dimension_numbers = #tpu.dot_dimension_numbers<[1], [0], [0], [1], [0, 0, 1, 1], [], []>} : vector<8x32xf32>, vector<32x32xf32>, vector<8x32xf32> -> vector<8x32xf32>
    %688 = vector.broadcast %617 : vector<1x32xf32> to vector<8x32xf32>
    %689 = arith.addf %687, %688 : vector<8x32xf32>
    %690 = arith.addf %603, %689 : vector<8x32xf32>
    %c1_327 = arith.constant 1 : index
    %c0_328 = arith.constant 0 : index
    %c0_329 = arith.constant 0 : index
    %691 = vector.load %arg26[%c1_327, %c0_328, %c0_329] : memref<2x1x32xf32, #tpu.memory_space<vmem>>, vector<1x1x32xf32>
    %692 = vector.shape_cast %691 : vector<1x1x32xf32> to vector<1x32xf32>
    %c1_330 = arith.constant 1 : index
    %c0_331 = arith.constant 0 : index
    %c0_332 = arith.constant 0 : index
    %693 = vector.load %arg27[%c1_330, %c0_331, %c0_332] : memref<2x1x32xf32, #tpu.memory_space<vmem>>, vector<1x1x32xf32>
    %694 = vector.shape_cast %693 : vector<1x1x32xf32> to vector<1x32xf32>
    %cst_333 = arith.constant dense<0.000000e+00> : vector<8xf32>
    %695 = vector.multi_reduction <add>, %690, %cst_333 [1] : vector<8x32xf32> to vector<8xf32>
    %696 = vector.shape_cast %695 : vector<8xf32> to vector<8x1xf32>
    %cst_334 = arith.constant 3.200000e+01 : f32
    %697 = vector.broadcast %cst_334 : f32 to vector<8x1xf32>
    %698 = arith.divf %696, %697 : vector<8x1xf32>
    %699 = vector.broadcast %698 : vector<8x1xf32> to vector<8x32xf32>
    %700 = arith.subf %690, %699 : vector<8x32xf32>
    %701 = arith.mulf %700, %700 : vector<8x32xf32>
    %cst_335 = arith.constant dense<0.000000e+00> : vector<8xf32>
    %702 = vector.multi_reduction <add>, %701, %cst_335 [1] : vector<8x32xf32> to vector<8xf32>
    %703 = vector.shape_cast %702 : vector<8xf32> to vector<8x1xf32>
    %cst_336 = arith.constant 3.200000e+01 : f32
    %704 = vector.broadcast %cst_336 : f32 to vector<8x1xf32>
    %705 = arith.divf %703, %704 : vector<8x1xf32>
    %cst_337 = arith.constant 9.99999974E-6 : f32
    %706 = vector.broadcast %cst_337 : f32 to vector<8x1xf32>
    %707 = arith.addf %705, %706 : vector<8x1xf32>
    %708 = math.rsqrt %707 : vector<8x1xf32>
    %709 = vector.broadcast %708 : vector<8x1xf32> to vector<8x32xf32>
    %710 = arith.mulf %700, %709 : vector<8x32xf32>
    %711 = vector.broadcast %692 : vector<1x32xf32> to vector<8x32xf32>
    %712 = arith.mulf %710, %711 : vector<8x32xf32>
    %713 = vector.broadcast %694 : vector<1x32xf32> to vector<8x32xf32>
    %714 = arith.addf %712, %713 : vector<8x32xf32>
    %c1_338 = arith.constant 1 : index
    %c0_339 = arith.constant 0 : index
    %c0_340 = arith.constant 0 : index
    %715 = vector.load %arg28[%c1_338, %c0_339, %c0_340] : memref<2x32x32xf32, #tpu.memory_space<vmem>>, vector<1x32x32xf32>
    %716 = vector.shape_cast %715 : vector<1x32x32xf32> to vector<32x32xf32>
    %cst_341 = arith.constant dense<0.000000e+00> : vector<8x32xf32>
    %717 = tpu.matmul %714, %716, %cst_341 {dimension_numbers = #tpu.dot_dimension_numbers<[1], [0], [0], [1], [0, 0, 1, 1], [], []>} : vector<8x32xf32>, vector<32x32xf32>, vector<8x32xf32> -> vector<8x32xf32>
    %c1_342 = arith.constant 1 : index
    %c0_343 = arith.constant 0 : index
    %c0_344 = arith.constant 0 : index
    %718 = vector.load %arg29[%c1_342, %c0_343, %c0_344] : memref<2x1x32xf32, #tpu.memory_space<vmem>>, vector<1x1x32xf32>
    %719 = vector.shape_cast %718 : vector<1x1x32xf32> to vector<1x32xf32>
    %720 = vector.broadcast %719 : vector<1x32xf32> to vector<8x32xf32>
    %721 = arith.addf %717, %720 : vector<8x32xf32>
    %c1_345 = arith.constant 1 : index
    %c0_346 = arith.constant 0 : index
    %c0_347 = arith.constant 0 : index
    %722 = vector.load %arg30[%c1_345, %c0_346, %c0_347] : memref<2x32x64xf32, #tpu.memory_space<vmem>>, vector<1x32x64xf32>
    %723 = vector.shape_cast %722 : vector<1x32x64xf32> to vector<32x64xf32>
    %cst_348 = arith.constant dense<0.000000e+00> : vector<8x64xf32>
    %724 = tpu.matmul %338, %723, %cst_348 {dimension_numbers = #tpu.dot_dimension_numbers<[1], [0], [0], [1], [0, 0, 1, 1], [], []>} : vector<8x32xf32>, vector<32x64xf32>, vector<8x64xf32> -> vector<8x64xf32>
    %c1_349 = arith.constant 1 : index
    %c0_350 = arith.constant 0 : index
    %c0_351 = arith.constant 0 : index
    %725 = vector.load %arg31[%c1_349, %c0_350, %c0_351] : memref<2x1x64xf32, #tpu.memory_space<vmem>>, vector<1x1x64xf32>
    %726 = vector.shape_cast %725 : vector<1x1x64xf32> to vector<1x64xf32>
    %727 = vector.broadcast %726 : vector<1x64xf32> to vector<8x64xf32>
    %728 = arith.addf %724, %727 : vector<8x64xf32>
    %729 = vector.extract_strided_slice %728 {offsets = [0, 0], sizes = [8, 32], strides = [1, 1]} : vector<8x64xf32> to vector<8x32xf32>
    %730 = vector.extract_strided_slice %728 {offsets = [0, 32], sizes = [8, 32], strides = [1, 1]} : vector<8x64xf32> to vector<8x32xf32>
    %c1_352 = arith.constant 1 : index
    %c0_353 = arith.constant 0 : index
    %c0_354 = arith.constant 0 : index
    %731 = vector.load %arg32[%c1_352, %c0_353, %c0_354] : memref<2x32x32xf32, #tpu.memory_space<vmem>>, vector<1x32x32xf32>
    %732 = vector.shape_cast %731 : vector<1x32x32xf32> to vector<32x32xf32>
    %c1_355 = arith.constant 1 : index
    %c0_356 = arith.constant 0 : index
    %c0_357 = arith.constant 0 : index
    %733 = vector.load %arg33[%c1_355, %c0_356, %c0_357] : memref<2x1x32xf32, #tpu.memory_space<vmem>>, vector<1x1x32xf32>
    %734 = vector.shape_cast %733 : vector<1x1x32xf32> to vector<1x32xf32>
    %735 = vector.extract_strided_slice %721 {offsets = [0, 0], sizes = [8, 8], strides = [1, 1]} : vector<8x32xf32> to vector<8x8xf32>
    %736 = vector.extract_strided_slice %729 {offsets = [0, 0], sizes = [8, 8], strides = [1, 1]} : vector<8x32xf32> to vector<8x8xf32>
    %737 = vector.extract_strided_slice %730 {offsets = [0, 0], sizes = [8, 8], strides = [1, 1]} : vector<8x32xf32> to vector<8x8xf32>
    "tpu.trace_start"() <{level = 10 : i32, message = "qd,kd->qk"}> : () -> ()
    %cst_358 = arith.constant dense<0.000000e+00> : vector<8x8xf32>
    %738 = tpu.matmul %735, %736, %cst_358 {dimension_numbers = #tpu.dot_dimension_numbers<[1], [1], [0], [0], [0, 0, 1, 0], [], []>} : vector<8x8xf32>, vector<8x8xf32>, vector<8x8xf32> -> vector<8x8xf32>
    "tpu.trace_stop"() : () -> ()
    %cst_359 = arith.constant 0.353553385 : f32
    %739 = vector.broadcast %cst_359 : f32 to vector<8x8xf32>
    %740 = arith.mulf %738, %739 : vector<8x8xf32>
    %cst_360 = arith.constant dense<0xFF800000> : vector<8xf32>
    %741 = vector.multi_reduction <maximumf>, %740, %cst_360 [1] : vector<8x8xf32> to vector<8xf32>
    %742 = vector.shape_cast %741 : vector<8xf32> to vector<8x1xf32>
    %743 = vector.broadcast %742 : vector<8x1xf32> to vector<8x8xf32>
    %744 = arith.subf %740, %743 : vector<8x8xf32>
    %745 = math.exp %744 : vector<8x8xf32>
    %cst_361 = arith.constant dense<0.000000e+00> : vector<8xf32>
    %746 = vector.multi_reduction <add>, %745, %cst_361 [1] : vector<8x8xf32> to vector<8xf32>
    %747 = vector.shape_cast %746 : vector<8xf32> to vector<8x1xf32>
    %748 = vector.broadcast %747 : vector<8x1xf32> to vector<8x8xf32>
    %749 = arith.divf %745, %748 : vector<8x8xf32>
    %cst_362 = arith.constant dense<0.000000e+00> : vector<8x8xf32>
    %750 = tpu.matmul %749, %737, %cst_362 {dimension_numbers = #tpu.dot_dimension_numbers<[1], [0], [0], [1], [0, 0, 1, 1], [], []>} : vector<8x8xf32>, vector<8x8xf32>, vector<8x8xf32> -> vector<8x8xf32>
    %751 = vector.extract_strided_slice %721 {offsets = [0, 8], sizes = [8, 8], strides = [1, 1]} : vector<8x32xf32> to vector<8x8xf32>
    %752 = vector.extract_strided_slice %729 {offsets = [0, 8], sizes = [8, 8], strides = [1, 1]} : vector<8x32xf32> to vector<8x8xf32>
    %753 = vector.extract_strided_slice %730 {offsets = [0, 8], sizes = [8, 8], strides = [1, 1]} : vector<8x32xf32> to vector<8x8xf32>
    "tpu.trace_start"() <{level = 10 : i32, message = "qd,kd->qk"}> : () -> ()
    %cst_363 = arith.constant dense<0.000000e+00> : vector<8x8xf32>
    %754 = tpu.matmul %751, %752, %cst_363 {dimension_numbers = #tpu.dot_dimension_numbers<[1], [1], [0], [0], [0, 0, 1, 0], [], []>} : vector<8x8xf32>, vector<8x8xf32>, vector<8x8xf32> -> vector<8x8xf32>
    "tpu.trace_stop"() : () -> ()
    %cst_364 = arith.constant 0.353553385 : f32
    %755 = vector.broadcast %cst_364 : f32 to vector<8x8xf32>
    %756 = arith.mulf %754, %755 : vector<8x8xf32>
    %cst_365 = arith.constant dense<0xFF800000> : vector<8xf32>
    %757 = vector.multi_reduction <maximumf>, %756, %cst_365 [1] : vector<8x8xf32> to vector<8xf32>
    %758 = vector.shape_cast %757 : vector<8xf32> to vector<8x1xf32>
    %759 = vector.broadcast %758 : vector<8x1xf32> to vector<8x8xf32>
    %760 = arith.subf %756, %759 : vector<8x8xf32>
    %761 = math.exp %760 : vector<8x8xf32>
    %cst_366 = arith.constant dense<0.000000e+00> : vector<8xf32>
    %762 = vector.multi_reduction <add>, %761, %cst_366 [1] : vector<8x8xf32> to vector<8xf32>
    %763 = vector.shape_cast %762 : vector<8xf32> to vector<8x1xf32>
    %764 = vector.broadcast %763 : vector<8x1xf32> to vector<8x8xf32>
    %765 = arith.divf %761, %764 : vector<8x8xf32>
    %cst_367 = arith.constant dense<0.000000e+00> : vector<8x8xf32>
    %766 = tpu.matmul %765, %753, %cst_367 {dimension_numbers = #tpu.dot_dimension_numbers<[1], [0], [0], [1], [0, 0, 1, 1], [], []>} : vector<8x8xf32>, vector<8x8xf32>, vector<8x8xf32> -> vector<8x8xf32>
    %767 = vector.extract_strided_slice %721 {offsets = [0, 16], sizes = [8, 8], strides = [1, 1]} : vector<8x32xf32> to vector<8x8xf32>
    %768 = vector.extract_strided_slice %729 {offsets = [0, 16], sizes = [8, 8], strides = [1, 1]} : vector<8x32xf32> to vector<8x8xf32>
    %769 = vector.extract_strided_slice %730 {offsets = [0, 16], sizes = [8, 8], strides = [1, 1]} : vector<8x32xf32> to vector<8x8xf32>
    "tpu.trace_start"() <{level = 10 : i32, message = "qd,kd->qk"}> : () -> ()
    %cst_368 = arith.constant dense<0.000000e+00> : vector<8x8xf32>
    %770 = tpu.matmul %767, %768, %cst_368 {dimension_numbers = #tpu.dot_dimension_numbers<[1], [1], [0], [0], [0, 0, 1, 0], [], []>} : vector<8x8xf32>, vector<8x8xf32>, vector<8x8xf32> -> vector<8x8xf32>
    "tpu.trace_stop"() : () -> ()
    %cst_369 = arith.constant 0.353553385 : f32
    %771 = vector.broadcast %cst_369 : f32 to vector<8x8xf32>
    %772 = arith.mulf %770, %771 : vector<8x8xf32>
    %cst_370 = arith.constant dense<0xFF800000> : vector<8xf32>
    %773 = vector.multi_reduction <maximumf>, %772, %cst_370 [1] : vector<8x8xf32> to vector<8xf32>
    %774 = vector.shape_cast %773 : vector<8xf32> to vector<8x1xf32>
    %775 = vector.broadcast %774 : vector<8x1xf32> to vector<8x8xf32>
    %776 = arith.subf %772, %775 : vector<8x8xf32>
    %777 = math.exp %776 : vector<8x8xf32>
    %cst_371 = arith.constant dense<0.000000e+00> : vector<8xf32>
    %778 = vector.multi_reduction <add>, %777, %cst_371 [1] : vector<8x8xf32> to vector<8xf32>
    %779 = vector.shape_cast %778 : vector<8xf32> to vector<8x1xf32>
    %780 = vector.broadcast %779 : vector<8x1xf32> to vector<8x8xf32>
    %781 = arith.divf %777, %780 : vector<8x8xf32>
    %cst_372 = arith.constant dense<0.000000e+00> : vector<8x8xf32>
    %782 = tpu.matmul %781, %769, %cst_372 {dimension_numbers = #tpu.dot_dimension_numbers<[1], [0], [0], [1], [0, 0, 1, 1], [], []>} : vector<8x8xf32>, vector<8x8xf32>, vector<8x8xf32> -> vector<8x8xf32>
    %783 = vector.extract_strided_slice %721 {offsets = [0, 24], sizes = [8, 8], strides = [1, 1]} : vector<8x32xf32> to vector<8x8xf32>
    %784 = vector.extract_strided_slice %729 {offsets = [0, 24], sizes = [8, 8], strides = [1, 1]} : vector<8x32xf32> to vector<8x8xf32>
    %785 = vector.extract_strided_slice %730 {offsets = [0, 24], sizes = [8, 8], strides = [1, 1]} : vector<8x32xf32> to vector<8x8xf32>
    "tpu.trace_start"() <{level = 10 : i32, message = "qd,kd->qk"}> : () -> ()
    %cst_373 = arith.constant dense<0.000000e+00> : vector<8x8xf32>
    %786 = tpu.matmul %783, %784, %cst_373 {dimension_numbers = #tpu.dot_dimension_numbers<[1], [1], [0], [0], [0, 0, 1, 0], [], []>} : vector<8x8xf32>, vector<8x8xf32>, vector<8x8xf32> -> vector<8x8xf32>
    "tpu.trace_stop"() : () -> ()
    %cst_374 = arith.constant 0.353553385 : f32
    %787 = vector.broadcast %cst_374 : f32 to vector<8x8xf32>
    %788 = arith.mulf %786, %787 : vector<8x8xf32>
    %cst_375 = arith.constant dense<0xFF800000> : vector<8xf32>
    %789 = vector.multi_reduction <maximumf>, %788, %cst_375 [1] : vector<8x8xf32> to vector<8xf32>
    %790 = vector.shape_cast %789 : vector<8xf32> to vector<8x1xf32>
    %791 = vector.broadcast %790 : vector<8x1xf32> to vector<8x8xf32>
    %792 = arith.subf %788, %791 : vector<8x8xf32>
    %793 = math.exp %792 : vector<8x8xf32>
    %cst_376 = arith.constant dense<0.000000e+00> : vector<8xf32>
    %794 = vector.multi_reduction <add>, %793, %cst_376 [1] : vector<8x8xf32> to vector<8xf32>
    %795 = vector.shape_cast %794 : vector<8xf32> to vector<8x1xf32>
    %796 = vector.broadcast %795 : vector<8x1xf32> to vector<8x8xf32>
    %797 = arith.divf %793, %796 : vector<8x8xf32>
    %cst_377 = arith.constant dense<0.000000e+00> : vector<8x8xf32>
    %798 = tpu.matmul %797, %785, %cst_377 {dimension_numbers = #tpu.dot_dimension_numbers<[1], [0], [0], [1], [0, 0, 1, 1], [], []>} : vector<8x8xf32>, vector<8x8xf32>, vector<8x8xf32> -> vector<8x8xf32>
    %799 = tpu.concatenate %750, %766, %782, %798 in 1 : vector<8x8xf32>, vector<8x8xf32>, vector<8x8xf32>, vector<8x8xf32> -> vector<8x32xf32>
    %cst_378 = arith.constant dense<0.000000e+00> : vector<8x32xf32>
    %800 = tpu.matmul %799, %732, %cst_378 {dimension_numbers = #tpu.dot_dimension_numbers<[1], [0], [0], [1], [0, 0, 1, 1], [], []>} : vector<8x32xf32>, vector<32x32xf32>, vector<8x32xf32> -> vector<8x32xf32>
    %801 = vector.broadcast %734 : vector<1x32xf32> to vector<8x32xf32>
    %802 = arith.addf %800, %801 : vector<8x32xf32>
    %803 = arith.addf %714, %802 : vector<8x32xf32>
    %c1_379 = arith.constant 1 : index
    %c0_380 = arith.constant 0 : index
    %c0_381 = arith.constant 0 : index
    %804 = vector.load %arg34[%c1_379, %c0_380, %c0_381] : memref<2x1x32xf32, #tpu.memory_space<vmem>>, vector<1x1x32xf32>
    %805 = vector.shape_cast %804 : vector<1x1x32xf32> to vector<1x32xf32>
    %c1_382 = arith.constant 1 : index
    %c0_383 = arith.constant 0 : index
    %c0_384 = arith.constant 0 : index
    %806 = vector.load %arg35[%c1_382, %c0_383, %c0_384] : memref<2x1x32xf32, #tpu.memory_space<vmem>>, vector<1x1x32xf32>
    %807 = vector.shape_cast %806 : vector<1x1x32xf32> to vector<1x32xf32>
    %cst_385 = arith.constant dense<0.000000e+00> : vector<8xf32>
    %808 = vector.multi_reduction <add>, %803, %cst_385 [1] : vector<8x32xf32> to vector<8xf32>
    %809 = vector.shape_cast %808 : vector<8xf32> to vector<8x1xf32>
    %cst_386 = arith.constant 3.200000e+01 : f32
    %810 = vector.broadcast %cst_386 : f32 to vector<8x1xf32>
    %811 = arith.divf %809, %810 : vector<8x1xf32>
    %812 = vector.broadcast %811 : vector<8x1xf32> to vector<8x32xf32>
    %813 = arith.subf %803, %812 : vector<8x32xf32>
    %814 = arith.mulf %813, %813 : vector<8x32xf32>
    %cst_387 = arith.constant dense<0.000000e+00> : vector<8xf32>
    %815 = vector.multi_reduction <add>, %814, %cst_387 [1] : vector<8x32xf32> to vector<8xf32>
    %816 = vector.shape_cast %815 : vector<8xf32> to vector<8x1xf32>
    %cst_388 = arith.constant 3.200000e+01 : f32
    %817 = vector.broadcast %cst_388 : f32 to vector<8x1xf32>
    %818 = arith.divf %816, %817 : vector<8x1xf32>
    %cst_389 = arith.constant 9.99999974E-6 : f32
    %819 = vector.broadcast %cst_389 : f32 to vector<8x1xf32>
    %820 = arith.addf %818, %819 : vector<8x1xf32>
    %821 = math.rsqrt %820 : vector<8x1xf32>
    %822 = vector.broadcast %821 : vector<8x1xf32> to vector<8x32xf32>
    %823 = arith.mulf %813, %822 : vector<8x32xf32>
    %824 = vector.broadcast %805 : vector<1x32xf32> to vector<8x32xf32>
    %825 = arith.mulf %823, %824 : vector<8x32xf32>
    %826 = vector.broadcast %807 : vector<1x32xf32> to vector<8x32xf32>
    %827 = arith.addf %825, %826 : vector<8x32xf32>
    %c1_390 = arith.constant 1 : index
    %c0_391 = arith.constant 0 : index
    %c0_392 = arith.constant 0 : index
    %828 = vector.load %arg36[%c1_390, %c0_391, %c0_392] : memref<2x32x64xf32, #tpu.memory_space<vmem>>, vector<1x32x64xf32>
    %829 = vector.shape_cast %828 : vector<1x32x64xf32> to vector<32x64xf32>
    %cst_393 = arith.constant dense<0.000000e+00> : vector<8x64xf32>
    %830 = tpu.matmul %827, %829, %cst_393 {dimension_numbers = #tpu.dot_dimension_numbers<[1], [0], [0], [1], [0, 0, 1, 1], [], []>} : vector<8x32xf32>, vector<32x64xf32>, vector<8x64xf32> -> vector<8x64xf32>
    %c1_394 = arith.constant 1 : index
    %c0_395 = arith.constant 0 : index
    %c0_396 = arith.constant 0 : index
    %831 = vector.load %arg37[%c1_394, %c0_395, %c0_396] : memref<2x1x64xf32, #tpu.memory_space<vmem>>, vector<1x1x64xf32>
    %832 = vector.shape_cast %831 : vector<1x1x64xf32> to vector<1x64xf32>
    %833 = vector.broadcast %832 : vector<1x64xf32> to vector<8x64xf32>
    %834 = arith.addf %830, %833 : vector<8x64xf32>
    %cst_397 = arith.constant 0.000000e+00 : f32
    %835 = vector.broadcast %cst_397 : f32 to vector<8x64xf32>
    %836 = arith.maximumf %834, %835 : vector<8x64xf32>
    %c1_398 = arith.constant 1 : index
    %c0_399 = arith.constant 0 : index
    %c0_400 = arith.constant 0 : index
    %837 = vector.load %arg38[%c1_398, %c0_399, %c0_400] : memref<2x64x32xf32, #tpu.memory_space<vmem>>, vector<1x64x32xf32>
    %838 = vector.shape_cast %837 : vector<1x64x32xf32> to vector<64x32xf32>
    %cst_401 = arith.constant dense<0.000000e+00> : vector<8x32xf32>
    %839 = tpu.matmul %836, %838, %cst_401 {dimension_numbers = #tpu.dot_dimension_numbers<[1], [0], [0], [1], [0, 0, 1, 1], [], []>} : vector<8x64xf32>, vector<64x32xf32>, vector<8x32xf32> -> vector<8x32xf32>
    %c1_402 = arith.constant 1 : index
    %c0_403 = arith.constant 0 : index
    %c0_404 = arith.constant 0 : index
    %840 = vector.load %arg39[%c1_402, %c0_403, %c0_404] : memref<2x1x32xf32, #tpu.memory_space<vmem>>, vector<1x1x32xf32>
    %841 = vector.shape_cast %840 : vector<1x1x32xf32> to vector<1x32xf32>
    %842 = vector.broadcast %841 : vector<1x32xf32> to vector<8x32xf32>
    %843 = arith.addf %839, %842 : vector<8x32xf32>
    %844 = arith.addf %827, %843 : vector<8x32xf32>
    %c1_405 = arith.constant 1 : index
    %c0_406 = arith.constant 0 : index
    %c0_407 = arith.constant 0 : index
    %845 = vector.load %arg40[%c1_405, %c0_406, %c0_407] : memref<2x1x32xf32, #tpu.memory_space<vmem>>, vector<1x1x32xf32>
    %846 = vector.shape_cast %845 : vector<1x1x32xf32> to vector<1x32xf32>
    %c1_408 = arith.constant 1 : index
    %c0_409 = arith.constant 0 : index
    %c0_410 = arith.constant 0 : index
    %847 = vector.load %arg41[%c1_408, %c0_409, %c0_410] : memref<2x1x32xf32, #tpu.memory_space<vmem>>, vector<1x1x32xf32>
    %848 = vector.shape_cast %847 : vector<1x1x32xf32> to vector<1x32xf32>
    %cst_411 = arith.constant dense<0.000000e+00> : vector<8xf32>
    %849 = vector.multi_reduction <add>, %844, %cst_411 [1] : vector<8x32xf32> to vector<8xf32>
    %850 = vector.shape_cast %849 : vector<8xf32> to vector<8x1xf32>
    %cst_412 = arith.constant 3.200000e+01 : f32
    %851 = vector.broadcast %cst_412 : f32 to vector<8x1xf32>
    %852 = arith.divf %850, %851 : vector<8x1xf32>
    %853 = vector.broadcast %852 : vector<8x1xf32> to vector<8x32xf32>
    %854 = arith.subf %844, %853 : vector<8x32xf32>
    %855 = arith.mulf %854, %854 : vector<8x32xf32>
    %cst_413 = arith.constant dense<0.000000e+00> : vector<8xf32>
    %856 = vector.multi_reduction <add>, %855, %cst_413 [1] : vector<8x32xf32> to vector<8xf32>
    %857 = vector.shape_cast %856 : vector<8xf32> to vector<8x1xf32>
    %cst_414 = arith.constant 3.200000e+01 : f32
    %858 = vector.broadcast %cst_414 : f32 to vector<8x1xf32>
    %859 = arith.divf %857, %858 : vector<8x1xf32>
    %cst_415 = arith.constant 9.99999974E-6 : f32
    %860 = vector.broadcast %cst_415 : f32 to vector<8x1xf32>
    %861 = arith.addf %859, %860 : vector<8x1xf32>
    %862 = math.rsqrt %861 : vector<8x1xf32>
    %863 = vector.broadcast %862 : vector<8x1xf32> to vector<8x32xf32>
    %864 = arith.mulf %854, %863 : vector<8x32xf32>
    %865 = vector.broadcast %846 : vector<1x32xf32> to vector<8x32xf32>
    %866 = arith.mulf %864, %865 : vector<8x32xf32>
    %867 = vector.broadcast %848 : vector<1x32xf32> to vector<8x32xf32>
    %868 = arith.addf %866, %867 : vector<8x32xf32>
    %c0_416 = arith.constant 0 : index
    %c0_417 = arith.constant 0 : index
    %869 = vector.load %arg44[%c0_416, %c0_417] : memref<1x32xf32, #tpu.memory_space<vmem>>, vector<1x32xf32>
    %c0_418 = arith.constant 0 : index
    %c0_419 = arith.constant 0 : index
    %870 = vector.load %arg45[%c0_418, %c0_419] : memref<1x32xf32, #tpu.memory_space<vmem>>, vector<1x32xf32>
    %cst_420 = arith.constant dense<0.000000e+00> : vector<8xf32>
    %871 = vector.multi_reduction <add>, %868, %cst_420 [1] : vector<8x32xf32> to vector<8xf32>
    %872 = vector.shape_cast %871 : vector<8xf32> to vector<8x1xf32>
    %cst_421 = arith.constant 3.200000e+01 : f32
    %873 = vector.broadcast %cst_421 : f32 to vector<8x1xf32>
    %874 = arith.divf %872, %873 : vector<8x1xf32>
    %875 = vector.broadcast %874 : vector<8x1xf32> to vector<8x32xf32>
    %876 = arith.subf %868, %875 : vector<8x32xf32>
    %877 = arith.mulf %876, %876 : vector<8x32xf32>
    %cst_422 = arith.constant dense<0.000000e+00> : vector<8xf32>
    %878 = vector.multi_reduction <add>, %877, %cst_422 [1] : vector<8x32xf32> to vector<8xf32>
    %879 = vector.shape_cast %878 : vector<8xf32> to vector<8x1xf32>
    %cst_423 = arith.constant 3.200000e+01 : f32
    %880 = vector.broadcast %cst_423 : f32 to vector<8x1xf32>
    %881 = arith.divf %879, %880 : vector<8x1xf32>
    %cst_424 = arith.constant 9.99999974E-6 : f32
    %882 = vector.broadcast %cst_424 : f32 to vector<8x1xf32>
    %883 = arith.addf %881, %882 : vector<8x1xf32>
    %884 = math.rsqrt %883 : vector<8x1xf32>
    %885 = vector.broadcast %884 : vector<8x1xf32> to vector<8x32xf32>
    %886 = arith.mulf %876, %885 : vector<8x32xf32>
    %887 = vector.broadcast %869 : vector<1x32xf32> to vector<8x32xf32>
    %888 = arith.mulf %886, %887 : vector<8x32xf32>
    %889 = vector.broadcast %870 : vector<1x32xf32> to vector<8x32xf32>
    %890 = arith.addf %888, %889 : vector<8x32xf32>
    %c0_425 = arith.constant 0 : index
    %c0_426 = arith.constant 0 : index
    %891 = vector.load %arg46[%c0_425, %c0_426] : memref<32x4xf32, #tpu.memory_space<vmem>>, vector<32x4xf32>
    %cst_427 = arith.constant dense<0.000000e+00> : vector<8x4xf32>
    %892 = tpu.matmul %890, %891, %cst_427 {dimension_numbers = #tpu.dot_dimension_numbers<[1], [0], [0], [1], [0, 0, 1, 1], [], []>} : vector<8x32xf32>, vector<32x4xf32>, vector<8x4xf32> -> vector<8x4xf32>
    %c0_428 = arith.constant 0 : index
    %c0_429 = arith.constant 0 : index
    %893 = vector.load %arg47[%c0_428, %c0_429] : memref<1x4xf32, #tpu.memory_space<vmem>>, vector<1x4xf32>
    %894 = vector.broadcast %893 : vector<1x4xf32> to vector<8x4xf32>
    %895 = arith.addf %892, %894 : vector<8x4xf32>
    %c0_430 = arith.constant 0 : index
    %c0_431 = arith.constant 0 : index
    %896 = vector.load %arg48[%c0_430, %c0_431] : memref<8x4xf32, #tpu.memory_space<vmem>>, vector<8x4xf32>
    tpu.vector_store %arg48[%c0_430, %c0_431], %895 {strides = array<i32>} : memref<8x4xf32, #tpu.memory_space<vmem>>, vector<8x4xf32>,
    return
  }
  func.func @transform_0(%arg0: i32) -> (i32, i32) {
    %c0_i32 = arith.constant 0 : i32
    %c0_i32_0 = arith.constant 0 : i32
    return %arg0, %c0_i32 : i32, i32
  }
  func.func @transform_1(%arg0: i32) -> (i32, i32) {
    %c0_i32 = arith.constant 0 : i32
    %c0_i32_0 = arith.constant 0 : i32
    return %arg0, %c0_i32 : i32, i32
  }
  func.func @transform_2(%arg0: i32) -> (i32, i32) {
    %c0_i32 = arith.constant 0 : i32
    %c0_i32_0 = arith.constant 0 : i32
    %c0_i32_1 = arith.constant 0 : i32
    return %c0_i32, %c0_i32_0 : i32, i32
  }
  func.func @transform_3(%arg0: i32) -> (i32, i32) {
    %c0_i32 = arith.constant 0 : i32
    %c0_i32_0 = arith.constant 0 : i32
    %c0_i32_1 = arith.constant 0 : i32
    return %c0_i32, %c0_i32_0 : i32, i32
  }
  func.func @transform_4(%arg0: i32) -> (i32, i32) {
    %c0_i32 = arith.constant 0 : i32
    %c0_i32_0 = arith.constant 0 : i32
    %c0_i32_1 = arith.constant 0 : i32
    return %c0_i32, %c0_i32_0 : i32, i32
  }
  func.func @transform_5(%arg0: i32) -> (i32, i32) {
    %c0_i32 = arith.constant 0 : i32
    %c0_i32_0 = arith.constant 0 : i32
    %c0_i32_1 = arith.constant 0 : i32
    return %c0_i32, %c0_i32_0 : i32, i32
  }
  func.func @transform_6(%arg0: i32) -> (i32, i32) {
    %c0_i32 = arith.constant 0 : i32
    %c0_i32_0 = arith.constant 0 : i32
    %c0_i32_1 = arith.constant 0 : i32
    return %c0_i32, %c0_i32_0 : i32, i32
  }
  func.func @transform_7(%arg0: i32) -> (i32, i32) {
    %c0_i32 = arith.constant 0 : i32
    %c0_i32_0 = arith.constant 0 : i32
    %c0_i32_1 = arith.constant 0 : i32
    return %c0_i32, %c0_i32_0 : i32, i32
  }
  func.func @transform_8(%arg0: i32) -> (i32, i32) {
    %c0_i32 = arith.constant 0 : i32
    %c0_i32_0 = arith.constant 0 : i32
    %c0_i32_1 = arith.constant 0 : i32
    return %c0_i32, %c0_i32_0 : i32, i32
  }
  func.func @transform_9(%arg0: i32) -> (i32, i32, i32) {
    %c0_i32 = arith.constant 0 : i32
    %c0_i32_0 = arith.constant 0 : i32
    %c0_i32_1 = arith.constant 0 : i32
    %c0_i32_2 = arith.constant 0 : i32
    return %c0_i32, %c0_i32_0, %c0_i32_1 : i32, i32, i32
  }
  func.func @transform_10(%arg0: i32) -> (i32, i32, i32) {
    %c0_i32 = arith.constant 0 : i32
    %c0_i32_0 = arith.constant 0 : i32
    %c0_i32_1 = arith.constant 0 : i32
    %c0_i32_2 = arith.constant 0 : i32
    return %c0_i32, %c0_i32_0, %c0_i32_1 : i32, i32, i32
  }
  func.func @transform_11(%arg0: i32) -> (i32, i32, i32) {
    %c0_i32 = arith.constant 0 : i32
    %c0_i32_0 = arith.constant 0 : i32
    %c0_i32_1 = arith.constant 0 : i32
    %c0_i32_2 = arith.constant 0 : i32
    return %c0_i32, %c0_i32_0, %c0_i32_1 : i32, i32, i32
  }
  func.func @transform_12(%arg0: i32) -> (i32, i32, i32) {
    %c0_i32 = arith.constant 0 : i32
    %c0_i32_0 = arith.constant 0 : i32
    %c0_i32_1 = arith.constant 0 : i32
    %c0_i32_2 = arith.constant 0 : i32
    return %c0_i32, %c0_i32_0, %c0_i32_1 : i32, i32, i32
  }
  func.func @transform_13(%arg0: i32) -> (i32, i32, i32) {
    %c0_i32 = arith.constant 0 : i32
    %c0_i32_0 = arith.constant 0 : i32
    %c0_i32_1 = arith.constant 0 : i32
    %c0_i32_2 = arith.constant 0 : i32
    return %c0_i32, %c0_i32_0, %c0_i32_1 : i32, i32, i32
  }
  func.func @transform_14(%arg0: i32) -> (i32, i32, i32) {
    %c0_i32 = arith.constant 0 : i32
    %c0_i32_0 = arith.constant 0 : i32
    %c0_i32_1 = arith.constant 0 : i32
    %c0_i32_2 = arith.constant 0 : i32
    return %c0_i32, %c0_i32_0, %c0_i32_1 : i32, i32, i32
  }
  func.func @transform_15(%arg0: i32) -> (i32, i32, i32) {
    %c0_i32 = arith.constant 0 : i32
    %c0_i32_0 = arith.constant 0 : i32
    %c0_i32_1 = arith.constant 0 : i32
    %c0_i32_2 = arith.constant 0 : i32
    return %c0_i32, %c0_i32_0, %c0_i32_1 : i32, i32, i32
  }
  func.func @transform_16(%arg0: i32) -> (i32, i32, i32) {
    %c0_i32 = arith.constant 0 : i32
    %c0_i32_0 = arith.constant 0 : i32
    %c0_i32_1 = arith.constant 0 : i32
    %c0_i32_2 = arith.constant 0 : i32
    return %c0_i32, %c0_i32_0, %c0_i32_1 : i32, i32, i32
  }
  func.func @transform_17(%arg0: i32) -> (i32, i32, i32) {
    %c0_i32 = arith.constant 0 : i32
    %c0_i32_0 = arith.constant 0 : i32
    %c0_i32_1 = arith.constant 0 : i32
    %c0_i32_2 = arith.constant 0 : i32
    return %c0_i32, %c0_i32_0, %c0_i32_1 : i32, i32, i32
  }
  func.func @transform_18(%arg0: i32) -> (i32, i32, i32) {
    %c0_i32 = arith.constant 0 : i32
    %c0_i32_0 = arith.constant 0 : i32
    %c0_i32_1 = arith.constant 0 : i32
    %c0_i32_2 = arith.constant 0 : i32
    return %c0_i32, %c0_i32_0, %c0_i32_1 : i32, i32, i32
  }
  func.func @transform_19(%arg0: i32) -> (i32, i32, i32) {
    %c0_i32 = arith.constant 0 : i32
    %c0_i32_0 = arith.constant 0 : i32
    %c0_i32_1 = arith.constant 0 : i32
    %c0_i32_2 = arith.constant 0 : i32
    return %c0_i32, %c0_i32_0, %c0_i32_1 : i32, i32, i32
  }
  func.func @transform_20(%arg0: i32) -> (i32, i32, i32) {
    %c0_i32 = arith.constant 0 : i32
    %c0_i32_0 = arith.constant 0 : i32
    %c0_i32_1 = arith.constant 0 : i32
    %c0_i32_2 = arith.constant 0 : i32
    return %c0_i32, %c0_i32_0, %c0_i32_1 : i32, i32, i32
  }
  func.func @transform_21(%arg0: i32) -> (i32, i32, i32) {
    %c0_i32 = arith.constant 0 : i32
    %c0_i32_0 = arith.constant 0 : i32
    %c0_i32_1 = arith.constant 0 : i32
    %c0_i32_2 = arith.constant 0 : i32
    return %c0_i32, %c0_i32_0, %c0_i32_1 : i32, i32, i32
  }
  func.func @transform_22(%arg0: i32) -> (i32, i32, i32) {
    %c0_i32 = arith.constant 0 : i32
    %c0_i32_0 = arith.constant 0 : i32
    %c0_i32_1 = arith.constant 0 : i32
    %c0_i32_2 = arith.constant 0 : i32
    return %c0_i32, %c0_i32_0, %c0_i32_1 : i32, i32, i32
  }
  func.func @transform_23(%arg0: i32) -> (i32, i32, i32) {
    %c0_i32 = arith.constant 0 : i32
    %c0_i32_0 = arith.constant 0 : i32
    %c0_i32_1 = arith.constant 0 : i32
    %c0_i32_2 = arith.constant 0 : i32
    return %c0_i32, %c0_i32_0, %c0_i32_1 : i32, i32, i32
  }
  func.func @transform_24(%arg0: i32) -> (i32, i32, i32) {
    %c0_i32 = arith.constant 0 : i32
    %c0_i32_0 = arith.constant 0 : i32
    %c0_i32_1 = arith.constant 0 : i32
    %c0_i32_2 = arith.constant 0 : i32
    return %c0_i32, %c0_i32_0, %c0_i32_1 : i32, i32, i32
  }
  func.func @transform_25(%arg0: i32) -> (i32, i32, i32) {
    %c0_i32 = arith.constant 0 : i32
    %c0_i32_0 = arith.constant 0 : i32
    %c0_i32_1 = arith.constant 0 : i32
    %c0_i32_2 = arith.constant 0 : i32
    return %c0_i32, %c0_i32_0, %c0_i32_1 : i32, i32, i32
  }
  func.func @transform_26(%arg0: i32) -> (i32, i32, i32) {
    %c0_i32 = arith.constant 0 : i32
    %c0_i32_0 = arith.constant 0 : i32
    %c0_i32_1 = arith.constant 0 : i32
    %c0_i32_2 = arith.constant 0 : i32
    return %c0_i32, %c0_i32_0, %c0_i32_1 : i32, i32, i32
  }
  func.func @transform_27(%arg0: i32) -> (i32, i32, i32) {
    %c0_i32 = arith.constant 0 : i32
    %c0_i32_0 = arith.constant 0 : i32
    %c0_i32_1 = arith.constant 0 : i32
    %c0_i32_2 = arith.constant 0 : i32
    return %c0_i32, %c0_i32_0, %c0_i32_1 : i32, i32, i32
  }
  func.func @transform_28(%arg0: i32) -> (i32, i32, i32) {
    %c0_i32 = arith.constant 0 : i32
    %c0_i32_0 = arith.constant 0 : i32
    %c0_i32_1 = arith.constant 0 : i32
    %c0_i32_2 = arith.constant 0 : i32
    return %c0_i32, %c0_i32_0, %c0_i32_1 : i32, i32, i32
  }
  func.func @transform_29(%arg0: i32) -> (i32, i32, i32) {
    %c0_i32 = arith.constant 0 : i32
    %c0_i32_0 = arith.constant 0 : i32
    %c0_i32_1 = arith.constant 0 : i32
    %c0_i32_2 = arith.constant 0 : i32
    return %c0_i32, %c0_i32_0, %c0_i32_1 : i32, i32, i32
  }
  func.func @transform_30(%arg0: i32) -> (i32, i32, i32) {
    %c0_i32 = arith.constant 0 : i32
    %c0_i32_0 = arith.constant 0 : i32
    %c0_i32_1 = arith.constant 0 : i32
    %c0_i32_2 = arith.constant 0 : i32
    return %c0_i32, %c0_i32_0, %c0_i32_1 : i32, i32, i32
  }
  func.func @transform_31(%arg0: i32) -> (i32, i32, i32) {
    %c0_i32 = arith.constant 0 : i32
    %c0_i32_0 = arith.constant 0 : i32
    %c0_i32_1 = arith.constant 0 : i32
    %c0_i32_2 = arith.constant 0 : i32
    return %c0_i32, %c0_i32_0, %c0_i32_1 : i32, i32, i32
  }
  func.func @transform_32(%arg0: i32) -> (i32, i32, i32) {
    %c0_i32 = arith.constant 0 : i32
    %c0_i32_0 = arith.constant 0 : i32
    %c0_i32_1 = arith.constant 0 : i32
    %c0_i32_2 = arith.constant 0 : i32
    return %c0_i32, %c0_i32_0, %c0_i32_1 : i32, i32, i32
  }
  func.func @transform_33(%arg0: i32) -> (i32, i32, i32) {
    %c0_i32 = arith.constant 0 : i32
    %c0_i32_0 = arith.constant 0 : i32
    %c0_i32_1 = arith.constant 0 : i32
    %c0_i32_2 = arith.constant 0 : i32
    return %c0_i32, %c0_i32_0, %c0_i32_1 : i32, i32, i32
  }
  func.func @transform_34(%arg0: i32) -> (i32, i32, i32) {
    %c0_i32 = arith.constant 0 : i32
    %c0_i32_0 = arith.constant 0 : i32
    %c0_i32_1 = arith.constant 0 : i32
    %c0_i32_2 = arith.constant 0 : i32
    return %c0_i32, %c0_i32_0, %c0_i32_1 : i32, i32, i32
  }
  func.func @transform_35(%arg0: i32) -> (i32, i32, i32) {
    %c0_i32 = arith.constant 0 : i32
    %c0_i32_0 = arith.constant 0 : i32
    %c0_i32_1 = arith.constant 0 : i32
    %c0_i32_2 = arith.constant 0 : i32
    return %c0_i32, %c0_i32_0, %c0_i32_1 : i32, i32, i32
  }
  func.func @transform_36(%arg0: i32) -> (i32, i32, i32) {
    %c0_i32 = arith.constant 0 : i32
    %c0_i32_0 = arith.constant 0 : i32
    %c0_i32_1 = arith.constant 0 : i32
    %c0_i32_2 = arith.constant 0 : i32
    return %c0_i32, %c0_i32_0, %c0_i32_1 : i32, i32, i32
  }
  func.func @transform_37(%arg0: i32) -> (i32, i32, i32) {
    %c0_i32 = arith.constant 0 : i32
    %c0_i32_0 = arith.constant 0 : i32
    %c0_i32_1 = arith.constant 0 : i32
    %c0_i32_2 = arith.constant 0 : i32
    return %c0_i32, %c0_i32_0, %c0_i32_1 : i32, i32, i32
  }
  func.func @transform_38(%arg0: i32) -> (i32, i32, i32) {
    %c0_i32 = arith.constant 0 : i32
    %c0_i32_0 = arith.constant 0 : i32
    %c0_i32_1 = arith.constant 0 : i32
    %c0_i32_2 = arith.constant 0 : i32
    return %c0_i32, %c0_i32_0, %c0_i32_1 : i32, i32, i32
  }
  func.func @transform_39(%arg0: i32) -> (i32, i32, i32) {
    %c0_i32 = arith.constant 0 : i32
    %c0_i32_0 = arith.constant 0 : i32
    %c0_i32_1 = arith.constant 0 : i32
    %c0_i32_2 = arith.constant 0 : i32
    return %c0_i32, %c0_i32_0, %c0_i32_1 : i32, i32, i32
  }
  func.func @transform_40(%arg0: i32) -> (i32, i32, i32) {
    %c0_i32 = arith.constant 0 : i32
    %c0_i32_0 = arith.constant 0 : i32
    %c0_i32_1 = arith.constant 0 : i32
    %c0_i32_2 = arith.constant 0 : i32
    return %c0_i32, %c0_i32_0, %c0_i32_1 : i32, i32, i32
  }
  func.func @transform_41(%arg0: i32) -> (i32, i32) {
    %c0_i32 = arith.constant 0 : i32
    %c0_i32_0 = arith.constant 0 : i32
    %c0_i32_1 = arith.constant 0 : i32
    return %c0_i32, %c0_i32_0 : i32, i32
  }
  func.func @transform_42(%arg0: i32) -> (i32, i32) {
    %c0_i32 = arith.constant 0 : i32
    %c0_i32_0 = arith.constant 0 : i32
    %c0_i32_1 = arith.constant 0 : i32
    return %c0_i32, %c0_i32_0 : i32, i32
  }
  func.func @transform_43(%arg0: i32) -> (i32, i32) {
    %c0_i32 = arith.constant 0 : i32
    %c0_i32_0 = arith.constant 0 : i32
    %c0_i32_1 = arith.constant 0 : i32
    return %c0_i32, %c0_i32_0 : i32, i32
  }
  func.func @transform_44(%arg0: i32) -> (i32, i32) {
    %c0_i32 = arith.constant 0 : i32
    %c0_i32_0 = arith.constant 0 : i32
    %c0_i32_1 = arith.constant 0 : i32
    return %c0_i32, %c0_i32_0 : i32, i32
  }
  func.func @transform_45(%arg0: i32) -> (i32, i32) {
    %c0_i32 = arith.constant 0 : i32
    %c0_i32_0 = arith.constant 0 : i32
    %c0_i32_1 = arith.constant 0 : i32
    return %c0_i32, %c0_i32_0 : i32, i32
  }
  func.func @transform_46(%arg0: i32) -> (i32, i32) {
    %c0_i32 = arith.constant 0 : i32
    %c0_i32_0 = arith.constant 0 : i32
    %c0_i32_1 = arith.constant 0 : i32
    return %c0_i32, %c0_i32_0 : i32, i32
  }
  func.func @transform_47(%arg0: i32) -> (i32, i32) {
    %c0_i32 = arith.constant 0 : i32
    %c0_i32_0 = arith.constant 0 : i32
    return %arg0, %c0_i32 : i32, i32
  }
}

</mosaic_0001>

<bundles_post_ra>
// kernel: _lambda_.1
= control target key start
LH: loop header
LB: loop body
LE: loop exit
PB: predicated region body
PF: predicated region fallthrough
CT: control target
= control target key end

     0   :  { %s5531_s6 = smov 1   ;;  %s5532_s10 = smov 2   ;;  %s6588_s0 = inlined_call_operand.smem [shape: u32[48], index: -1, kind: input, shape index: {}] }
   0x1   :  { %s5608_s5 = sld [smem:[%s6588_s0]]   ;;  %s5533_s14 = smov 3  }
   0x2   :  { %s5613_s9 = sld [smem:[%s6588_s0 + %s5531_s6]]   ;;  %s5534_s18 = smov 4  }
   0x3   :  { %s5618_s13 = sld [smem:[%s6588_s0 + %s5532_s10]]   ;;  %s5535_s22 = smov 5  }
   0x4   :  { %s5623_s17 = sld [smem:[%s6588_s0 + %s5533_s14]]   ;;  %s5536_s26 = smov 6  }
   0x5   :  { %s5628_s21 = sld [smem:[%s6588_s0 + %s5534_s18]]   ;;  %s5537_s30 = smov 7  }
   0x6   :  { %s5633_s25 = sld [smem:[%s6588_s0 + %s5535_s22]]   ;;  %s5538_s4 = smov 8  }
   0x7   :  { %6666 = sst [smem:[#allocation13_spill]] %s5608_s5  ;;  %s5539_s10 = smov 9  }
   0x8   :  { %6667 = sst [smem:[#allocation14_spill]] %s5613_s9  ;;  %s5540_s15 = smov 10  }
   0x9   :  { %6668 = sst [smem:[#allocation15_spill]] %s5618_s13  ;;  %s5541_s20 = smov 11  }
   0xa   :  { %6669 = sst [smem:[#allocation16_spill]] %s5623_s17  ;;  %s5543_s1 = smov 13  }
   0xb   :  { %6670 = sst [smem:[#allocation17_spill]] %s5628_s21  ;;  %s5544_s7 = smov 14  }
   0xc   :  { %6671 = sst [smem:[#allocation18_spill]] %s5633_s25  ;;  %s5546_s22 = smov 16  }
   0xd   :  { %s5638_s29 = sld [smem:[%s6588_s0 + %s5536_s26]]   ;;  %s5542_s26 = smov 12  }
   0xe   :  { %s5643_s3 = sld [smem:[%s6588_s0 + %s5537_s30]]   ;;  %s5547_s28 = smov 17  }
   0xf   :  { %s5648_s8 = sld [smem:[%s6588_s0 + %s5538_s4]]  }
  0x10   :  { %s5653_s14 = sld [smem:[%s6588_s0 + %s5539_s10]]  }
  0x11   :  { %s5658_s19 = sld [smem:[%s6588_s0 + %s5540_s15]]   ;;  %s5545_s15 = smov 15  }
  0x12   :  { %s5663_s24 = sld [smem:[%s6588_s0 + %s5541_s20]]  }
  0x13   :  { %6672 = sst [smem:[#allocation19_spill]] %s5638_s29 }
  0x14   :  { %6673 = sst [smem:[#allocation20_spill]] %s5643_s3 }
  0x15   :  { %6674 = sst [smem:[#allocation21_spill]] %s5648_s8 }
  0x16   :  { %6675 = sst [smem:[#allocation22_spill]] %s5653_s14 }
  0x17   :  { %6676 = sst [smem:[#allocation23_spill]] %s5658_s19 }
  0x18   :  { %6677 = sst [smem:[#allocation24_spill]] %s5663_s24 }
  0x19   :  { %s5668_s30 = sld [smem:[%s6588_s0 + %s5542_s26]]  }
  0x1a   :  { %s5673_s6 = sld [smem:[%s6588_s0 + %s5543_s1]]  }
  0x1b   :  { %s5678_s12 = sld [smem:[%s6588_s0 + %s5544_s7]]   ;;  %s5548_s7 = smov 18  }
  0x1c   :  { %s5683_s20 = sld [smem:[%s6588_s0 + %s5545_s15]]   ;;  %s5549_s15 = smov 19  }
  0x1d   :  { %s5688_s27 = sld [smem:[%s6588_s0 + %s5546_s22]]   ;;  %s5550_s22 = smov 20  }
  0x1e   :  { %s5693_s4 = sld [smem:[%s6588_s0 + %s5547_s28]]   ;;  %s5551_s28 = smov 21  }
  0x1f   :  { %6678 = sst [smem:[#allocation25_spill]] %s5668_s30 }
  0x20   :  { %6679 = sst [smem:[#allocation26_spill]] %s5673_s6 }
  0x21   :  { %6680 = sst [smem:[#allocation27_spill]] %s5678_s12 }
  0x22   :  { %6681 = sst [smem:[#allocation28_spill]] %s5683_s20 }
  0x23   :  { %6682 = sst [smem:[#allocation29_spill]] %s5688_s27 }
  0x24   :  { %6683 = sst [smem:[#allocation30_spill]] %s5693_s4 }
  0x25   :  { %s5698_s21 = sld [smem:[%s6588_s0 + %s5548_s7]]   ;;  %s5552_s7 = smov 22  }
  0x26   :  { %s5703_s17 = sld [smem:[%s6588_s0 + %s5549_s15]]   ;;  %s5553_s15 = smov 23  }
  0x27   :  { %s5708_s27 = sld [smem:[%s6588_s0 + %s5550_s22]]   ;;  %s5554_s22 = smov 24  }
  0x28   :  { %s5713_s12 = sld [smem:[%s6588_s0 + %s5551_s28]]   ;;  %s5555_s28 = smov 25  }
  0x2b   :  { %6684 = sst [smem:[#allocation31_spill]] %s5698_s21 }
  0x2c   :  { %6685 = sst [smem:[#allocation32_spill]] %s5703_s17 }
  0x2d   :  { %6686 = sst [smem:[#allocation33_spill]] %s5708_s27 }
  0x2e   :  { %6687 = sst [smem:[#allocation34_spill]] %s5713_s12 }
  0x2f   :  { %s5718_s21 = sld [smem:[%s6588_s0 + %s5552_s7]]   ;;  %s5556_s7 = smov 26  }
  0x30   :  { %s5723_s17 = sld [smem:[%s6588_s0 + %s5553_s15]]   ;;  %s5557_s15 = smov 27  }
  0x31   :  { %s5728_s27 = sld [smem:[%s6588_s0 + %s5554_s22]]   ;;  %s5558_s22 = smov 28  }
  0x32   :  { %s5733_s12 = sld [smem:[%s6588_s0 + %s5555_s28]]   ;;  %s5559_s28 = smov 29  }
  0x35   :  { %6688 = sst [smem:[#allocation35_spill]] %s5718_s21 }
  0x36   :  { %6689 = sst [smem:[#allocation36_spill]] %s5723_s17 }
  0x37   :  { %6690 = sst [smem:[#allocation37_spill]] %s5728_s27 }
  0x38   :  { %6691 = sst [smem:[#allocation38_spill]] %s5733_s12 }
  0x39   :  { %s5738_s21 = sld [smem:[%s6588_s0 + %s5556_s7]]   ;;  %s5560_s7 = smov 30  }
  0x3a   :  { %s5743_s17 = sld [smem:[%s6588_s0 + %s5557_s15]]   ;;  %s5561_s15 = smov 31  }
  0x3b   :  { %s5748_s27 = sld [smem:[%s6588_s0 + %s5558_s22]]   ;;  %s5562_s22 = smov 32  }
  0x3c   :  { %s5753_s12 = sld [smem:[%s6588_s0 + %s5559_s28]]   ;;  %s5563_s28 = smov 33  }
  0x3d   :  { %s5763_s6 = sld [smem:[%s6588_s0 + %s5561_s15]]   ;;  %s5565_s15 = smov 35  }
  0x3e   :  { %s5773_s4 = sld [smem:[%s6588_s0 + %s5563_s28]]   ;;  %s5567_s28 = smov 37  }
  0x3f   :  { %6692 = sst [smem:[#allocation39_spill]] %s5738_s21 }
  0x40   :  { %6693 = sst [smem:[#allocation40_spill]] %s5743_s17 }
  0x41   :  { %6694 = sst [smem:[#allocation41_spill]] %s5748_s27 }
  0x42   :  { %6695 = sst [smem:[#allocation42_spill]] %s5753_s12 }
  0x43   :  { %s5758_s21 = sld [smem:[%s6588_s0 + %s5560_s7]]   ;;  %s5564_s7 = smov 34  }
  0x44   :  { %6697 = sst [smem:[#allocation44_spill]] %s5763_s6 }
  0x45   :  { %s5768_s27 = sld [smem:[%s6588_s0 + %s5562_s22]]   ;;  %s5566_s22 = smov 36  }
  0x46   :  { %6699 = sst [smem:[#allocation46_spill]] %s5773_s4 }
  0x47   :  { %s5783_s20 = sld [smem:[%s6588_s0 + %s5565_s15]]   ;;  %s5569_s15 = smov 39  }
  0x48   :  { %s5793_s4 = sld [smem:[%s6588_s0 + %s5567_s28]]   ;;  %s5571_s28 = smov 41  }
  0x49   :  { %6696 = sst [smem:[#allocation43_spill]] %s5758_s21 }
  0x4a   :  { %s5778_s21 = sld [smem:[%s6588_s0 + %s5564_s7]]   ;;  %s5568_s7 = smov 38  }
  0x4b   :  { %6698 = sst [smem:[#allocation45_spill]] %s5768_s27 }
  0x4c   :  { %s5788_s27 = sld [smem:[%s6588_s0 + %s5566_s22]]   ;;  %s5570_s22 = smov 40  }
  0x4d   :  { %6701 = sst [smem:[#allocation48_spill]] %s5783_s20 }
  0x4e   :  { %6703 = sst [smem:[#allocation50_spill]] %s5793_s4 }
  0x4f   :  { %s5803_s30 = sld [smem:[%s6588_s0 + %s5569_s15]]   ;;  %s5573_s15 = smov 43  }
  0x50   :  { %6700 = sst [smem:[#allocation47_spill]] %s5778_s21 }
  0x51   :  { %s5798_s21 = sld [smem:[%s6588_s0 + %s5568_s7]]   ;;  %s5572_s7 = smov 42  }
  0x52   :  { %6702 = sst [smem:[#allocation49_spill]] %s5788_s27 }
  0x53   :  { %s5808_s27 = sld [smem:[%s6588_s0 + %s5570_s22]]   ;;  %s5574_s22 = smov 44  }
  0x54   :  { %s5813_s4 = sld [smem:[%s6588_s0 + %s5571_s28]]   ;;  %s5575_s28 = smov 45  }
  0x55   :  { %6705 = sst [smem:[#allocation52_spill]] %s5803_s30 }
  0x56   :  { %s5823_s30 = sld [smem:[%s6588_s0 + %s5573_s15]]   ;;  %s5577_s15 = smov 47  }
  0x57   :  { %6704 = sst [smem:[#allocation51_spill]] %s5798_s21 }
  0x58   :  { %s5818_s21 = sld [smem:[%s6588_s0 + %s5572_s7]]   ;;  %s5576_s7 = smov 46  }
  0x59   :  { %6706 = sst [smem:[#allocation53_spill]] %s5808_s27 }
  0x5a   :  { %6707 = sst [smem:[#allocation54_spill]] %s5813_s4 }
  0x5b   :  { %s5828_s27 = sld [smem:[%s6588_s0 + %s5574_s22]]  }
  0x5c   :  { %6709 = sst [smem:[#allocation56_spill]] %s5823_s30 }
  0x5d   :  { %s5833_s4 = sld [smem:[%s6588_s0 + %s5575_s28]]  }
  0x5e   :  { %6708 = sst [smem:[#allocation55_spill]] %s5818_s21 }
  0x5f   :  { %s5838_s21 = sld [smem:[%s6588_s0 + %s5576_s7]]  }
  0x60   :  { %s5843_s30 = sld [smem:[%s6588_s0 + %s5577_s15]]  }
  0x61   :  { %6710 = sst [smem:[#allocation57_spill]] %s5828_s27 }
  0x63   :  { %6711 = sst [smem:[#allocation58_spill]] %s5833_s4 }
  0x65   :  { %6712 = sst [smem:[#allocation59_spill]] %s5838_s21 }
  0x66   :  { %6713 = sst [smem:[#allocation60_spill]] %s5843_s30 }
  0x67   :  { %100 = vsyncpa [#allocation3], 0 }
  0x68   :  { %101 = vsyncpa [#allocation5], 0 }
  0x69   :  { %102 = vsyncpa [#allocation8], 0  ;;  %s5845_s22 = smov 0  }
  0x6a LB: > { %s6714_s24 = sld [smem:[#allocation24_spill]]  ;;  %s5854_s0 = sadd.s32 4294967295, %s5529_s22   ;;  %s5529_s22 = sphi %s5845_s22, %s108_s22  }
  0x6b   : > { %s6715_s20 = sld [smem:[#allocation48_spill]]  ;;  %p4892_p0 = scmp.ge.s32.totalorder %s5529_s22, 1 }
  0x6c   : > { %s6716_s19 = sld [smem:[#allocation23_spill]]  ;;  %p1136_p1 = scmp.lt.s32.totalorder %s5529_s22, 3 }
  0x6d   : > { %s6717_s14 = sld [smem:[#allocation22_spill]]  ;;  %p5102_p2 = scmp.eq.s32.totalorder %s5854_s0, 0 }
  0x6e   : > { %s6718_s12 = sld [smem:[#allocation42_spill]]  ;;  %p5859_p3 = pnand %p4892_p0, %p1136_p1 }
  0x6f   : > { %s6719_s8 = sld [smem:[#allocation21_spill]]  ;;  %s5578_s28 = smov [#allocation4]  }
  0x70   : > { %s6720_s17 = sld [smem:[#allocation40_spill]]  ;;  %s5863_s1 = sshll.u32 %s5578_s28, 4  ;;  %s1234_s1 = int_to_ptr.vmem [resolvable:$true] %s5863_s1 }
  0x71   : > { %s6721_s6 = sld [smem:[#allocation44_spill]]  ;;  %p5086_p4 = pneg %p5859_p3 }
  0x72   : > { %6722 = sst [smem:[#allocation61_spill]] %s5529_s22  ;;  %s5579_s10 = smov [#allocation7]  }
  0x73   : > { %p5871_p5 = pnand %p5102_p2, %p5086_p4  ;;  %s5877_s11 = sshll.u32 %s5579_s10, 4 }
  0x74   : > { %6725 = sst [smem:[#allocation62_spill]] %s5877_s11 }
  0x75   : > { %p5884_p7 = pneg %p5871_p5 }
  0x76   : > { %s1231_s23 = sshll.u32 %s6720_s17, 4  ;;  %s5368_s22 = scalar_lea.hbm %s6720_s17, 64  ;;  %s5851_s23 = int_to_ptr.hbm [resolvable:$true] %s1231_s23 }
  0x77   : > { %s1265_s2 = sshll.u32 %s6721_s6, 4  ;;  %s5361_s16 = sshra.s32 %s5851_s23, 4  ;;  %s5875_s2 = int_to_ptr.hbm [resolvable:$true] %s1265_s2  ;;  %s5362_s16 = int_to_ptr.hbm [resolvable:$true] %s5361_s16 }
  0x78   : > { %s5363_s18 = scalar_lea.hbm %s5362_s16, 64  ;;  %p5369_p10 = scmp.lt.s32.totalorder %s5362_s16, %s6720_s17 }
  0x79   : > { %p5364_p6 = scmp.ne.s32.totalorder %s5362_s16, %s5363_s18  ;;  %p5370_p11 = scmp.lt.s32.totalorder %s5368_s22, %s5363_s18 }
  0x7b   : > { %p5366_p8 = pnand %p5884_p7, %p5364_p6  ;;  %p5371_p12 = por %p5370_p11, %p5369_p10 }
  0x7d   : > { %p5367_p9 = pneg %p5366_p8 }
  0x7f   : > { %p5372_p13 = pnand %p5371_p12, %p5367_p9 }
  0x81   : > { %5375 = shalt.err (!%p5372_p13)
}
  0x82   : > { %s6619_s10 = smov 128   ;;  %s5581_s15 = smov 8  }
  0x83   : > { %5092 = dma.hbm_to_vmem [thread:$0]  (!%p5871_p5), %s5851_s23, 1024, %s1234_s1, [#allocation5], %s6619_s10, %s6619_s10, %s5581_s15  }
  0x84   : > { %s5391_s11 = sshra.s32 %s5875_s2, 4  ;;  %s5398_s22 = scalar_lea.hbm %s6721_s6, 64  ;;  %s5392_s11 = int_to_ptr.hbm [resolvable:$true] %s5391_s11 }
  0x85   : > { %s5393_s16 = scalar_lea.hbm %s5392_s11, 64  ;;  %p5399_p6 = scmp.lt.s32.totalorder %s5392_s11, %s6721_s6 }
  0x86   : > { %p5394_p0 = scmp.ne.s32.totalorder %s5392_s11, %s5393_s16  ;;  %p5400_p8 = scmp.lt.s32.totalorder %s5398_s22, %s5393_s16 }
  0x88   : > { %p5396_p1 = pnand %p5394_p0, %p5884_p7  ;;  %p5401_p9 = por %p5400_p8, %p5399_p6 }
  0x8a   : > { %p5397_p4 = pneg %p5396_p1 }
  0x8c   : > { %p5402_p10 = pnand %p5401_p9, %p5397_p4 }
  0x8e   : > { %5405 = shalt.err (!%p5402_p10)
}
  0x8f   : > { %s6727_s18 = sld [smem:[#allocation62_spill]]  ;;  %s6729_s1 = sshll.u32 %s6719_s8, 4  ;;  %s1167_s1 = int_to_ptr.hbm [resolvable:$true] %s6729_s1 }
  0x90   : > { %s5582_s11 = smov [#allocation2]   ;;  %s1248_s22 = sshll.u32 %s6718_s12, 4  ;;  %s5914_s22 = int_to_ptr.hbm [resolvable:$true] %s1248_s22 }
  0x91   : > { %s1168_s16 = sshll.u32 %s5582_s11, 4  ;;  %s5421_s6 = sshra.s32 %s1167_s1, 4  ;;  %s1169_s16 = int_to_ptr.vmem [resolvable:$true] %s1168_s16  ;;  %s5422_s6 = int_to_ptr.hbm [resolvable:$true] %s5421_s6 }
  0x92   : > { %s5423_s17 = scalar_lea.hbm %s5422_s6, 1  ;;  %p5429_p0 = scmp.lt.s32.totalorder %s5422_s6, %s6719_s8 }
  0x93   : > { %p5424_p11 = scmp.ne.s32.totalorder %s5422_s6, %s5423_s17 }
  0x95   : > { %s6728_s23 = int_to_ptr.vmem [resolvable:$true] %s6727_s18  ;;  %p5426_p12 = pnand %p5424_p11, %p5884_p7 }
  0x96   : > { %5098 = dma.hbm_to_vmem [thread:$0]  (!%p5871_p5), %s5875_s2, 1024, %s6728_s23, [#allocation8], %s6619_s10, %s6619_s10, %s5581_s15  }
  0x97   : > { %p5427_p13 = pneg %p5426_p12  ;;  %s5428_s18 = scalar_lea.hbm %s6719_s8, 1 }
  0x98   : > { %p5430_p1 = scmp.lt.s32.totalorder %s5428_s18, %s5423_s17 }
  0x9a   : > { %p5431_p4 = por %p5430_p1, %p5429_p0 }
  0x9c   : > { %p5432_p6 = pnand %p5431_p4, %p5427_p13 }
  0x9e   : > { %5435 = shalt.err (!%p5432_p6)
}
  0x9f   : > { %5089 = dma.hbm_to_vmem [thread:$0]  (!%p5871_p5), %s1167_s1, 16, %s1169_s16, [#allocation3]  }
  0xa0   : > { %s1288_s2 = sshll.u32 %s6715_s20, 4  ;;  %s5583_s23 = smov [#allocation6]   ;;  %s5923_s2 = int_to_ptr.hbm [resolvable:$true] %s1288_s2 }
  0xa1   : > { %s1250_s11 = sshll.u32 %s5583_s23, 4  ;;  %s5451_s10 = sshra.s32 %s5914_s22, 4  ;;  %s1251_s11 = int_to_ptr.vmem [resolvable:$true] %s1250_s11  ;;  %s5452_s10 = int_to_ptr.hbm [resolvable:$true] %s5451_s10 }
  0xa2   : > { %s5453_s17 = scalar_lea.hbm %s5452_s10, 64  ;;  %s5458_s6 = scalar_lea.hbm %s6718_s12, 64 }
  0xa3   : > { %p5454_p8 = scmp.ne.s32.totalorder %s5452_s10, %s5453_s17  ;;  %p5459_p11 = scmp.lt.s32.totalorder %s5452_s10, %s6718_s12 }
  0xa4   : > { %p5460_p12 = scmp.lt.s32.totalorder %s5458_s6, %s5453_s17 }
  0xa5   : > { %p5456_p9 = pnand %p5454_p8, %p5884_p7 }
  0xa6   : > { %p5461_p13 = por %p5460_p12, %p5459_p11 }
  0xa7   : > { %p5457_p10 = pneg %p5456_p9 }
  0xa9   : > { %p5462_p0 = pnand %p5461_p13, %p5457_p10 }
  0xab   : > { %5465 = shalt.err (!%p5462_p0)
}
  0xac   : > { %s6730_s1 = smov 128   ;;  %s5584_s16 = smov [#allocation9]  }
  0xad   : > { %5095 = dma.hbm_to_vmem [thread:$0]  (!%p5871_p5), %s5914_s22, 1024, %s1251_s11, [#allocation5], %s6730_s1, %s6730_s1, %s5581_s15  }
  0xae   : > { %s1290_s18 = sshll.u32 %s5584_s16, 4  ;;  %s5481_s23 = sshra.s32 %s5923_s2, 4  ;;  %s1291_s18 = int_to_ptr.vmem [resolvable:$true] %s1290_s18  ;;  %s5482_s23 = int_to_ptr.hbm [resolvable:$true] %s5481_s23 }
  0xaf   : > { %s5483_s10 = scalar_lea.hbm %s5482_s23, 64  ;;  %s5488_s17 = scalar_lea.hbm %s6715_s20, 64 }
  0xb0   : > { %p5484_p1 = scmp.ne.s32.totalorder %s5482_s23, %s5483_s10  ;;  %p5489_p8 = scmp.lt.s32.totalorder %s5482_s23, %s6715_s20 }
  0xb1   : > { %p5490_p9 = scmp.lt.s32.totalorder %s5488_s17, %s5483_s10 }
  0xb2   : > { %p5486_p4 = pnand %p5484_p1, %p5884_p7 }
  0xb3   : > { %p5491_p10 = por %p5490_p9, %p5489_p8 }
  0xb4   : > { %p5487_p6 = pneg %p5486_p4 }
  0xb6   : > { %p5492_p11 = pnand %p5491_p10, %p5487_p6 }
  0xb8   : > { %5495 = shalt.err (!%p5492_p11)
}
  0xb9   : > { %5101 = dma.hbm_to_vmem [thread:$0]  (!%p5871_p5), %s5923_s2, 1024, %s1291_s18, [#allocation8], %s6730_s1, %s6730_s1, %s5581_s15  }
  0xba   : > { %1353 = sbr.rel (%p5859_p3) target bundleno = 10727 (0x29e7), region = 208 }
  0xbf   : > { %5516 = dma.done.wait (%p5102_p2), [#allocation3], 16  }
  0xc0   : > { %5518 = vsyncadd (%p5102_p2), [#allocation3], 4294967280 }
  0xc1   : > { %5520 = dma.done.wait (%p5102_p2), [#allocation5], 2048  }
  0xc2   : > { %5522 = vsyncadd (%p5102_p2), [#allocation5], 4294965248 }
  0xc3   : > { %5524 = dma.done.wait (%p5102_p2), [#allocation8], 2048  }
  0xc4   : > { %5526 = vsyncadd (%p5102_p2), [#allocation8], 4294965248  ;;  %s6731_s5 = sld [smem:[#allocation13_spill]]  ;;  %p1488_p3 = scmp.lt.s32.totalorder %s5854_s0, 1  ;;  %vm1510_vm0 = vcmask 1043456   ;;  %vm1506_vm1 = vcmask 31744  }
  0xc5   : > { %s6732_s25 = sld [smem:[#allocation18_spill]]  ;;  %v1576_v2 = vld [vmem:[%s6717_s14 + $0x18] sm:$0xff]  ;;  %v1575_v3 = vld [vmem:[%s6717_s14 + $0x10] sm:$0xff]  ;;  %v1574_v4 = vld [vmem:[%s6717_s14 + $0x8] sm:$0xff]  ;;  %vm1581_vm2 = vcmask 261120   ;;  %s6647_s15 = smov 96  }
  0xc6   : > { %s6790_s0 = smov (!%p1488_p3, %s5854_s0), 1  ;;  %s6734_s29 = sld [smem:[#allocation19_spill]]  ;;  %1597 = vmatpush.msra.mxu2 %v1576_v2  ;;  %v1573_v5 = vld [vmem:[%s6717_s14] sm:$0xff]  ;;  %vm1613_vm3 = vcmask 64512  }
  0xc7   : > { %s5963_s26 = sshll.u32 %s6790_s0, 3  ;;  %s6735_s13 = sld [smem:[#allocation15_spill]]  ;;  %v5190_v12 = vld [vmem:[%s6716_s19] ss:$0 sm:$0xff] }
  0xc8   : > { %6733 = sst [smem:[#allocation63_spill]] %s5963_s26  ;;  %1598 = vmatpush.msra.mxu2 %v1575_v3  ;;  %s6641_s0 = smov 72  }
  0xc9   : > { %s6736_s3 = sld [smem:[#allocation20_spill]]  ;;  %s6639_s28 = smov 88  }
  0xca   : > { %s1491_s7 = scalar_lea.vmem %s6731_s5, %s5963_s26  ;;  %1599 = vmatpush.msra.mxu2 %v1574_v4  ;;  %s6737_s9 = sld [smem:[#allocation14_spill]] }
  0xcb   : > { %v1501_v0 = vld [vmem:[%s6732_s25] sm:$0xf]  ;;  %s6635_s22 = smov 112   ;;  %s6633_s2 = smov 80  }
  0xcc   : > { %v1500_v1 = vld [vmem:[%s1491_s7] sm:$0xff]  ;;  %4908 = vmatpush.msk.msra.mxu0 %vm1510_vm0, %v1501_v0  ;;  %1600 = vmatpush.msra.mxu2 %v1573_v5  ;;  %s6645_s11 = smov 120   ;;  %s6637_s6 = smov 104  }
  0xcd   : > { %4909 = vmatmul.msk.f32.vlgmr.msra.gmra.mxu0 %vm1506_vm1, %v1500_v1  ;;  %v5189_v6 = vld [vmem:[%s6734_s29] ss:$0 sm:$0xff]  ;;  %s6643_s16 = smov 64   ;;  %s6631_s18 = smov 56  }
  0xce   : > { %v1535_v9 = vld [vmem:[%s6735_s13] sm:$0xff]  ;;  %s6621_s23 = smov 48   ;;  %s6629_s10 = smov 40  }
  0xcf   : > { %v1538_v15 = vld [vmem:[%s6736_s3] sm:$0xf]  ;;  %s6627_s17 = smov 8   ;;  %s6623_s7 = smov 16  }
  0xd0   : > { %4910 = vmatpush.msk.msra.mxu1 %vm1510_vm0, %v1538_v15  ;;  %s1495_s1 = scalar_lea.vmem %s6737_s9, %s5963_s26  ;;  %s6753_s3 = smov 40  }
  0xd1   : > { %v1537_v16 = vld [vmem:[%s1495_s1] sm:$0xff]  ;;  %s6625_s1 = smov 24   ;;  %s6754_s5 = sld [smem:[#allocation34_spill]] }
  0xd2   : > { %4911 = vmatmul.msk.f32.vlgmr.msra.gmra.mxu1 %vm1506_vm1, %v1537_v16  ;;  %s6755_s8 = sld [smem:[#allocation16_spill]]  ;;  %s6756_s9 = smov 48  }
  0xd3   : > { %s6757_s12 = sld [smem:[#allocation35_spill]]  ;;  %s6759_s13 = smov 24  }
  0xd4   : > { %s6762_s20 = sld [smem:[#allocation17_spill]]  ;;  %s6765_s25 = smov 72  }
  0xd5   : > { %s6776_s29 = sld [smem:[#allocation46_spill]] }
  0xd6   : > { %s6777_s30 = sld [smem:[#allocation47_spill]] }
  0xd7   : > { %s6778_s26 = sld [smem:[#allocation49_spill]] }
  0xd8   : > { %s6779_s21 = sld [smem:[#allocation51_spill]] }
  0xd9   : > { %s6780_s27 = sld [smem:[#allocation52_spill]] }
  0xda   : > { %s6781_s4 = sld [smem:[#allocation53_spill]] }
 0x14a   : > { %v1531_v7 = vpop.f32.mrf.mxu0 }
 0x14b   : > { %v1532_v8 = vadd.f32 %v5189_v6, %v1531_v7 }
 0x14d   : > { %v1534_v10 = vmul.f32 5.656854, %v1532_v8 }
 0x14f   : > { %v5976_v11 = vadd.f32 %v1535_v9, %v1534_v10  ;;  %v6011_v24 = vpop.f32.mrf.mxu1 }
 0x151   : > { %4912 = vmatmul.msk.f32.vlgmr.msra.gmra.mxu2 %vm1581_vm2, %v5976_v11 }
 0x1d4   : > { %v1602_v13 = vpop.f32.mrf.mxu2 }
 0x1d5   : > { %v5981_v14 = vadd.f32 %v5190_v12, %v1602_v13 }
 0x1d7   : > { %1849 = vrot.lane.b32.xlu2 %v5981_v14, %s6641_s0  ;;  %1611 = vrot.lane.b32.xlu1 %v5981_v14, %s6647_s15 }
 0x1d8   : > { %1691 = vrot.lane.b32.xlu0 %v5981_v14, %s6639_s28  ;;  %s6747_s28 = sld [smem:[#allocation33_spill]] }
 0x1df   : > { %1768 = vrot.lane.b32.xlu2 %v5981_v14, %s6635_s22  ;;  %1770 = vrot.lane.b32.xlu1 %v5981_v14, %s6633_s2  ;;  %s6744_s2 = sld [smem:[#allocation31_spill]] }
 0x1e0   : > { %1689 = vrot.lane.b32.xlu0 %v5981_v14, %s6645_s11  ;;  %s6745_s22 = sld [smem:[#allocation32_spill]] }
 0x1e8   : > { %1847 = vrot.lane.b32.xlu0 %v5981_v14, %s6637_s6  ;;  %s6746_s6 = smov %s6745_s22 }
 0x231   : > { %v1850_v18 = vpop.permute.xlu2 %1849 }
 0x239   : > { %v1769_v22 = vpop.permute.xlu2 %1768 }
 0x249   : > { %v1612_v17 = vpop.permute.xlu1 %1611 }
 0x24a   : > { %v1692_v19 = vpop.permute.xlu0 %1691  ;;  %4913 = vmatpush.xpose.msk.msrb.mxu0 %vm1613_vm3, %v1612_v17 }
 0x24b   : > { %4916 = vmatpush.xpose.msk.msrb.mxu1 %vm1613_vm3, %v1692_v19 }
 0x24d   : > { %4914 = vmatmul.msk.f32.vlgmr.msrb.gmra.mxu0 %vm1613_vm3, %v5981_v14 }
 0x24f   : > { %4922 = vmatpush.xpose.msk.msra.mxu1 %vm1613_vm3, %v1850_v18 }
 0x251   : > { %v1771_v20 = vpop.permute.xlu1 %1770 }
 0x252   : > { %v1690_v21 = vpop.permute.xlu0 %1689  ;;  %4919 = vmatpush.xpose.msk.msrb.mxu2 %vm1613_vm3, %v1771_v20 }
 0x253   : > { %4917 = vmatmul.msk.f32.vlgmr.msrb.gmra.mxu1 %vm1613_vm3, %v1690_v21 }
 0x255   : > { %4920 = vmatmul.msk.f32.vlgmr.msrb.gmra.mxu2 %vm1613_vm3, %v1769_v22 }
 0x25a   : > { %v1848_v23 = vpop.permute.xlu0 %1847 }
 0x25b   : > { %4923 = vmatmul.msk.f32.vlgmr.msra.gmra.mxu1 %vm1613_vm3, %v1848_v23 }
 0x2ca   : > { %v1635_v25 = vpop.f32.mrf.mxu0 }
 0x2cb   : > { %v1638_v26 = vmul.f32 0.35355338, %v1635_v25 }
 0x2cd   : > { %v1639_v27 = vsel %vm1613_vm3, %v1638_v26, -inf }
 0x2ce   : > { %1640 = vmax.xlane.f32.xlu2 %v1639_v27 }
 0x2d0   : > { %v1714_v28 = vpop.f32.mrf.mxu1 }
 0x2d1   : > { %v1717_v29 = vmul.f32 0.35355338, %v1714_v28 }
 0x2d3   : > { %v1718_v30 = vsel %vm1613_vm3, %v1717_v29, -inf }
 0x2d4   : > { %1719 = vmax.xlane.f32.xlu1 %v1718_v30 }
 0x2d8   : > { %v1872_v31 = vpop.f32.mrf.mxu1  ;;  %v1793_v32 = vpop.f32.mrf.mxu2 }
 0x2d9   : > { %v1875_v33 = vmul.f32 0.35355338, %v1872_v31  ;;  %v1796_v34 = vmul.f32 0.35355338, %v1793_v32 }
 0x2db   : > { %v1876_v35 = vsel %vm1613_vm3, %v1875_v33, -inf  ;;  %v1797_v36 = vsel %vm1613_vm3, %v1796_v34, -inf }
 0x2dc   : > { %1877 = vmax.xlane.f32.xlu0 %v1876_v35  ;;  %1798 = vmax.xlane.f32.xlu2 %v1797_v36 }
 0x2f0   : > { %1663 = vrot.lane.b32.xlu0 %v5981_v14, %s6643_s16 }
 0x341   : > { %v1641_v37 = vpop.xlane.xlu2 %1640 }
 0x342   : > { %v1642_v38 = vsub.f32 %v1638_v26, %v1641_v37 }
 0x344   : > { %v1643_v39 = vmul.f32 1.442695, %v1642_v38 }
 0x346   : > { %5238 = vpow2.f32 %v1643_v39 }
 0x347   : > { %v1720_v40 = vpop.xlane.xlu1 %1719 }
 0x348   : > { %v1721_v41 = vsub.f32 %v1717_v29, %v1720_v40 }
 0x34a   : > { %v1722_v42 = vmul.f32 1.442695, %v1721_v41 }
 0x34c   : > { %v5239_v43 = vpop.eup %5238  ;;  %5240 = vpow2.f32 %v1722_v42 }
 0x34d   : > { %v1645_v44 = vsel %vm1613_vm3, %v5239_v43, 0.0 }
 0x34e   : > { %1646 = vadd.xlane.f32.xlu2 %v1645_v44 }
 0x34f   : > { %v1878_v45 = vpop.xlane.xlu0 %1877  ;;  %v1799_v46 = vpop.xlane.xlu2 %1798 }
 0x350   : > { %v1879_v47 = vsub.f32 %v1875_v33, %v1878_v45  ;;  %v1800_v48 = vsub.f32 %v1796_v34, %v1799_v46 }
 0x352   : > { %v6020_v49 = vpop.eup %5240  ;;  %v1880_v50 = vmul.f32 1.442695, %v1879_v47  ;;  %v1801_v51 = vmul.f32 1.442695, %v1800_v48 }
 0x353   : > { %v1724_v52 = vsel %vm1613_vm3, %v6020_v49, 0.0 }
 0x354   : > { %5242 = vpow2.f32 %v1880_v50  ;;  %1725 = vadd.xlane.f32.xlu1 %v1724_v52  ;;  %v1607_v52 = vld [vmem:[%s6714_s24 + $0x10] sm:$0xff] }
 0x355   : > { %5244 = vpow2.f32 %v1801_v51  ;;  %v1608_v51 = vld [vmem:[%s6714_s24 + $0x18] sm:$0xff] }
 0x356   : > { %1961 = vmatpush.msra.mxu2 %v1608_v51 }
 0x358   : > { %1962 = vmatpush.msra.mxu2 %v1607_v52 }
 0x35a   : > { %v6024_v53 = vpop.eup %5242 }
 0x35b   : > { %v6026_v54 = vpop.eup %5244  ;;  %v1882_v55 = vsel %vm1613_vm3, %v6024_v53, 0.0 }
 0x35c   : > { %1883 = vadd.xlane.f32.xlu0 %v1882_v55  ;;  %v1803_v56 = vsel %vm1613_vm3, %v6026_v54, 0.0 }
 0x35d   : > { %1804 = vadd.xlane.f32.xlu1 %v1803_v56 }
 0x362   : > { %v1664_v57 = vpop.permute.xlu0 %1663 }
 0x363   : > { %1684 = vmatpush.msra.mxu0 %v1664_v57 }
 0x366   : > { %1742 = vrot.lane.b32.xlu2 %v5981_v14, %s6631_s18  ;;  %s6743_s18 = sld [smem:[#allocation29_spill]] }
 0x370   : > { %1821 = vrot.lane.b32.xlu0 %v5981_v14, %s6621_s23  ;;  %s6738_s23 = sld [smem:[#allocation25_spill]] }
 0x376   : > { %1900 = vrot.lane.b32.xlu1 %v5981_v14, %s6629_s10  ;;  %s6742_s10 = sld [smem:[#allocation27_spill]] }
 0x3c1   : > { %v1647_v58 = vpop.xlane.xlu2 %1646 }
 0x3c2   : > { %5246 = vrcp.f32 %v1647_v58  ;;  %v1659_v0 = vand.u32 2147483648, %v1647_v58  ;;  %v1657_v2 = vand.u32 2147483647, %v1647_v58  ;;  %vm1653_vm5 = vweird.f32 %v1647_v58 }
 0x3c4   : > { %v1660_v7 = vor.u32 1.1754944e-38, %v1659_v0  ;;  %vm1658_vm7 = vcmp.eq.f32.partialorder %v1657_v2, 8.507059e+37  ;;  %v5599_v2 = vmov 32.0  }
 0x3c7   : > { %v1726_v59 = vpop.xlane.xlu1 %1725 }
 0x3c8   : > { %v5247_v60 = vpop.eup %5246  ;;  %5248 = vrcp.f32 %v1726_v59  ;;  %v1738_v13 = vand.u32 2147483648, %v1726_v59  ;;  %v1736_v16 = vand.u32 2147483647, %v1726_v59  ;;  %vm1732_vm9 = vweird.f32 %v1726_v59 }
 0x3c9   : > { %v1649_v61 = vmul.f32 %v5247_v60, %v1647_v58  ;;  %v1743_v62 = vpop.permute.xlu2 %1742  ;;  %vm1654_vm4 = vweird.f32 %v5247_v60 }
 0x3ca   : > { %1763 = vmatpush.msra.mxu3 %v1743_v62  ;;  %vm1655_vm6 = vmor %vm1653_vm5, %vm1654_vm4  ;;  %v1739_v19 = vor.u32 1.1754944e-38, %v1738_v13  ;;  %vm1737_vm11 = vcmp.eq.f32.partialorder %v1736_v16, 8.507059e+37 }
 0x3cb   : > { %v1650_v63 = vsub.f32 1.0, %v1649_v61  ;;  %v5192_v61 = vld [vmem:[%s6738_s23] ss:$0 sm:$0xff] }
 0x3cd   : > { %v1651_v1 = vmul.f32 %v5247_v60, %v1650_v63 }
 0x3ce   : > { %v5249_v3 = vpop.eup %5248 }
 0x3cf   : > { %v1652_v4 = vadd.f32 %v5247_v60, %v1651_v1  ;;  %v1728_v5 = vmul.f32 %v5249_v3, %v1726_v59  ;;  %v1884_v6 = vpop.xlane.xlu0 %1883  ;;  %vm1733_vm8 = vweird.f32 %v5249_v3 }
 0x3d0   : > { %5250 = vrcp.f32 %v1884_v6  ;;  %v1805_v8 = vpop.xlane.xlu1 %1804  ;;  %vm1734_vm10 = vmor %vm1732_vm9, %vm1733_vm8  ;;  %v1896_v35 = vand.u32 2147483648, %v1884_v6  ;;  %vm1890_vm0 = vweird.f32 %v1884_v6  ;;  %v1894_v38 = vand.u32 2147483647, %v1884_v6 }
 0x3d1   : > { %v1656_v9 = vsel %vm1655_vm6, %v5247_v60, %v1652_v4  ;;  %v1729_v10 = vsub.f32 1.0, %v1728_v5  ;;  %5252 = vrcp.f32 %v1805_v8  ;;  %v1817_v30 = vand.u32 2147483648, %v1805_v8 }
 0x3d2   : > { %v1661_v12 = vsel %vm1658_vm7, %v1660_v7, %v1656_v9  ;;  %v1815_v32 = vand.u32 2147483647, %v1805_v8  ;;  %vm1811_vm14 = vweird.f32 %v1805_v8  ;;  %vm1895_vm6 = vcmp.eq.f32.partialorder %v1894_v38, 8.507059e+37 }
 0x3d3   : > { %v1730_v14 = vmul.f32 %v5249_v3, %v1729_v10  ;;  %v1662_v15 = vmul.f32 %v5239_v43, %v1661_v12  ;;  %v1818_v36 = vor.u32 1.1754944e-38, %v1817_v30  ;;  %v1897_v43 = vor.u32 1.1754944e-38, %v1896_v35 }
 0x3d4   : > { %vm1816_vm4 = vcmp.eq.f32.partialorder %v1815_v32, 8.507059e+37  ;;  %vm1939_vm7 = vcmask 130048   ;;  %vm1941_vm8 = vcmask 195584   ;;  %5254 = vrcp.f32 %v5599_v2 }
 0x3d5   : > { %4915 = vmatmul.msk.f32.vlgmr.msra.gmra.mxu0 %vm1613_vm3, %v1662_v15  ;;  %v1731_v17 = vadd.f32 %v5249_v3, %v1730_v14 }
 0x3d6   : > { %v5251_v18 = vpop.eup %5250 }
 0x3d7   : > { %v5253_v20 = vpop.eup %5252  ;;  %v1886_v21 = vmul.f32 %v5251_v18, %v1884_v6  ;;  %v1735_v22 = vsel %vm1734_vm10, %v5249_v3, %v1731_v17  ;;  %vm1891_vm13 = vweird.f32 %v5251_v18 }
 0x3d8   : > { %v1807_v23 = vmul.f32 %v5253_v20, %v1805_v8  ;;  %v1740_v25 = vsel %vm1737_vm11, %v1739_v19, %v1735_v22  ;;  %vm1812_vm12 = vweird.f32 %v5253_v20  ;;  %vm1892_vm5 = vmor %vm1890_vm0, %vm1891_vm13  ;;  %vm2053_vm13 = vcmask 523264  }
 0x3d9   : > { %v1887_v26 = vsub.f32 1.0, %v1886_v21  ;;  %v1741_v27 = vmul.f32 %v6020_v49, %v1740_v25  ;;  %vm1813_vm15 = vmor %vm1811_vm14, %vm1812_vm12 }
 0x3da   : > { %v1808_v28 = vsub.f32 1.0, %v1807_v23  ;;  %v5255_v3 = vpop.eup %5254 }
 0x3db   : > { %v1888_v29 = vmul.f32 %v5251_v18, %v1887_v26  ;;  %4918 = vmatmul.msk.f32.vlgmr.msra.gmra.mxu3 %vm1613_vm3, %v1741_v27  ;;  %v1976_v4 = vmul.f32 32.0, %v5255_v3  ;;  %vm1980_vm9 = vweird.f32 %v5255_v3 }
 0x3dc   : > { %v1809_v31 = vmul.f32 %v5253_v20, %v1808_v28 }
 0x3dd   : > { %v1889_v34 = vadd.f32 %v5251_v18, %v1888_v29  ;;  %v1977_v5 = vsub.f32 1.0, %v1976_v4 }
 0x3de   : > { %v1810_v33 = vadd.f32 %v5253_v20, %v1809_v31 }
 0x3df   : > { %v1893_v42 = vsel %vm1892_vm5, %v5251_v18, %v1889_v34  ;;  %v1978_v6 = vmul.f32 %v5255_v3, %v1977_v5  ;;  %v5197_v5 = vld [vmem:[%s6745_s22] ss:$0 sm:$0xff]  ;;  %s6748_s22 = smov 88  }
 0x3e0   : > { %v1814_v37 = vsel %vm1813_vm15, %v5253_v20, %v1810_v33  ;;  %v1898_v44 = vsel %vm1895_vm6, %v1897_v43, %v1893_v42  ;;  %v5195_v42 = vld [vmem:[%s6743_s18] ss:$0 sm:$0xff] }
 0x3e1   : > { %v1819_v39 = vsel %vm1816_vm4, %v1818_v36, %v1814_v37  ;;  %v1899_v46 = vmul.f32 %v6024_v53, %v1898_v44  ;;  %v1606_v53 = vld [vmem:[%s6714_s24 + $0x8] sm:$0xff]  ;;  %v1979_v7 = vadd.f32 %v5255_v3, %v1978_v6  ;;  %v5194_v36 = vld [vmem:[%s6742_s10] ss:$0 sm:$0xff] }
 0x3e2   : > { %v1822_v40 = vpop.permute.xlu0 %1821  ;;  %v1820_v41 = vmul.f32 %v6026_v54, %v1819_v39  ;;  %1963 = vmatpush.msra.mxu2 %v1606_v53  ;;  %v1605_v54 = vld [vmem:[%s6714_s24] sm:$0xff] }
 0x3e3   : > { %1842 = vmatpush.msrb.mxu0 %v1822_v40  ;;  %v6059_v8 = vsel %vm1980_vm9, %v5255_v3, %v1979_v7 }
 0x3e4   : > { %4921 = vmatmul.msk.f32.vlgmr.msrb.gmra.mxu0 %vm1613_vm3, %v1820_v41  ;;  %1964 = vmatpush.msra.mxu2 %v1605_v54 }
 0x3e8   : > { %v1901_v45 = vpop.permute.xlu1 %1900 }
 0x3e9   : > { %1921 = vmatpush.msrb.mxu3 %v1901_v45 }
 0x3ea   : > { %4924 = vmatmul.msk.f32.vlgmr.msrb.gmra.mxu3 %vm1613_vm3, %v1899_v46  ;;  %v5196_v46 = vld [vmem:[%s6744_s2] ss:$0 sm:$0xff] }
 0x452   : > { %v1686_v47 = vpop.f32.mrf.mxu0 }
 0x45e   : > { %v1765_v48 = vpop.f32.mrf.mxu3 }
 0x45f   : > { %1927 = vrot.lane.b32.xlu2 %v1765_v48, %s6627_s17  ;;  %s6741_s17 = sld [smem:[#allocation26_spill]] }
 0x461   : > { %v1844_v49 = vpop.f32.mrf.mxu0 }
 0x462   : > { %1931 = vrot.lane.b32.xlu1 %v1844_v49, %s6623_s7  ;;  %s6739_s7 = sld [smem:[#allocation28_spill]] }
 0x465   : > { %v5193_v33 = vld [vmem:[%s6741_s17] ss:$0 sm:$0xff] }
 0x468   : > { %v2012_v14 = vld [vmem:[%s6739_s7 + $0x18] sm:$0xff]  ;;  %v2011_v15 = vld [vmem:[%s6739_s7 + $0x10] sm:$0xff]  ;;  %v2010_v16 = vld [vmem:[%s6739_s7 + $0x8] sm:$0xff] }
 0x469   : > { %2032 = vmatpush.msra.mxu0 %v2012_v14  ;;  %v2009_v17 = vld [vmem:[%s6739_s7] sm:$0xff] }
 0x46b   : > { %2033 = vmatpush.msra.mxu0 %v2011_v15 }
 0x46d   : > { %v1923_v50 = vpop.f32.mrf.mxu3  ;;  %2034 = vmatpush.msra.mxu0 %v2010_v16 }
 0x46e   : > { %1935 = vrot.lane.b32.xlu0 %v1923_v50, %s6625_s1  ;;  %s6740_s1 = sld [smem:[#allocation30_spill]] }
 0x46f   : > { %2035 = vmatpush.msra.mxu0 %v2009_v17 }
 0x474   : > { %v2048_v18 = vld [vmem:[%s6740_s1 + $0x38] sm:$0xff]  ;;  %v2047_v19 = vld [vmem:[%s6740_s1 + $0x30] sm:$0xff]  ;;  %v2046_v20 = vld [vmem:[%s6740_s1 + $0x28] sm:$0xff] }
 0x475   : > { %2065 = vmatpush.msrb.mxu1 %v2048_v18  ;;  %v2045_v23 = vld [vmem:[%s6740_s1 + $0x20] sm:$0xff]  ;;  %v2044_v26 = vld [vmem:[%s6740_s1 + $0x18] sm:$0xff]  ;;  %v2043_v39 = vld [vmem:[%s6740_s1 + $0x10] sm:$0xff] }
 0x476   : > { %v2042_v40 = vld [vmem:[%s6740_s1 + $0x8] sm:$0xff]  ;;  %v2041_v41 = vld [vmem:[%s6740_s1] sm:$0xff] }
 0x477   : > { %2066 = vmatpush.msrb.mxu1 %v2047_v19 }
 0x479   : > { %2067 = vmatpush.msrb.mxu1 %v2046_v20 }
 0x47b   : > { %2068 = vmatpush.msrb.mxu1 %v2045_v23 }
 0x47d   : > { %2069 = vmatpush.msrb.mxu1 %v2044_v26 }
 0x47f   : > { %2070 = vmatpush.msrb.mxu1 %v2043_v39 }
 0x481   : > { %2071 = vmatpush.msrb.mxu1 %v2042_v40 }
 0x483   : > { %2072 = vmatpush.msrb.mxu1 %v2041_v41 }
 0x4b9   : > { %v1928_v55 = vpop.permute.xlu2 %1927 }
 0x4ba   : > { %v1938_v57 = vsel %vm1613_vm3, %v1686_v47, %v1928_v55 }
 0x4d4   : > { %v1932_v56 = vpop.permute.xlu1 %1931 }
 0x4d5   : > { %v1940_v58 = vsel %vm1939_vm7, %v1938_v57, %v1932_v56  ;;  %v4931_v56 = vld [vmem:[%s6717_s14 + $0x38] sm:$0xff]  ;;  %v4930_v57 = vld [vmem:[%s6717_s14 + $0x30] sm:$0xff] }
 0x4d6   : > { %2135 = vmatpush.msra.mxu3 %v4931_v56 }
 0x4d8   : > { %2136 = vmatpush.msra.mxu3 %v4930_v57 }
 0x4e0   : > { %v1936_v59 = vpop.permute.xlu0 %1935 }
 0x4e1   : > { %v1942_v60 = vsel %vm1941_vm8, %v1940_v58, %v1936_v59  ;;  %v4929_v58 = vld [vmem:[%s6717_s14 + $0x28] sm:$0xff]  ;;  %v4928_v59 = vld [vmem:[%s6717_s14 + $0x20] sm:$0xff]  ;;  %s6760_s14 = smov 96  }
 0x4e2   : > { %4925 = vmatmul.msk.f32.vlgmr.msra.gmra.mxu2 %vm1581_vm2, %v1942_v60  ;;  %2137 = vmatpush.msra.mxu3 %v4929_v58 }
 0x4e4   : > { %2138 = vmatpush.msra.mxu3 %v4928_v59 }
 0x565   : > { %v1966_v62 = vpop.f32.mrf.mxu2 }
 0x566   : > { %v1967_v63 = vadd.f32 %v5192_v61, %v1966_v62 }
 0x568   : > { %v1969_v0 = vadd.f32 %v1967_v63, %v5976_v11 }
 0x56a   : > { %v1972_v1 = vsel %vm1581_vm2, %v1969_v0, 0.0 }
 0x56b   : > { %1973 = vadd.xlane.f32.xlu2 %v1972_v1 }
 0x5de   : > { %v1974_v11 = vpop.xlane.xlu2 %1973 }
 0x5df   : > { %v1982_v9 = vmul.f32 %v6059_v8, %v1974_v11  ;;  %v5198_v11 = vld [vmem:[%s6747_s28] ss:$0 sm:$0xff] }
 0x5e1   : > { %v1983_v10 = vsub.f32 %v1969_v0, %v1982_v9 }
 0x5e3   : > { %v1984_v12 = vmul.f32 %v1983_v10, %v1983_v10 }
 0x5e5   : > { %v1985_v13 = vsel %vm1581_vm2, %v1984_v12, 0.0  ;;  %v5199_v12 = vld [vmem:[%s6716_s19 + $0x1] ss:$0 sm:$0xff]  ;;  %s6761_s19 = smov 16  }
 0x5e6   : > { %1986 = vadd.xlane.f32.xlu1 %v1985_v13 }
 0x659   : > { %v1987_v21 = vpop.xlane.xlu1 %1986 }
 0x65a   : > { %v1988_v22 = vmul.f32 %v1987_v21, %v6059_v8 }
 0x65c   : > { %v1989_v25 = vadd.f32 1e-05, %v1988_v22 }
 0x65e   : > { %5256 = vrsqrt.f32 %v1989_v25  ;;  %vm1996_vm11 = vweird.f32 %v1989_v25 }
 0x664   : > { %v5257_v27 = vpop.eup %5256 }
 0x665   : > { %v1991_v28 = vmul.f32 %v5257_v27, %v1989_v25  ;;  %vm1997_vm10 = vweird.f32 %v5257_v27 }
 0x666   : > { %vm1998_vm12 = vmor %vm1996_vm11, %vm1997_vm10 }
 0x667   : > { %v1992_v29 = vmul.f32 %v5257_v27, %v1991_v28 }
 0x669   : > { %v1993_v30 = vmul.f32 0.5, %v1992_v29 }
 0x66b   : > { %v1994_v31 = vsub.f32 1.5, %v1993_v30 }
 0x66d   : > { %v1995_v32 = vmul.f32 %v5257_v27, %v1994_v31 }
 0x66f   : > { %v1999_v34 = vsel %vm1998_vm12, %v5257_v27, %v1995_v32 }
 0x670   : > { %v2000_v35 = vmul.f32 %v1999_v34, %v1983_v10 }
 0x672   : > { %v2004_v37 = vmul.f32 %v5193_v33, %v2000_v35 }
 0x674   : > { %v2008_v38 = vadd.f32 %v5194_v36, %v2004_v37 }
 0x676   : > { %4926 = vmatmul.msk.f32.vlgmr.msra.gmra.mxu0 %vm1581_vm2, %v2008_v38 }
 0x6f3   : > { %v2037_v43 = vpop.f32.mrf.mxu0 }
 0x6f4   : > { %v2038_v44 = vadd.f32 %v5195_v42, %v2037_v43 }
 0x6f6   : > { %v2040_v45 = vmax.f32 %v2038_v44, 0.0 }
 0x6f8   : > { %4927 = vmatmul.msk.f32.vlgmr.msrb.gmra.mxu1 %vm2053_vm13, %v2040_v45 }
 0x775   : > { %v2074_v47 = vpop.f32.mrf.mxu1 }
 0x776   : > { %v2075_v48 = vadd.f32 %v5196_v46, %v2074_v47 }
 0x778   : > { %v2077_v49 = vadd.f32 %v2075_v48, %v2008_v38 }
 0x77a   : > { %v2080_v50 = vsel %vm1581_vm2, %v2077_v49, 0.0 }
 0x77b   : > { %2081 = vadd.xlane.f32.xlu0 %v2080_v50 }
 0x7ee   : > { %v2082_v51 = vpop.xlane.xlu0 %2081 }
 0x7ef   : > { %v2083_v52 = vmul.f32 %v2082_v51, %v6059_v8 }
 0x7f1   : > { %v2084_v53 = vsub.f32 %v2077_v49, %v2083_v52 }
 0x7f3   : > { %v2085_v54 = vmul.f32 %v2084_v53, %v2084_v53 }
 0x7f5   : > { %v2086_v55 = vsel %vm1581_vm2, %v2085_v54, 0.0 }
 0x7f6   : > { %2087 = vadd.xlane.f32.xlu2 %v2086_v55 }
 0x869   : > { %v2088_v60 = vpop.xlane.xlu2 %2087 }
 0x86a   : > { %v2089_v61 = vmul.f32 %v2088_v60, %v6059_v8 }
 0x86c   : > { %v2090_v62 = vadd.f32 1e-05, %v2089_v61 }
 0x86e   : > { %5258 = vrsqrt.f32 %v2090_v62  ;;  %vm2097_vm15 = vweird.f32 %v2090_v62 }
 0x874   : > { %v5259_v63 = vpop.eup %5258 }
 0x875   : > { %v2092_v0 = vmul.f32 %v5259_v63, %v2090_v62  ;;  %vm2098_vm14 = vweird.f32 %v5259_v63 }
 0x876   : > { %vm2099_vm0 = vmor %vm2097_vm15, %vm2098_vm14 }
 0x877   : > { %v2093_v1 = vmul.f32 %v5259_v63, %v2092_v0 }
 0x879   : > { %v2094_v2 = vmul.f32 0.5, %v2093_v1 }
 0x87b   : > { %v2095_v3 = vsub.f32 1.5, %v2094_v2 }
 0x87d   : > { %v2096_v4 = vmul.f32 %v5259_v63, %v2095_v3 }
 0x87f   : > { %v2100_v6 = vsel %vm2099_vm0, %v5259_v63, %v2096_v4 }
 0x880   : > { %v2101_v7 = vmul.f32 %v2100_v6, %v2084_v53 }
 0x882   : > { %v2105_v9 = vmul.f32 %v5197_v5, %v2101_v7 }
 0x884   : > { %v6092_v10 = vadd.f32 %v5198_v11, %v2105_v9 }
 0x886   : > { %4933 = vmatmul.msk.f32.vlgmr.msra.gmra.mxu3 %vm1581_vm2, %v6092_v10 }
 0x909   : > { %v2140_v13 = vpop.f32.mrf.mxu3 }
 0x90a   : > { %v6097_v14 = vadd.f32 %v5199_v12, %v2140_v13 }
 0x90c   : > { %2228 = vrot.lane.b32.xlu2 %v6097_v14, %s6645_s11  ;;  %2151 = vrot.lane.b32.xlu1 %v6097_v14, %s6647_s15  ;;  %s6751_s11 = smov 80   ;;  %s6752_s15 = smov 56  }
 0x914   : > { %2388 = vrot.lane.b32.xlu1 %v6097_v14, %s6641_s0  ;;  %s6749_s0 = smov 104  }
 0x91c   : > { %2202 = vrot.lane.b32.xlu1 %v6097_v14, %s6643_s16  ;;  %s6750_s16 = smov 112  }
 0x966   : > { %v2229_v28 = vpop.permute.xlu2 %2228 }
 0x97e   : > { %v2152_v15 = vpop.permute.xlu1 %2151 }
 0x97f   : > { %4939 = vmatpush.xpose.msk.msrb.mxu2 %vm1613_vm3, %v2152_v15 }
 0x982   : > { %4940 = vmatmul.msk.f32.vlgmr.msrb.gmra.mxu2 %vm1613_vm3, %v6097_v14 }
 0x986   : > { %v2389_v16 = vpop.permute.xlu1 %2388 }
 0x98e   : > { %v2203_v17 = vpop.permute.xlu1 %2202 }
 0x98f   : > { %2223 = vmatpush.msrb.mxu0 %v2203_v17 }
 0xa05   : > { %v2174_v18 = vpop.f32.mrf.mxu2 }
 0xa06   : > { %v2177_v19 = vmul.f32 0.35355338, %v2174_v18 }
 0xa08   : > { %v2178_v20 = vsel %vm1613_vm3, %v2177_v19, -inf }
 0xa09   : > { %2179 = vmax.xlane.f32.xlu0 %v2178_v20 }
 0xa1d   : > { %2230 = vrot.lane.b32.xlu0 %v6097_v14, %s6748_s22 }
 0xa25   : > { %2386 = vrot.lane.b32.xlu0 %v6097_v14, %s6749_s0 }
 0xa2d   : > { %2307 = vrot.lane.b32.xlu0 %v6097_v14, %s6750_s16 }
 0xa7c   : > { %v2180_v21 = vpop.xlane.xlu0 %2179 }
 0xa7d   : > { %v2181_v22 = vsub.f32 %v2177_v19, %v2180_v21 }
 0xa7f   : > { %v2182_v23 = vmul.f32 1.442695, %v2181_v22 }
 0xa81   : > { %5260 = vpow2.f32 %v2182_v23 }
 0xa87   : > { %v5261_v25 = vpop.eup %5260 }
 0xa88   : > { %v2184_v26 = vsel %vm1613_vm3, %v5261_v25, 0.0 }
 0xa89   : > { %2185 = vadd.xlane.f32.xlu2 %v2184_v26 }
 0xa8f   : > { %v2231_v27 = vpop.permute.xlu0 %2230 }
 0xa90   : > { %4942 = vmatpush.xpose.msk.msrb.mxu3 %vm1613_vm3, %v2231_v27 }
 0xa93   : > { %4943 = vmatmul.msk.f32.vlgmr.msrb.gmra.mxu3 %vm1613_vm3, %v2229_v28 }
 0xa94   : > { %4948 = vmatpush.xpose.msk.msra.mxu3 %vm1613_vm3, %v2389_v16 }
 0xa97   : > { %v2387_v29 = vpop.permute.xlu0 %2386 }
 0xa9b   : > { %4949 = vmatmul.msk.f32.vlgmr.msra.gmra.mxu3 %vm1613_vm3, %v2387_v29 }
 0xa9f   : > { %v2308_v44 = vpop.permute.xlu0 %2307 }
 0xaa1   : > { %2309 = vrot.lane.b32.xlu2 %v6097_v14, %s6751_s11 }
 0xafc   : > { %v2186_v30 = vpop.xlane.xlu2 %2185 }
 0xafd   : > { %5262 = vrcp.f32 %v2186_v30  ;;  %v2198_v35 = vand.u32 2147483648, %v2186_v30  ;;  %v2196_v37 = vand.u32 2147483647, %v2186_v30  ;;  %vm2192_vm5 = vweird.f32 %v2186_v30 }
 0xaff   : > { %v2199_v39 = vor.u32 1.1754944e-38, %v2198_v35  ;;  %vm2197_vm9 = vcmp.eq.f32.partialorder %v2196_v37, 8.507059e+37  ;;  %v5191_v35 = vld [vmem:[#allocation2] ss:$0 sm:$0xff]  ;;  %v2680_v37 = vld [vmem:[%s6754_s5 + $0x8] sm:$0xff] }
 0xb03   : > { %v5263_v31 = vpop.eup %5262 }
 0xb04   : > { %v2188_v32 = vmul.f32 %v5263_v31, %v2186_v30  ;;  %v2310_v33 = vpop.permute.xlu2 %2309  ;;  %vm2193_vm4 = vweird.f32 %v5263_v31  ;;  %v2682_v30 = vld [vmem:[%s6754_s5 + $0x18] sm:$0xff] }
 0xb05   : > { %4945 = vmatpush.xpose.msk.msra.mxu0 %vm1613_vm3, %v2310_v33  ;;  %vm2194_vm6 = vmor %vm2192_vm5, %vm2193_vm4 }
 0xb06   : > { %v2189_v34 = vsub.f32 1.0, %v2188_v32 }
 0xb08   : > { %v2190_v36 = vmul.f32 %v5263_v31, %v2189_v34  ;;  %v2681_v34 = vld [vmem:[%s6754_s5 + $0x10] sm:$0xff] }
 0xb0a   : > { %v2191_v38 = vadd.f32 %v5263_v31, %v2190_v36 }
 0xb0c   : > { %v2195_v40 = vsel %vm2194_vm6, %v5263_v31, %v2191_v38  ;;  %v1567_v38 = vadd.f32 %v5191_v35, %v6011_v24  ;;  %v4955_v35 = vld [vmem:[%s6739_s7 + $0x28] sm:$0xff] }
 0xb0d   : > { %v2200_v41 = vsel %vm2197_vm9, %v2199_v39, %v2195_v40  ;;  %v2679_v40 = vld [vmem:[%s6754_s5] sm:$0xff] }
 0xb0e   : > { %v2201_v42 = vmul.f32 %v5261_v25, %v2200_v41  ;;  %v1569_v41 = vmul.f32 5.656854, %v1567_v38 }
 0xb10   : > { %4941 = vmatmul.msk.f32.vlgmr.msrb.gmra.mxu0 %vm1613_vm3, %v2201_v42  ;;  %v1570_v42 = vld [vmem:[%s6755_s8] sm:$0xff]  ;;  %s6758_s8 = smov 8  }
 0xb16   : > { %v2253_v43 = vpop.f32.mrf.mxu3 }
 0xb17   : > { %v2256_v45 = vmul.f32 0.35355338, %v2253_v43  ;;  %v6152_v43 = vadd.f32 %v1570_v42, %v1569_v41 }
 0xb18   : > { %4946 = vmatmul.msk.f32.vlgmr.msra.gmra.mxu0 %vm1613_vm3, %v2308_v44 }
 0xb19   : > { %v2257_v46 = vsel %vm1613_vm3, %v2256_v45, -inf }
 0xb1a   : > { %2258 = vmax.xlane.f32.xlu1 %v2257_v46 }
 0xb1e   : > { %v2411_v47 = vpop.f32.mrf.mxu3 }
 0xb1f   : > { %v2414_v48 = vmul.f32 0.35355338, %v2411_v47 }
 0xb21   : > { %v2415_v49 = vsel %vm1613_vm3, %v2414_v48, -inf }
 0xb22   : > { %2416 = vmax.xlane.f32.xlu2 %v2415_v49 }
 0xb8d   : > { %v6129_v50 = vpop.f32.mrf.mxu0  ;;  %v2259_v51 = vpop.xlane.xlu1 %2258 }
 0xb8e   : > { %v2260_v52 = vsub.f32 %v2256_v45, %v2259_v51 }
 0xb90   : > { %v2261_v53 = vmul.f32 1.442695, %v2260_v52 }
 0xb92   : > { %5264 = vpow2.f32 %v2261_v53 }
 0xb95   : > { %v2417_v54 = vpop.xlane.xlu2 %2416  ;;  %v2332_v55 = vpop.f32.mrf.mxu0 }
 0xb96   : > { %v2418_v56 = vsub.f32 %v2414_v48, %v2417_v54  ;;  %v2335_v57 = vmul.f32 0.35355338, %v2332_v55 }
 0xb98   : > { %v5265_v58 = vpop.eup %5264  ;;  %v2419_v59 = vmul.f32 1.442695, %v2418_v56  ;;  %v2336_v60 = vsel %vm1613_vm3, %v2335_v57, -inf }
 0xb99   : > { %2337 = vmax.xlane.f32.xlu0 %v2336_v60  ;;  %v2263_v61 = vsel %vm1613_vm3, %v5265_v58, 0.0 }
 0xb9a   : > { %5266 = vpow2.f32 %v2419_v59  ;;  %2264 = vadd.xlane.f32.xlu1 %v2263_v61  ;;  %v4937_v61 = vld [vmem:[%s6714_s24 + $0x38] sm:$0xff] }
 0xb9b   : > { %2498 = vmatpush.msrb.mxu0 %v4937_v61 }
 0xba0   : > { %v5267_v62 = vpop.eup %5266 }
 0xba1   : > { %v2421_v63 = vsel %vm1613_vm3, %v5267_v62, 0.0 }
 0xba2   : > { %2422 = vadd.xlane.f32.xlu2 %v2421_v63  ;;  %v4935_v63 = vld [vmem:[%s6714_s24 + $0x28] sm:$0xff] }
 0xbb3   : > { %2281 = vrot.lane.b32.xlu1 %v6097_v14, %s6752_s15 }
 0xbba   : > { %2439 = vrot.lane.b32.xlu2 %v6097_v14, %s6753_s3 }
 0xc0c   : > { %v2338_v0 = vpop.xlane.xlu0 %2337 }
 0xc0d   : > { %v2339_v1 = vsub.f32 %v2335_v57, %v2338_v0  ;;  %v2265_v2 = vpop.xlane.xlu1 %2264  ;;  %v4934_v0 = vld [vmem:[%s6714_s24 + $0x20] sm:$0xff] }
 0xc0e   : > { %5268 = vrcp.f32 %v2265_v2  ;;  %v2277_v16 = vand.u32 2147483648, %v2265_v2  ;;  %vm2271_vm11 = vweird.f32 %v2265_v2  ;;  %v2275_v17 = vand.u32 2147483647, %v2265_v2 }
 0xc0f   : > { %v2340_v3 = vmul.f32 1.442695, %v2339_v1 }
 0xc10   : > { %v2278_v21 = vor.u32 1.1754944e-38, %v2277_v16  ;;  %vm2276_vm14 = vcmp.eq.f32.partialorder %v2275_v17, 8.507059e+37  ;;  %v6182_v17 = vld [vmem:[%s6762_s20] sm:$0xff] }
 0xc11   : > { %5270 = vpow2.f32 %v2340_v3 }
 0xc14   : > { %v5269_v4 = vpop.eup %5268 }
 0xc15   : > { %v2267_v5 = vmul.f32 %v5269_v4, %v2265_v2  ;;  %v2423_v6 = vpop.xlane.xlu2 %2422  ;;  %vm2272_vm10 = vweird.f32 %v5269_v4 }
 0xc16   : > { %5272 = vrcp.f32 %v2423_v6  ;;  %vm2273_vm12 = vmor %vm2271_vm11, %vm2272_vm10  ;;  %v2435_v26 = vand.u32 2147483648, %v2423_v6  ;;  %vm2429_vm0 = vweird.f32 %v2423_v6  ;;  %v2433_v27 = vand.u32 2147483647, %v2423_v6 }
 0xc17   : > { %v6138_v7 = vpop.eup %5270  ;;  %v2268_v11 = vsub.f32 1.0, %v2267_v5 }
 0xc18   : > { %v2342_v9 = vsel %vm1613_vm3, %v6138_v7, 0.0  ;;  %v2436_v33 = vor.u32 1.1754944e-38, %v2435_v26  ;;  %vm2434_vm5 = vcmp.eq.f32.partialorder %v2433_v27, 8.507059e+37 }
 0xc19   : > { %v2269_v12 = vmul.f32 %v5269_v4, %v2268_v11  ;;  %2343 = vadd.xlane.f32.xlu0 %v2342_v9  ;;  %v5201_v9 = vld [vmem:[%s6738_s23 + $0x1] ss:$0 sm:$0xff]  ;;  %s6764_s23 = smov 64  }
 0xc1b   : > { %v2270_v13 = vadd.f32 %v5269_v4, %v2269_v12 }
 0xc1c   : > { %v5273_v15 = vpop.eup %5272 }
 0xc1d   : > { %v2425_v18 = vmul.f32 %v5273_v15, %v2423_v6  ;;  %v2274_v19 = vsel %vm2273_vm12, %v5269_v4, %v2270_v13  ;;  %vm2430_vm15 = vweird.f32 %v5273_v15  ;;  %v2440_v32 = vpop.permute.xlu2 %2439 }
 0xc1e   : > { %v2279_v23 = vsel %vm2276_vm14, %v2278_v21, %v2274_v19  ;;  %vm2431_vm4 = vmor %vm2429_vm0, %vm2430_vm15 }
 0xc1f   : > { %v2426_v20 = vsub.f32 1.0, %v2425_v18  ;;  %v2280_v29 = vmul.f32 %v5265_v58, %v2279_v23  ;;  %v5200_v58 = vld [vmem:[%s6757_s12] ss:$0 sm:$0xff] }
 0xc21   : > { %v2427_v22 = vmul.f32 %v5273_v15, %v2426_v20 }
 0xc23   : > { %v2428_v25 = vadd.f32 %v5273_v15, %v2427_v22 }
 0xc25   : > { %v2282_v28 = vpop.permute.xlu1 %2281  ;;  %v2432_v31 = vsel %vm2431_vm4, %v5273_v15, %v2428_v25 }
 0xc26   : > { %2302 = vmatpush.msra.mxu2 %v2282_v28  ;;  %v2437_v36 = vsel %vm2434_vm5, %v2436_v33, %v2432_v31  ;;  %v4957_v33 = vld [vmem:[%s6739_s7 + $0x38] sm:$0xff] }
 0xc27   : > { %4944 = vmatmul.msk.f32.vlgmr.msra.gmra.mxu2 %vm1613_vm3, %v2280_v29  ;;  %v2438_v39 = vmul.f32 %v5267_v62, %v2437_v36  ;;  %v4936_v62 = vld [vmem:[%s6714_s24 + $0x30] sm:$0xff]  ;;  %s6763_s24 = smov 120   ;;  %v4954_v36 = vld [vmem:[%s6739_s7 + $0x20] sm:$0xff] }
 0xc28   : > { %2460 = vmatpush.msrb.mxu2 %v2440_v32  ;;  %2499 = vmatpush.msrb.mxu0 %v4936_v62 }
 0xc2a   : > { %2702 = vmatpush.msra.mxu2 %v2682_v30  ;;  %2500 = vmatpush.msrb.mxu0 %v4935_v63 }
 0xc2c   : > { %2703 = vmatpush.msra.mxu2 %v2681_v34  ;;  %2501 = vmatpush.msrb.mxu0 %v4934_v0  ;;  %v4956_v34 = vld [vmem:[%s6739_s7 + $0x30] sm:$0xff]  ;;  %s6769_s7 = sld [smem:[#allocation55_spill]] }
 0xc2d   : > { %2360 = vrot.lane.b32.xlu0 %v6097_v14, %s6756_s9 }
 0xc2e   : > { %2704 = vmatpush.msra.mxu2 %v2680_v37 }
 0xc2f   : > { %4950 = vmatmul.msk.f32.vlgmr.msrb.gmra.mxu2 %vm1613_vm3, %v2438_v39 }
 0xc30   : > { %2705 = vmatpush.msra.mxu2 %v2679_v40 }
 0xc37   : > { %4972 = vmatmul.msk.f32.vlgmr.msra.gmra.mxu2 %vm1581_vm2, %v6152_v43 }
 0xc8c   : > { %v2344_v44 = vpop.xlane.xlu0 %2343 }
 0xc8d   : > { %5274 = vrcp.f32 %v2344_v44  ;;  %v2356_v47 = vand.u32 2147483648, %v2344_v44  ;;  %v2354_v48 = vand.u32 2147483647, %v2344_v44  ;;  %vm2350_vm9 = vweird.f32 %v2344_v44 }
 0xc8f   : > { %v2357_v51 = vor.u32 1.1754944e-38, %v2356_v47  ;;  %vm2355_vm11 = vcmp.eq.f32.partialorder %v2354_v48, 8.507059e+37 }
 0xc93   : > { %v5275_v45 = vpop.eup %5274 }
 0xc94   : > { %v2346_v24 = vmul.f32 %v5275_v45, %v2344_v44  ;;  %vm2351_vm6 = vweird.f32 %v5275_v45  ;;  %v4967_v44 = vld [vmem:[%s6740_s1 + $0x78] sm:$0xff] }
 0xc95   : > { %vm2352_vm10 = vmor %vm2350_vm9, %vm2351_vm6  ;;  %2600 = vmatpush.msrb.mxu3 %v4967_v44 }
 0xc96   : > { %v2347_v46 = vsub.f32 1.0, %v2346_v24 }
 0xc98   : > { %v2348_v14 = vmul.f32 %v5275_v45, %v2347_v46  ;;  %v4965_v46 = vld [vmem:[%s6740_s1 + $0x68] sm:$0xff] }
 0xc9a   : > { %v2349_v49 = vadd.f32 %v5275_v45, %v2348_v14 }
 0xc9c   : > { %v2353_v52 = vsel %vm2352_vm10, %v5275_v45, %v2349_v49  ;;  %v4966_v45 = vld [vmem:[%s6740_s1 + $0x70] sm:$0xff] }
 0xc9d   : > { %v2358_v53 = vsel %vm2355_vm11, %v2357_v51, %v2353_v52  ;;  %2601 = vmatpush.msrb.mxu3 %v4966_v45  ;;  %v5202_v51 = vld [vmem:[%s6741_s17 + $0x1] ss:$0 sm:$0xff]  ;;  %s6773_s17 = sld [smem:[#allocation41_spill]] }
 0xc9e   : > { %v2359_v54 = vmul.f32 %v6138_v7, %v2358_v53 }
 0xc9f   : > { %v2361_v55 = vpop.permute.xlu0 %2360  ;;  %2602 = vmatpush.msrb.mxu3 %v4965_v46 }
 0xca0   : > { %2381 = vmatpush.msra.mxu1 %v2361_v55 }
 0xca1   : > { %4947 = vmatmul.msk.f32.vlgmr.msra.gmra.mxu1 %vm1613_vm3, %v2359_v54 }
 0xca2   : > { %2566 = vmatpush.msrb.mxu1 %v4957_v33 }
 0xca4   : > { %2567 = vmatpush.msrb.mxu1 %v4956_v34 }
 0xca6   : > { %2568 = vmatpush.msrb.mxu1 %v4955_v35 }
 0xca8   : > { %2569 = vmatpush.msrb.mxu1 %v4954_v36 }
 0xcaa   : > { %v2304_v56 = vpop.f32.mrf.mxu2 }
 0xcab   : > { %2466 = vrot.lane.b32.xlu1 %v2304_v56, %s6758_s8  ;;  %v5203_v56 = vld [vmem:[%s6742_s10 + $0x1] ss:$0 sm:$0xff]  ;;  %s6770_s10 = sld [smem:[#allocation38_spill]] }
 0xcb2   : > { %v2462_v57 = vpop.f32.mrf.mxu2 }
 0xcb3   : > { %2474 = vrot.lane.b32.xlu2 %v2462_v57, %s6759_s13 }
 0xcba   : > { %v2707_v59 = vpop.f32.mrf.mxu2 }
 0xcbb   : > { %v6161_v60 = vadd.f32 %v5200_v58, %v2707_v59 }
 0xcbd   : > { %2716 = vrot.lane.b32.xlu1 %v6161_v60, %s6760_s14 }
 0xd0d   : > { %v2475_v6 = vpop.permute.xlu2 %2474 }
 0xd1d   : > { %v2467_v2 = vpop.permute.xlu1 %2466 }
 0xd1e   : > { %v2383_v1 = vpop.f32.mrf.mxu1  ;;  %v2477_v4 = vsel %vm1613_vm3, %v6129_v50, %v2467_v2 }
 0xd1f   : > { %2470 = vrot.lane.b32.xlu0 %v2383_v1, %s6761_s19 }
 0xd2f   : > { %v2717_v3 = vpop.permute.xlu1 %2716 }
 0xd30   : > { %4973 = vmatpush.xpose.msk.msra.mxu0 %vm1613_vm3, %v2717_v3 }
 0xd91   : > { %v2471_v5 = vpop.permute.xlu0 %2470 }
 0xd92   : > { %v2478_v7 = vsel %vm1939_vm7, %v2477_v4, %v2471_v5 }
 0xd93   : > { %v2479_v11 = vsel %vm1941_vm8, %v2478_v7, %v2475_v6 }
 0xd94   : > { %4951 = vmatmul.msk.f32.vlgmr.msrb.gmra.mxu0 %vm1581_vm2, %v2479_v11 }
 0xd9c   : > { %4974 = vmatmul.msk.f32.vlgmr.msra.gmra.mxu0 %vm1613_vm3, %v6161_v60 }
 0xe11   : > { %v2503_v12 = vpop.f32.mrf.mxu0 }
 0xe12   : > { %v2504_v13 = vadd.f32 %v5201_v9, %v2503_v12 }
 0xe14   : > { %v2506_v15 = vadd.f32 %v2504_v13, %v6092_v10 }
 0xe16   : > { %v2511_v16 = vsel %vm1581_vm2, %v2506_v15, 0.0 }
 0xe17   : > { %2512 = vadd.xlane.f32.xlu0 %v2511_v16  ;;  %v4964_v16 = vld [vmem:[%s6740_s1 + $0x60] sm:$0xff] }
 0xe18   : > { %2603 = vmatpush.msrb.mxu3 %v4964_v16 }
 0xe19   : > { %v2739_v50 = vpop.f32.mrf.mxu0 }
 0xe1a   : > { %v2742_v18 = vmul.f32 0.35355338, %v2739_v50  ;;  %v4963_v50 = vld [vmem:[%s6740_s1 + $0x58] sm:$0xff] }
 0xe1b   : > { %2604 = vmatpush.msrb.mxu3 %v4963_v50 }
 0xe1c   : > { %v2743_v19 = vadd.f32 %v2742_v18, %v6182_v17  ;;  %v4962_v18 = vld [vmem:[%s6740_s1 + $0x50] sm:$0xff] }
 0xe1d   : > { %2605 = vmatpush.msrb.mxu3 %v4962_v18 }
 0xe1e   : > { %v2744_v20 = vsel %vm1613_vm3, %v2743_v19, -inf }
 0xe1f   : > { %2745 = vmax.xlane.f32.xlu2 %v2744_v20  ;;  %v4960_v20 = vld [vmem:[%s6740_s1 + $0x40] sm:$0xff] }
 0xe2b   : > { %2794 = vrot.lane.b32.xlu0 %v6161_v60, %s6763_s24 }
 0xe37   : > { %2796 = vrot.lane.b32.xlu2 %v6161_v60, %s6748_s22 }
 0xe3f   : > { %2876 = vrot.lane.b32.xlu2 %v6161_v60, %s6751_s11 }
 0xe47   : > { %2954 = vrot.lane.b32.xlu2 %v6161_v60, %s6749_s0 }
 0xe8a   : > { %v2513_v10 = vpop.xlane.xlu0 %2512 }
 0xe8b   : > { %v2514_v21 = vmul.f32 %v2513_v10, %v6059_v8 }
 0xe8d   : > { %v2515_v22 = vsub.f32 %v2506_v15, %v2514_v21 }
 0xe8f   : > { %v2516_v23 = vmul.f32 %v2515_v22, %v2515_v22 }
 0xe91   : > { %v2517_v25 = vsel %vm1581_vm2, %v2516_v23, 0.0 }
 0xe92   : > { %2518 = vadd.xlane.f32.xlu1 %v2517_v25  ;;  %v2746_v26 = vpop.xlane.xlu2 %2745 }
 0xe93   : > { %v2747_v27 = vsub.f32 %v2743_v19, %v2746_v26  ;;  %v4961_v19 = vld [vmem:[%s6740_s1 + $0x48] sm:$0xff]  ;;  %s6766_s1 = sld [smem:[#allocation36_spill]] }
 0xe94   : > { %2606 = vmatpush.msrb.mxu3 %v4961_v19 }
 0xe95   : > { %v2748_v28 = vmul.f32 1.442695, %v2747_v27 }
 0xe96   : > { %2607 = vmatpush.msrb.mxu3 %v4960_v20 }
 0xe97   : > { %5276 = vpow2.f32 %v2748_v28 }
 0xe9a   : > { %v2797_v29 = vpop.permute.xlu2 %2796 }
 0xe9b   : > { %4976 = vmatpush.xpose.msk.msrb.mxu2 %vm1613_vm3, %v2797_v29 }
 0xe9d   : > { %v6197_v30 = vpop.eup %5276  ;;  %v2795_v31 = vpop.permute.xlu0 %2794 }
 0xe9e   : > { %4977 = vmatmul.msk.f32.vlgmr.msrb.gmra.mxu2 %vm1613_vm3, %v2795_v31  ;;  %v2750_v32 = vsel %vm1613_vm3, %v6197_v30, 0.0 }
 0xe9f   : > { %2751 = vadd.xlane.f32.xlu0 %v2750_v32 }
 0xea2   : > { %v2877_v58 = vpop.permute.xlu2 %2876 }
 0xeaa   : > { %v2955_v12 = vpop.permute.xlu2 %2954 }
 0xeab   : > { %2768 = vrot.lane.b32.xlu1 %v6161_v60, %s6764_s23 }
 0xeb3   : > { %2874 = vrot.lane.b32.xlu1 %v6161_v60, %s6750_s16  ;;  %2956 = vrot.lane.b32.xlu0 %v6161_v60, %s6765_s25 }
 0xf05   : > { %v2519_v37 = vpop.xlane.xlu1 %2518 }
 0xf06   : > { %v2520_v38 = vmul.f32 %v2519_v37, %v6059_v8 }
 0xf08   : > { %v2521_v39 = vadd.f32 1e-05, %v2520_v38 }
 0xf0a   : > { %5278 = vrsqrt.f32 %v2521_v39  ;;  %vm2528_vm14 = vweird.f32 %v2521_v39 }
 0xf10   : > { %v5279_v40 = vpop.eup %5278 }
 0xf11   : > { %v2523_v41 = vmul.f32 %v5279_v40, %v2521_v39  ;;  %vm2529_vm12 = vweird.f32 %v5279_v40 }
 0xf12   : > { %v2752_v42 = vpop.xlane.xlu0 %2751  ;;  %vm2530_vm15 = vmor %vm2528_vm14, %vm2529_vm12 }
 0xf13   : > { %v2524_v24 = vmul.f32 %v5279_v40, %v2523_v41  ;;  %5280 = vrcp.f32 %v2752_v42  ;;  %v2764_v62 = vand.u32 2147483648, %v2752_v42  ;;  %vm2758_vm4 = vweird.f32 %v2752_v42 }
 0xf14   : > { %v2762_v0 = vand.u32 2147483647, %v2752_v42 }
 0xf15   : > { %v2525_v47 = vmul.f32 0.5, %v2524_v24  ;;  %v2765_v5 = vor.u32 1.1754944e-38, %v2764_v62  ;;  %v5205_v62 = vld [vmem:[%s6744_s2 + $0x1] ss:$0 sm:$0xff]  ;;  %s6767_s2 = sld [smem:[#allocation37_spill]] }
 0xf16   : > { %vm2763_vm6 = vcmp.eq.f32.partialorder %v2762_v0, 8.507059e+37 }
 0xf17   : > { %v2526_v14 = vsub.f32 1.5, %v2525_v47 }
 0xf19   : > { %v5281_v48 = vpop.eup %5280  ;;  %v2527_v49 = vmul.f32 %v5279_v40, %v2526_v14 }
 0xf1a   : > { %v2754_v52 = vmul.f32 %v5281_v48, %v2752_v42  ;;  %vm2759_vm0 = vweird.f32 %v5281_v48 }
 0xf1b   : > { %v2531_v53 = vsel %vm2530_vm15, %v5279_v40, %v2527_v49  ;;  %vm2760_vm5 = vmor %vm2758_vm4, %vm2759_vm0 }
 0xf1c   : > { %v2532_v54 = vmul.f32 %v2531_v53, %v2515_v22  ;;  %v2755_v55 = vsub.f32 1.0, %v2754_v52  ;;  %v5204_v22 = vld [vmem:[%s6743_s18 + $0x1] ss:$0 sm:$0xff]  ;;  %s6774_s18 = sld [smem:[#allocation45_spill]] }
 0xf1d   : > { %v2769_v57 = vpop.permute.xlu1 %2768 }
 0xf1e   : > { %v2536_v59 = vmul.f32 %v5202_v51, %v2532_v54  ;;  %v2756_v61 = vmul.f32 %v5281_v48, %v2755_v55  ;;  %2789 = vmatpush.msra.mxu1 %v2769_v57 }
 0xf20   : > { %v2757_v63 = vadd.f32 %v5281_v48, %v2756_v61  ;;  %v6218_v1 = vadd.f32 %v5203_v56, %v2536_v59 }
 0xf21   : > { %v2819_v2 = vpop.f32.mrf.mxu2 }
 0xf22   : > { %v2761_v3 = vsel %vm2760_vm5, %v5281_v48, %v2757_v63  ;;  %v2822_v4 = vmul.f32 0.35355338, %v2819_v2  ;;  %4959 = vmatmul.msk.f32.vlgmr.msrb.gmra.mxu1 %vm1581_vm2, %v6218_v1 }
 0xf23   : > { %4979 = vmatpush.xpose.msk.msrb.mxu1 %vm1613_vm3, %v2877_v58  ;;  %v2766_v7 = vsel %vm2763_vm6, %v2765_v5, %v2761_v3 }
 0xf24   : > { %v2823_v6 = vadd.f32 %v2822_v4, %v6182_v17  ;;  %v2767_v13 = vmul.f32 %v6197_v30, %v2766_v7 }
 0xf25   : > { %v2957_v11 = vpop.permute.xlu0 %2956  ;;  %v2875_v15 = vpop.permute.xlu1 %2874 }
 0xf26   : > { %4982 = vmatpush.xpose.msk.msra.mxu2 %vm1613_vm3, %v2957_v11  ;;  %v2824_v9 = vsel %vm1613_vm3, %v2823_v6, -inf }
 0xf27   : > { %2825 = vmax.xlane.f32.xlu0 %v2824_v9 }
 0xf29   : > { %4983 = vmatmul.msk.f32.vlgmr.msra.gmra.mxu2 %vm1613_vm3, %v2955_v12 }
 0xf2a   : > { %4975 = vmatmul.msk.f32.vlgmr.msra.gmra.mxu1 %vm1613_vm3, %v2767_v13 }
 0xf32   : > { %4980 = vmatmul.msk.f32.vlgmr.msrb.gmra.mxu1 %vm1613_vm3, %v2875_v15 }
 0xf9a   : > { %v2826_v10 = vpop.xlane.xlu0 %2825 }
 0xf9b   : > { %v2827_v21 = vsub.f32 %v2823_v6, %v2826_v10 }
 0xf9d   : > { %v2828_v23 = vmul.f32 1.442695, %v2827_v21 }
 0xf9f   : > { %5282 = vpow2.f32 %v2828_v23  ;;  %v2571_v25 = vpop.f32.mrf.mxu1 }
 0xfa0   : > { %v2572_v26 = vadd.f32 %v5204_v22, %v2571_v25 }
 0xfa2   : > { %v2574_v27 = vmax.f32 %v2572_v26, 0.0 }
 0xfa4   : > { %4969 = vmatmul.msk.f32.vlgmr.msrb.gmra.mxu3 %vm2053_vm13, %v2574_v27 }
 0xfa5   : > { %v5283_v28 = vpop.eup %5282 }
 0xfa6   : > { %v2830_v29 = vsel %vm1613_vm3, %v5283_v28, 0.0 }
 0xfa7   : > { %2831 = vadd.xlane.f32.xlu0 %v2830_v29  ;;  %v6238_v30 = vpop.f32.mrf.mxu1 }
 0xfac   : > { %v2979_v31 = vpop.f32.mrf.mxu2 }
 0xfad   : > { %v2982_v32 = vmul.f32 0.35355338, %v2979_v31 }
 0xfaf   : > { %v2899_v33 = vpop.f32.mrf.mxu1  ;;  %v2983_v34 = vadd.f32 %v2982_v32, %v6182_v17 }
 0xfb0   : > { %v2902_v35 = vmul.f32 0.35355338, %v2899_v33 }
 0xfb1   : > { %v2984_v36 = vsel %vm1613_vm3, %v2983_v34, -inf }
 0xfb2   : > { %2985 = vmax.xlane.f32.xlu2 %v2984_v36  ;;  %v2903_v37 = vadd.f32 %v2902_v35, %v6182_v17 }
 0xfb4   : > { %v2904_v38 = vsel %vm1613_vm3, %v2903_v37, -inf }
 0xfb5   : > { %2905 = vmax.xlane.f32.xlu1 %v2904_v38 }
 0xfbb   : > { %2848 = vrot.lane.b32.xlu0 %v6161_v60, %s6752_s15 }
0x101a   : > { %v2832_v39 = vpop.xlane.xlu0 %2831 }
0x101b   : > { %5284 = vrcp.f32 %v2832_v39  ;;  %v2844_v44 = vand.u32 2147483648, %v2832_v39  ;;  %v2842_v46 = vand.u32 2147483647, %v2832_v39  ;;  %vm2838_vm10 = vweird.f32 %v2832_v39 }
0x101d   : > { %v2845_v49 = vor.u32 1.1754944e-38, %v2844_v44  ;;  %vm2843_vm12 = vcmp.eq.f32.partialorder %v2842_v46, 8.507059e+37  ;;  %v2710_v44 = vld [vmem:[%s6766_s1] sm:$0xff] }
0x1021   : > { %v5285_v40 = vpop.eup %5284 }
0x1022   : > { %v2834_v41 = vmul.f32 %v5285_v40, %v2832_v39  ;;  %vm2839_vm9 = vweird.f32 %v5285_v40 }
0x1023   : > { %vm2840_vm11 = vmor %vm2838_vm10, %vm2839_vm9 }
0x1024   : > { %v2835_v42 = vsub.f32 1.0, %v2834_v41  ;;  %v2712_v41 = vld [vmem:[%s6766_s1 + $0x10] sm:$0xff] }
0x1025   : > { %v2986_v45 = vpop.xlane.xlu2 %2985 }
0x1026   : > { %v2836_v24 = vmul.f32 %v5285_v40, %v2835_v42  ;;  %v2987_v47 = vsub.f32 %v2983_v34, %v2986_v45  ;;  %v2711_v42 = vld [vmem:[%s6766_s1 + $0x8] sm:$0xff] }
0x1027   : > { %v2609_v63 = vpop.f32.mrf.mxu3 }
0x1028   : > { %v2837_v14 = vadd.f32 %v5285_v40, %v2836_v24  ;;  %v2988_v17 = vmul.f32 1.442695, %v2987_v47  ;;  %v2906_v48 = vpop.xlane.xlu1 %2905  ;;  %v2610_v0 = vadd.f32 %v5205_v62, %v2609_v63 }
0x1029   : > { %v2907_v51 = vsub.f32 %v2903_v37, %v2906_v48 }
0x102a   : > { %v2841_v52 = vsel %vm2840_vm11, %v5285_v40, %v2837_v14  ;;  %5286 = vpow2.f32 %v2988_v17  ;;  %v2612_v2 = vadd.f32 %v2610_v0, %v6218_v1  ;;  %v2713_v40 = vld [vmem:[%s6766_s1 + $0x18] sm:$0xff] }
0x102b   : > { %v2846_v53 = vsel %vm2843_vm12, %v2845_v49, %v2841_v52  ;;  %v2908_v54 = vmul.f32 1.442695, %v2907_v51  ;;  %3067 = vmatpush.msra.mxu1 %v2713_v40  ;;  %v3108_v40 = vld [vmem:[#allocation4] sm:$0xff] }
0x102c   : > { %v2847_v55 = vmul.f32 %v5283_v28, %v2846_v53  ;;  %v2617_v3 = vsel %vm1581_vm2, %v2612_v2, 0.0 }
0x102d   : > { %5288 = vpow2.f32 %v2908_v54  ;;  %v2849_v56 = vpop.permute.xlu0 %2848  ;;  %3068 = vmatpush.msra.mxu1 %v2712_v41 }
0x102e   : > { %2869 = vmatpush.msrb.mxu0 %v2849_v56 }
0x102f   : > { %4978 = vmatmul.msk.f32.vlgmr.msrb.gmra.mxu0 %vm1613_vm3, %v2847_v55  ;;  %3069 = vmatpush.msra.mxu1 %v2711_v42 }
0x1030   : > { %v5287_v57 = vpop.eup %5286 }
0x1031   : > { %v2990_v58 = vsel %vm1613_vm3, %v5287_v57, 0.0  ;;  %3070 = vmatpush.msra.mxu1 %v2710_v44 }
0x1032   : > { %2991 = vadd.xlane.f32.xlu1 %v2990_v58 }
0x1033   : > { %v5289_v59 = vpop.eup %5288 }
0x1034   : > { %v2910_v61 = vsel %vm1613_vm3, %v5289_v59, 0.0 }
0x1035   : > { %2911 = vadd.xlane.f32.xlu2 %v2910_v61  ;;  %v5207_v61 = vld [vmem:[%s6747_s28 + $0x1] ss:$0 sm:$0xff]  ;;  %s6775_s28 = sld [smem:[#allocation50_spill]] }
0x104b   : > { %3008 = vrot.lane.b32.xlu1 %v6161_v60, %s6753_s3 }
0x104d   : > { %2928 = vrot.lane.b32.xlu2 %v6161_v60, %s6756_s9 }
0x1075   : > { %2618 = vadd.xlane.f32.xlu1 %v2617_v3 }
0x10a5   : > { %v2992_v4 = vpop.xlane.xlu1 %2991 }
0x10a6   : > { %5290 = vrcp.f32 %v2992_v4  ;;  %v3004_v18 = vand.u32 2147483648, %v2992_v4  ;;  %vm2998_vm0 = vweird.f32 %v2992_v4  ;;  %v3002_v10 = vand.u32 2147483647, %v2992_v4 }
0x10a8   : > { %v2912_v5 = vpop.xlane.xlu2 %2911  ;;  %v3005_v25 = vor.u32 1.1754944e-38, %v3004_v18  ;;  %vm3003_vm10 = vcmp.eq.f32.partialorder %v3002_v10, 8.507059e+37  ;;  %v3141_v18 = vld [vmem:[#allocation6 + $0x10] sm:$0xff] }
0x10a9   : > { %5292 = vrcp.f32 %v2912_v5  ;;  %v2924_v50 = vand.u32 2147483648, %v2912_v5  ;;  %v2922_v20 = vand.u32 2147483647, %v2912_v5  ;;  %vm2918_vm5 = vweird.f32 %v2912_v5 }
0x10ab   : > { %v2925_v23 = vor.u32 1.1754944e-38, %v2924_v50  ;;  %vm2923_vm9 = vcmp.eq.f32.partialorder %v2922_v20, 8.507059e+37  ;;  %v3139_v20 = vld [vmem:[#allocation6] sm:$0xff] }
0x10ac   : > { %v5291_v6 = vpop.eup %5290  ;;  %v2871_v7 = vpop.f32.mrf.mxu0 }
0x10ad   : > { %v2994_v11 = vmul.f32 %v5291_v6, %v2992_v4  ;;  %3035 = vrot.lane.b32.xlu0 %v2871_v7, %s6758_s8  ;;  %vm2999_vm14 = vweird.f32 %v5291_v6 }
0x10ae   : > { %vm3000_vm4 = vmor %vm2998_vm0, %vm2999_vm14 }
0x10af   : > { %v5293_v9 = vpop.eup %5292  ;;  %v2995_v12 = vsub.f32 1.0, %v2994_v11 }
0x10b0   : > { %v2914_v60 = vmul.f32 %v5293_v9, %v2912_v5  ;;  %v2929_v13 = vpop.permute.xlu2 %2928  ;;  %vm2919_vm15 = vweird.f32 %v5293_v9 }
0x10b1   : > { %v2996_v15 = vmul.f32 %v5291_v6, %v2995_v12  ;;  %2949 = vmatpush.msra.mxu3 %v2929_v13  ;;  %vm2920_vm6 = vmor %vm2918_vm5, %vm2919_vm15 }
0x10b2   : > { %v2915_v16 = vsub.f32 1.0, %v2914_v60 }
0x10b3   : > { %v2997_v1 = vadd.f32 %v5291_v6, %v2996_v15 }
0x10b4   : > { %v2916_v19 = vmul.f32 %v5293_v9, %v2915_v16 }
0x10b5   : > { %v3001_v22 = vsel %vm3000_vm4, %v5291_v6, %v2997_v1 }
0x10b6   : > { %v2917_v21 = vadd.f32 %v5293_v9, %v2916_v19  ;;  %v3006_v28 = vsel %vm3003_vm10, %v3005_v25, %v3001_v22  ;;  %v3140_v19 = vld [vmem:[#allocation6 + $0x8] sm:$0xff] }
0x10b7   : > { %v3007_v32 = vmul.f32 %v5287_v57, %v3006_v28  ;;  %v5206_v57 = vld [vmem:[%s6746_s6 + $0x1] ss:$0 sm:$0xff]  ;;  %s6768_s6 = sld [smem:[#allocation54_spill]] }
0x10b8   : > { %v2921_v26 = vsel %vm2920_vm6, %v5293_v9, %v2917_v21 }
0x10b9   : > { %v2926_v27 = vsel %vm2923_vm9, %v2925_v23, %v2921_v26 }
0x10ba   : > { %v2927_v29 = vmul.f32 %v5289_v59, %v2926_v27 }
0x10bc   : > { %4981 = vmatmul.msk.f32.vlgmr.msra.gmra.mxu3 %vm1613_vm3, %v2927_v29 }
0x10bd   : > { %v3009_v31 = vpop.permute.xlu1 %3008 }
0x10be   : > { %3029 = vmatpush.msra.mxu0 %v3009_v31  ;;  %v5209_v31 = vld [vmem:[%s6768_s6] ss:$0 sm:$0xff]  ;;  %s6771_s6 = sld [smem:[#allocation39_spill]] }
0x10bf   : > { %4984 = vmatmul.msk.f32.vlgmr.msra.gmra.mxu0 %vm1613_vm3, %v3007_v32 }
0x10e8   : > { %v2619_v35 = vpop.xlane.xlu1 %2618 }
0x10e9   : > { %v2620_v36 = vmul.f32 %v2619_v35, %v6059_v8 }
0x10eb   : > { %v2621_v37 = vsub.f32 %v2612_v2, %v2620_v36  ;;  %v5208_v2 = vld [vmem:[%s6767_s2] ss:$0 sm:$0xff] }
0x10ed   : > { %v2622_v38 = vmul.f32 %v2621_v37, %v2621_v37 }
0x10ef   : > { %v2623_v39 = vsel %vm1581_vm2, %v2622_v38, 0.0  ;;  %v3110_v38 = vld [vmem:[#allocation4 + $0x10] sm:$0xff] }
0x111f   : > { %v3036_v45 = vpop.permute.xlu0 %3035 }
0x1120   : > { %v3046_v46 = vsel %vm1613_vm3, %v6238_v30, %v3036_v45 }
0x113c   : > { %v3031_v33 = vpop.f32.mrf.mxu0 }
0x113d   : > { %3043 = vrot.lane.b32.xlu0 %v3031_v33, %s6759_s13 }
0x113f   : > { %v2951_v34 = vpop.f32.mrf.mxu3 }
0x1140   : > { %3039 = vrot.lane.b32.xlu2 %v2951_v34, %s6761_s19  ;;  %v5210_v34 = vld [vmem:[%s6769_s7] ss:$0 sm:$0xff]  ;;  %s6772_s7 = sld [smem:[#allocation43_spill]] }
0x1169   : > { %2624 = vadd.xlane.f32.xlu2 %v2623_v39  ;;  %v3109_v39 = vld [vmem:[#allocation4 + $0x8] sm:$0xff] }
0x119a   : > { %v3040_v24 = vpop.permute.xlu2 %3039 }
0x119b   : > { %v3047_v47 = vsel %vm1939_vm7, %v3046_v46, %v3040_v24 }
0x11af   : > { %v3044_v14 = vpop.permute.xlu0 %3043 }
0x11b0   : > { %v3048_v17 = vsel %vm1941_vm8, %v3047_v47, %v3044_v14 }
0x11b1   : > { %4985 = vmatmul.msk.f32.vlgmr.msra.gmra.mxu1 %vm1581_vm2, %v3048_v17 }
0x11dc   : > { %v2625_v48 = vpop.xlane.xlu2 %2624 }
0x11dd   : > { %v2626_v49 = vmul.f32 %v2625_v48, %v6059_v8  ;;  %v5211_v48 = vld [vmem:[%s6770_s10] ss:$0 sm:$0xff] }
0x11df   : > { %v2627_v51 = vadd.f32 1e-05, %v2626_v49 }
0x11e1   : > { %5294 = vrsqrt.f32 %v2627_v51  ;;  %vm2634_vm12 = vweird.f32 %v2627_v51 }
0x11e7   : > { %v5295_v52 = vpop.eup %5294 }
0x11e8   : > { %v2629_v53 = vmul.f32 %v5295_v52, %v2627_v51  ;;  %vm2635_vm11 = vweird.f32 %v5295_v52 }
0x11e9   : > { %vm2636_vm14 = vmor %vm2634_vm12, %vm2635_vm11 }
0x11ea   : > { %v2630_v54 = vmul.f32 %v5295_v52, %v2629_v53 }
0x11ec   : > { %v2631_v55 = vmul.f32 0.5, %v2630_v54 }
0x11ee   : > { %v2632_v30 = vsub.f32 1.5, %v2631_v55  ;;  %v5213_v55 = vld [vmem:[%s6772_s7] ss:$0 sm:$0xff] }
0x11f0   : > { %v2633_v56 = vmul.f32 %v5295_v52, %v2632_v30 }
0x11f2   : > { %v2637_v58 = vsel %vm2636_vm14, %v5295_v52, %v2633_v56  ;;  %v5212_v52 = vld [vmem:[%s6771_s6] ss:$0 sm:$0xff] }
0x11f3   : > { %v2638_v59 = vmul.f32 %v2637_v58, %v2621_v37  ;;  %v3111_v37 = vld [vmem:[#allocation4 + $0x18] sm:$0xff] }
0x11f4   : > { %3131 = vmatpush.msrb.mxu3 %v3111_v37 }
0x11f5   : > { %v2642_v62 = vmul.f32 %v5206_v57, %v2638_v59  ;;  %v5214_v57 = vld [vmem:[%s6773_s17] ss:$0 sm:$0xff] }
0x11f6   : > { %3132 = vmatpush.msrb.mxu3 %v3110_v38 }
0x11f7   : > { %v2646_v63 = vadd.f32 %v5207_v61, %v2642_v62 }
0x11f8   : > { %3133 = vmatpush.msrb.mxu3 %v3109_v39 }
0x11f9   : > { %v2649_v0 = vsel %vm1581_vm2, %v2646_v63, 0.0 }
0x11fa   : > { %2650 = vadd.xlane.f32.xlu0 %v2649_v0  ;;  %3134 = vmatpush.msrb.mxu3 %v3108_v40 }
0x122e   : > { %v3072_v3 = vpop.f32.mrf.mxu1 }
0x122f   : > { %v3073_v4 = vadd.f32 %v5208_v2, %v3072_v3 }
0x1231   : > { %v3075_v5 = vadd.f32 %v3073_v4, %v6152_v43  ;;  %v3142_v43 = vld [vmem:[#allocation6 + $0x18] sm:$0xff] }
0x1232   : > { %3162 = vmatpush.msrb.mxu2 %v3142_v43 }
0x1233   : > { %v3078_v6 = vsel %vm1581_vm2, %v3075_v5, 0.0 }
0x1234   : > { %3079 = vadd.xlane.f32.xlu1 %v3078_v6  ;;  %3163 = vmatpush.msrb.mxu2 %v3141_v18 }
0x1236   : > { %3164 = vmatpush.msrb.mxu2 %v3140_v19 }
0x1238   : > { %3165 = vmatpush.msrb.mxu2 %v3139_v20 }
0x126d   : > { %v2651_v7 = vpop.xlane.xlu0 %2650 }
0x126e   : > { %v2652_v11 = vmul.f32 %v2651_v7, %v6059_v8 }
0x1270   : > { %v2653_v9 = vsub.f32 %v2646_v63, %v2652_v11 }
0x1272   : > { %v2654_v12 = vmul.f32 %v2653_v9, %v2653_v9 }
0x1274   : > { %v2655_v60 = vsel %vm1581_vm2, %v2654_v12, 0.0 }
0x1275   : > { %2656 = vadd.xlane.f32.xlu2 %v2655_v60 }
0x12a7   : > { %v3080_v13 = vpop.xlane.xlu1 %3079 }
0x12a8   : > { %v3081_v15 = vmul.f32 %v3080_v13, %v6059_v8 }
0x12aa   : > { %v3082_v16 = vsub.f32 %v3075_v5, %v3081_v15 }
0x12ac   : > { %v3083_v1 = vmul.f32 %v3082_v16, %v3082_v16 }
0x12ae   : > { %v3084_v50 = vsel %vm1581_vm2, %v3083_v1, 0.0 }
0x12af   : > { %3085 = vadd.xlane.f32.xlu0 %v3084_v50 }
0x12e8   : > { %v2657_v10 = vpop.xlane.xlu2 %2656 }
0x12e9   : > { %v2658_v21 = vmul.f32 %v2657_v10, %v6059_v8 }
0x12eb   : > { %v2659_v22 = vadd.f32 1e-05, %v2658_v21 }
0x12ed   : > { %5296 = vrsqrt.f32 %v2659_v22  ;;  %vm2666_vm0 = vweird.f32 %v2659_v22 }
0x12f3   : > { %v5297_v23 = vpop.eup %5296 }
0x12f4   : > { %v2661_v25 = vmul.f32 %v5297_v23, %v2659_v22  ;;  %vm2667_vm15 = vweird.f32 %v5297_v23 }
0x12f5   : > { %vm2668_vm4 = vmor %vm2666_vm0, %vm2667_vm15 }
0x12f6   : > { %v2662_v26 = vmul.f32 %v5297_v23, %v2661_v25 }
0x12f8   : > { %v2663_v27 = vmul.f32 0.5, %v2662_v26 }
0x12fa   : > { %v2664_v28 = vsub.f32 1.5, %v2663_v27 }
0x12fc   : > { %v2665_v29 = vmul.f32 %v5297_v23, %v2664_v28 }
0x12fe   : > { %v2669_v32 = vsel %vm2668_vm4, %v5297_v23, %v2665_v29 }
0x12ff   : > { %v2670_v33 = vmul.f32 %v2669_v32, %v2653_v9 }
0x1301   : > { %v2674_v35 = vmul.f32 %v5209_v31, %v2670_v33 }
0x1303   : > { %v6286_v36 = vadd.f32 %v5210_v34, %v2674_v35 }
0x1305   : > { %4987 = vmatmul.msk.f32.vlgmr.msrb.gmra.mxu2 %vm1581_vm2, %v6286_v36 }
0x1322   : > { %v3086_v41 = vpop.xlane.xlu0 %3085 }
0x1323   : > { %v3087_v42 = vmul.f32 %v3086_v41, %v6059_v8 }
0x1325   : > { %v3088_v44 = vadd.f32 1e-05, %v3087_v42 }
0x1327   : > { %5298 = vrsqrt.f32 %v3088_v44  ;;  %vm3095_vm6 = vweird.f32 %v3088_v44 }
0x132d   : > { %v5299_v45 = vpop.eup %5298 }
0x132e   : > { %v3090_v24 = vmul.f32 %v5299_v45, %v3088_v44  ;;  %vm3096_vm5 = vweird.f32 %v5299_v45 }
0x132f   : > { %vm3097_vm9 = vmor %vm3095_vm6, %vm3096_vm5 }
0x1330   : > { %v3091_v46 = vmul.f32 %v5299_v45, %v3090_v24 }
0x1332   : > { %v3092_v47 = vmul.f32 0.5, %v3091_v46 }
0x1334   : > { %v3093_v14 = vsub.f32 1.5, %v3092_v47 }
0x1336   : > { %v3094_v17 = vmul.f32 %v5299_v45, %v3093_v14 }
0x1338   : > { %v3098_v49 = vsel %vm3097_vm9, %v5299_v45, %v3094_v17 }
0x1339   : > { %v3099_v51 = vmul.f32 %v3098_v49, %v3082_v16 }
0x133b   : > { %v3103_v53 = vmul.f32 %v5211_v48, %v3099_v51 }
0x133d   : > { %v6293_v54 = vadd.f32 %v5212_v52, %v3103_v53 }
0x133f   : > { %4986 = vmatmul.msk.f32.vlgmr.msrb.gmra.mxu3 %vm1581_vm2, %v6293_v54 }
0x1388   : > { %v3167_v30 = vpop.f32.mrf.mxu2 }
0x1389   : > { %v6298_v56 = vadd.f32 %v5213_v55, %v3167_v30 }
0x138b   : > { %3254 = vrot.lane.b32.xlu1 %v6298_v56, %s6763_s24  ;;  %4988 = vmatpush.xpose.msk.msrb.mxu0 %vm1613_vm3, %v6298_v56 }
0x138c   : > { %3412 = vrot.lane.b32.xlu0 %v6298_v56, %s6749_s0 }
0x1394   : > { %3333 = vrot.lane.b32.xlu0 %v6298_v56, %s6750_s16 }
0x13c2   : > { %v3136_v58 = vpop.f32.mrf.mxu3 }
0x13c3   : > { %v3137_v59 = vadd.f32 %v5214_v57, %v3136_v58 }
0x13c5   : > { %3410 = vrot.lane.b32.xlu1 %v3137_v59, %s6749_s0  ;;  %3252 = vrot.lane.b32.xlu2 %v3137_v59, %s6763_s24 }
0x13c6   : > { %4989 = vmatmul.msk.f32.vlgmr.msrb.gmra.mxu0 %vm1613_vm3, %v3137_v59 }
0x13cd   : > { %3331 = vrot.lane.b32.xlu2 %v3137_v59, %s6750_s16 }
0x13fd   : > { %v3255_v61 = vpop.permute.xlu1 %3254 }
0x13fe   : > { %v3413_v62 = vpop.permute.xlu0 %3412  ;;  %4991 = vmatpush.xpose.msk.msra.mxu3 %vm1613_vm3, %v3255_v61 }
0x1402   : > { %4997 = vmatpush.xpose.msk.msrb.mxu3 %vm1613_vm3, %v3413_v62 }
0x1406   : > { %v3334_v63 = vpop.permute.xlu0 %3333 }
0x1407   : > { %4994 = vmatpush.xpose.msk.msra.mxu0 %vm1613_vm3, %v3334_v63 }
0x141f   : > { %v3253_v0 = vpop.permute.xlu2 %3252 }
0x1420   : > { %4992 = vmatmul.msk.f32.vlgmr.msra.gmra.mxu3 %vm1613_vm3, %v3253_v0 }
0x1427   : > { %v3332_v2 = vpop.permute.xlu2 %3331 }
0x1428   : > { %4995 = vmatmul.msk.f32.vlgmr.msra.gmra.mxu0 %vm1613_vm3, %v3332_v2 }
0x1437   : > { %v3411_v3 = vpop.permute.xlu1 %3410 }
0x1438   : > { %4998 = vmatmul.msk.f32.vlgmr.msrb.gmra.mxu3 %vm1613_vm3, %v3411_v3 }
0x1443   : > { %v3198_v4 = vpop.f32.mrf.mxu0 }
0x1444   : > { %v3201_v5 = vmul.f32 0.35355338, %v3198_v4 }
0x1446   : > { %v3202_v6 = vsel %vm1613_vm3, %v3201_v5, -inf }
0x1447   : > { %3203 = vmax.xlane.f32.xlu0 %v3202_v6 }
0x14a3   : > { %v3277_v7 = vpop.f32.mrf.mxu3 }
0x14a4   : > { %v3280_v11 = vmul.f32 0.35355338, %v3277_v7 }
0x14a5   : > { %v3356_v12 = vpop.f32.mrf.mxu0 }
0x14a6   : > { %v3281_v9 = vsel %vm1613_vm3, %v3280_v11, -inf  ;;  %v3359_v60 = vmul.f32 0.35355338, %v3356_v12 }
0x14a7   : > { %3282 = vmax.xlane.f32.xlu1 %v3281_v9 }
0x14a8   : > { %v3360_v13 = vsel %vm1613_vm3, %v3359_v60, -inf }
0x14af   : > { %3361 = vmax.xlane.f32.xlu1 %v3360_v13 }
0x14ba   : > { %v3204_v15 = vpop.xlane.xlu0 %3203 }
0x14bb   : > { %v3205_v16 = vsub.f32 %v3201_v5, %v3204_v15  ;;  %v3435_v1 = vpop.f32.mrf.mxu3 }
0x14bc   : > { %v3438_v50 = vmul.f32 0.35355338, %v3435_v1 }
0x14bd   : > { %v3206_v43 = vmul.f32 1.442695, %v3205_v16 }
0x14be   : > { %v3439_v18 = vsel %vm1613_vm3, %v3438_v50, -inf }
0x14bf   : > { %5300 = vpow2.f32 %v3206_v43  ;;  %3440 = vmax.xlane.f32.xlu2 %v3439_v18 }
0x14c5   : > { %v6323_v19 = vpop.eup %5300 }
0x14c6   : > { %v3208_v20 = vsel %vm1613_vm3, %v6323_v19, 0.0 }
0x14c7   : > { %3209 = vadd.xlane.f32.xlu2 %v3208_v20 }
0x14df   : > { %3305 = vrot.lane.b32.xlu2 %v6298_v56, %s6748_s22 }
0x14e7   : > { %3384 = vrot.lane.b32.xlu2 %v6298_v56, %s6751_s11 }
0x151a   : > { %v3283_v10 = vpop.xlane.xlu1 %3282 }
0x151b   : > { %v3284_v23 = vsub.f32 %v3280_v11, %v3283_v10 }
0x151d   : > { %v3285_v26 = vmul.f32 1.442695, %v3284_v23 }
0x1522   : > { %v3362_v21 = vpop.xlane.xlu1 %3361 }
0x1523   : > { %v3363_v22 = vsub.f32 %v3359_v60, %v3362_v21 }
0x1525   : > { %v3364_v25 = vmul.f32 1.442695, %v3363_v22 }
0x1527   : > { %5302 = vpow2.f32 %v3364_v25 }
0x1528   : > { %5304 = vpow2.f32 %v3285_v26 }
0x152d   : > { %v6331_v27 = vpop.eup %5302 }
0x152e   : > { %v3366_v28 = vsel %vm1613_vm3, %v6331_v27, 0.0  ;;  %v5305_v31 = vpop.eup %5304 }
0x152f   : > { %3367 = vadd.xlane.f32.xlu0 %v3366_v28  ;;  %v3287_v34 = vsel %vm1613_vm3, %v5305_v31, 0.0 }
0x1532   : > { %v3441_v29 = vpop.xlane.xlu2 %3440 }
0x1533   : > { %v3442_v32 = vsub.f32 %v3438_v50, %v3441_v29 }
0x1535   : > { %v3443_v33 = vmul.f32 1.442695, %v3442_v32 }
0x1537   : > { %5306 = vpow2.f32 %v3443_v33  ;;  %3288 = vadd.xlane.f32.xlu0 %v3287_v34  ;;  %v3173_v33 = vld [vmem:[#allocation7 + $0x18] sm:$0xff]  ;;  %v3172_v34 = vld [vmem:[#allocation7 + $0x10] sm:$0xff] }
0x1538   : > { %3522 = vmatpush.msrb.mxu0 %v3173_v33  ;;  %v5005_v33 = vld [vmem:[%s6754_s5 + $0x30] sm:$0xff] }
0x153a   : > { %v6336_v35 = vpop.xlane.xlu2 %3209  ;;  %3523 = vmatpush.msrb.mxu0 %v3172_v34  ;;  %v5004_v34 = vld [vmem:[%s6754_s5 + $0x28] sm:$0xff] }
0x153b   : > { %5308 = vrcp.f32 %v6336_v35  ;;  %v3222_v7 = vand.u32 2147483648, %v6336_v35  ;;  %vm3216_vm6 = vweird.f32 %v6336_v35  ;;  %v3220_v9 = vand.u32 2147483647, %v6336_v35 }
0x153d   : > { %v5307_v37 = vpop.eup %5306  ;;  %v3223_v1 = vor.u32 1.1754944e-38, %v3222_v7  ;;  %v5216_v7 = vld [vmem:[%s6776_s29] ss:$0 sm:$0xff] }
0x153e   : > { %v3445_v38 = vsel %vm1613_vm3, %v5307_v37, 0.0 }
0x153f   : > { %3446 = vadd.xlane.f32.xlu1 %v3445_v38 }
0x1541   : > { %v5309_v42 = vpop.eup %5308 }
0x1542   : > { %v3306_v39 = vpop.permute.xlu2 %3305  ;;  %v3212_v46 = vmul.f32 %v5309_v42, %v6336_v35  ;;  %vm3217_vm0 = vweird.f32 %v5309_v42  ;;  %v3171_v35 = vld [vmem:[#allocation7 + $0x8] sm:$0xff] }
0x1543   : > { %3326 = vmatpush.msra.mxu2 %v3306_v39  ;;  %3524 = vmatpush.msrb.mxu0 %v3171_v35  ;;  %v5003_v35 = vld [vmem:[%s6754_s5 + $0x20] sm:$0xff] }
0x1544   : > { %v3213_v51 = vsub.f32 1.0, %v3212_v46 }
0x1546   : > { %v3214_v58 = vmul.f32 %v5309_v42, %v3213_v51 }
0x1548   : > { %v3215_v4 = vadd.f32 %v5309_v42, %v3214_v58 }
0x154a   : > { %v3385_v22 = vpop.permute.xlu2 %3384 }
0x154b   : > { %3463 = vrot.lane.b32.xlu0 %v6298_v56, %s6765_s25 }
0x1558   : > { %3226 = vrot.lane.b32.xlu1 %v6298_v56, %s6760_s14 }
0x15a2   : > { %v6343_v40 = vpop.xlane.xlu0 %3367 }
0x15a3   : > { %v3380_v18 = vand.u32 2147483648, %v6343_v40  ;;  %v3378_v20 = vand.u32 2147483647, %v6343_v40 }
0x15a5   : > { %v3381_v25 = vor.u32 1.1754944e-38, %v3380_v18 }
0x15aa   : > { %v3289_v41 = vpop.xlane.xlu0 %3288 }
0x15ab   : > { %5310 = vrcp.f32 %v3289_v41  ;;  %v3301_v14 = vand.u32 2147483648, %v3289_v41  ;;  %v3299_v48 = vand.u32 2147483647, %v3289_v41  ;;  %vm3295_vm11 = vweird.f32 %v3289_v41 }
0x15ac   : > { %5312 = vrcp.f32 %v6343_v40 }
0x15ad   : > { %v3302_v55 = vor.u32 1.1754944e-38, %v3301_v14  ;;  %vm3300_vm14 = vcmp.eq.f32.partialorder %v3299_v48, 8.507059e+37 }
0x15b1   : > { %v5311_v44 = vpop.eup %5310 }
0x15b2   : > { %v3291_v45 = vmul.f32 %v5311_v44, %v3289_v41  ;;  %v3447_v24 = vpop.xlane.xlu1 %3446  ;;  %vm3296_vm10 = vweird.f32 %v5311_v44  ;;  %v5313_v49 = vpop.eup %5312 }
0x15b3   : > { %5314 = vrcp.f32 %v3447_v24  ;;  %vm3297_vm12 = vmor %vm3295_vm11, %vm3296_vm10  ;;  %v3370_v59 = vmul.f32 %v5313_v49, %v6343_v40  ;;  %v3459_v63 = vand.u32 2147483648, %v3447_v24  ;;  %v3457_v3 = vand.u32 2147483647, %v3447_v24 }
0x15b4   : > { %v3292_v47 = vsub.f32 1.0, %v3291_v45  ;;  %vm3453_vm4 = vweird.f32 %v3447_v24  ;;  %vm3218_vm10 = vmor %vm3216_vm6, %vm3217_vm0  ;;  %vm3221_vm11 = vcmp.eq.f32.partialorder %v3220_v9, 8.507059e+37  ;;  %vm3379_vm0 = vcmp.eq.f32.partialorder %v3378_v20, 8.507059e+37 }
0x15b5   : > { %v3371_v5 = vsub.f32 1.0, %v3370_v59  ;;  %v3460_v11 = vor.u32 1.1754944e-38, %v3459_v63  ;;  %vm3458_vm9 = vcmp.eq.f32.partialorder %v3457_v3, 8.507059e+37  ;;  %v3219_v13 = vsel %vm3218_vm10, %v5309_v42, %v3215_v4  ;;  %v3598_v63 = vld [vmem:[%s6775_s28 + $0x18] sm:$0xff] }
0x15b6   : > { %v3293_v17 = vmul.f32 %v5311_v44, %v3292_v47  ;;  %v3224_v50 = vsel %vm3221_vm11, %v3223_v1, %v3219_v13  ;;  %v3595_v1 = vld [vmem:[%s6775_s28] sm:$0xff] }
0x15b7   : > { %v3372_v15 = vmul.f32 %v5313_v49, %v3371_v5  ;;  %v3225_v21 = vmul.f32 %v6323_v19, %v3224_v50  ;;  %v5218_v50 = vld [vmem:[%s6778_s26] ss:$0 sm:$0xff] }
0x15b8   : > { %v3294_v52 = vadd.f32 %v5311_v44, %v3293_v17 }
0x15b9   : > { %v5315_v53 = vpop.eup %5314  ;;  %v3373_v43 = vadd.f32 %v5313_v49, %v3372_v15  ;;  %v3597_v15 = vld [vmem:[%s6775_s28 + $0x10] sm:$0xff] }
0x15ba   : > { %v3298_v30 = vsel %vm3297_vm12, %v5311_v44, %v3294_v52  ;;  %v3449_v56 = vmul.f32 %v5315_v53, %v3447_v24  ;;  %vm3454_vm15 = vweird.f32 %v5315_v53  ;;  %vm3375_vm12 = vweird.f32 %v5313_v49  ;;  %v5215_v44 = vld [vmem:[%s6774_s18] ss:$0 sm:$0xff] }
0x15bb   : > { %v3303_v57 = vsel %vm3300_vm14, %v3302_v55, %v3298_v30  ;;  %vm3455_vm5 = vmor %vm3453_vm4, %vm3454_vm15  ;;  %vm3374_vm14 = vweird.f32 %v6343_v40  ;;  %v3566_v52 = vld [vmem:[#allocation9 + $0x18] sm:$0xff]  ;;  %v3563_v55 = vld [vmem:[#allocation9] sm:$0xff] }
0x15bc   : > { %v3450_v61 = vsub.f32 1.0, %v3449_v56  ;;  %v3304_v62 = vmul.f32 %v5305_v31, %v3303_v57  ;;  %vm3376_vm15 = vmor %vm3374_vm14, %vm3375_vm12  ;;  %v3602_v30 = vld [vmem:[%s6775_s28 + $0x38] sm:$0xff]  ;;  %v3601_v56 = vld [vmem:[%s6775_s28 + $0x30] sm:$0xff] }
0x15bd   : > { %v3464_v0 = vpop.permute.xlu0 %3463  ;;  %v3377_v23 = vsel %vm3376_vm15, %v5313_v49, %v3373_v43  ;;  %3618 = vmatpush.msra.mxu3 %v3602_v30  ;;  %v3600_v57 = vld [vmem:[%s6775_s28 + $0x28] sm:$0xff] }
0x15be   : > { %v3451_v2 = vmul.f32 %v5315_v53, %v3450_v61  ;;  %4993 = vmatmul.msk.f32.vlgmr.msra.gmra.mxu2 %vm1613_vm3, %v3304_v62  ;;  %v3382_v26 = vsel %vm3379_vm0, %v3381_v25, %v3377_v23  ;;  %v3599_v61 = vld [vmem:[%s6775_s28 + $0x20] sm:$0xff] }
0x15bf   : > { %3484 = vmatpush.msrb.mxu2 %v3464_v0  ;;  %v3383_v28 = vmul.f32 %v6331_v27, %v3382_v26  ;;  %v3170_v27 = vld [vmem:[#allocation7] sm:$0xff]  ;;  %3619 = vmatpush.msra.mxu3 %v3601_v56 }
0x15c0   : > { %v3452_v6 = vadd.f32 %v5315_v53, %v3451_v2  ;;  %3525 = vmatpush.msrb.mxu0 %v3170_v27 }
0x15c1   : > { %3620 = vmatpush.msra.mxu3 %v3600_v57  ;;  %v6420_v57 = vld [vmem:[%s6762_s20] sm:$0xff] }
0x15c2   : > { %v3456_v12 = vsel %vm3455_vm5, %v5315_v53, %v3452_v6  ;;  %v3565_v53 = vld [vmem:[#allocation9 + $0x10] sm:$0xff] }
0x15c3   : > { %v3461_v60 = vsel %vm3458_vm9, %v3460_v11, %v3456_v12  ;;  %3621 = vmatpush.msra.mxu3 %v3599_v61  ;;  %v5217_v12 = vld [vmem:[%s6777_s30] ss:$0 sm:$0xff] }
0x15c4   : > { %v3462_v16 = vmul.f32 %v5307_v37, %v3461_v60 }
0x15c5   : > { %3622 = vmatpush.msra.mxu3 %v3598_v63 }
0x15c6   : > { %4999 = vmatmul.msk.f32.vlgmr.msrb.gmra.mxu2 %vm1613_vm3, %v3462_v16  ;;  %v3596_v16 = vld [vmem:[%s6775_s28 + $0x8] sm:$0xff] }
0x15c7   : > { %3623 = vmatpush.msra.mxu3 %v3597_v15 }
0x15c9   : > { %3624 = vmatpush.msra.mxu3 %v3596_v16 }
0x15ca   : > { %v3227_v10 = vpop.permute.xlu1 %3226 }
0x15cb   : > { %3247 = vmatpush.msrb.mxu1 %v3227_v10  ;;  %3625 = vmatpush.msra.mxu3 %v3595_v1  ;;  %v5219_v10 = vld [vmem:[%s6779_s21] ss:$0 sm:$0xff] }
0x15cc   : > { %4990 = vmatmul.msk.f32.vlgmr.msrb.gmra.mxu1 %vm1613_vm3, %v3225_v21 }
0x15cd   : > { %3405 = vmatpush.msra.mxu1 %v3385_v22 }
0x15cf   : > { %3586 = vmatpush.msrb.mxu1 %v3566_v52 }
0x15d1   : > { %3587 = vmatpush.msrb.mxu1 %v3565_v53 }
0x15d4   : > { %4996 = vmatmul.msk.f32.vlgmr.msra.gmra.mxu1 %vm1613_vm3, %v3383_v28 }
0x1641   : > { %v3328_v29 = vpop.f32.mrf.mxu2 }
0x1642   : > { %3490 = vrot.lane.b32.xlu0 %v3328_v29, %s6758_s8 }
0x1649   : > { %v3249_v31 = vpop.f32.mrf.mxu1  ;;  %v3486_v32 = vpop.f32.mrf.mxu2 }
0x164a   : > { %3498 = vrot.lane.b32.xlu2 %v3486_v32, %s6759_s13 }
0x1651   : > { %v3407_v19 = vpop.f32.mrf.mxu1 }
0x1652   : > { %3494 = vrot.lane.b32.xlu1 %v3407_v19, %s6761_s19  ;;  %v5006_v19 = vld [vmem:[%s6754_s5 + $0x38] sm:$0xff] }
0x1653   : > { %3688 = vmatpush.msra.mxu2 %v5006_v19 }
0x1655   : > { %3689 = vmatpush.msra.mxu2 %v5005_v33 }
0x1657   : > { %3690 = vmatpush.msra.mxu2 %v5004_v34 }
0x1659   : > { %3691 = vmatpush.msra.mxu2 %v5003_v35 }
0x16a4   : > { %v3499_v40 = vpop.permute.xlu2 %3498 }
0x16b4   : > { %v3491_v37 = vpop.permute.xlu0 %3490 }
0x16b5   : > { %v3501_v38 = vsel %vm1613_vm3, %v3249_v31, %v3491_v37 }
0x16c4   : > { %v3495_v39 = vpop.permute.xlu1 %3494 }
0x16c5   : > { %v3502_v41 = vsel %vm1939_vm7, %v3501_v38, %v3495_v39 }
0x16c6   : > { %v3503_v42 = vsel %vm1941_vm8, %v3502_v41, %v3499_v40 }
0x16c7   : > { %5000 = vmatmul.msk.f32.vlgmr.msrb.gmra.mxu0 %vm1581_vm2, %v3503_v42 }
0x1744   : > { %v3527_v45 = vpop.f32.mrf.mxu0 }
0x1745   : > { %v3528_v24 = vadd.f32 %v5215_v44, %v3527_v45 }
0x1747   : > { %v3530_v46 = vadd.f32 %v3528_v24, %v6293_v54  ;;  %v3564_v54 = vld [vmem:[#allocation9 + $0x8] sm:$0xff]  ;;  %v5220_v24 = vld [vmem:[%s6780_s27] ss:$0 sm:$0xff] }
0x1748   : > { %3588 = vmatpush.msrb.mxu1 %v3564_v54 }
0x1749   : > { %v3533_v47 = vsel %vm1581_vm2, %v3530_v46, 0.0 }
0x174a   : > { %3534 = vadd.xlane.f32.xlu0 %v3533_v47  ;;  %3589 = vmatpush.msrb.mxu1 %v3563_v55 }
0x17bd   : > { %v3535_v14 = vpop.xlane.xlu0 %3534 }
0x17be   : > { %v3536_v17 = vmul.f32 %v3535_v14, %v6059_v8  ;;  %v5221_v14 = vld [vmem:[%s6781_s4] ss:$0 sm:$0xff] }
0x17c0   : > { %v3537_v48 = vsub.f32 %v3530_v46, %v3536_v17 }
0x17c2   : > { %v3538_v49 = vmul.f32 %v3537_v48, %v3537_v48 }
0x17c4   : > { %v3539_v51 = vsel %vm1581_vm2, %v3538_v49, 0.0  ;;  %v5222_v49 = vld [vmem:[%s6757_s12 + $0x1] ss:$0 sm:$0xff] }
0x17c5   : > { %3540 = vadd.xlane.f32.xlu1 %v3539_v51 }
0x1838   : > { %v3541_v58 = vpop.xlane.xlu1 %3540 }
0x1839   : > { %v3542_v59 = vmul.f32 %v3541_v58, %v6059_v8 }
0x183b   : > { %v3543_v62 = vadd.f32 1e-05, %v3542_v59 }
0x183d   : > { %5316 = vrsqrt.f32 %v3543_v62  ;;  %vm3550_vm5 = vweird.f32 %v3543_v62 }
0x1843   : > { %v5317_v0 = vpop.eup %5316 }
0x1844   : > { %v3545_v2 = vmul.f32 %v5317_v0, %v3543_v62  ;;  %vm3551_vm4 = vweird.f32 %v5317_v0 }
0x1845   : > { %vm3552_vm6 = vmor %vm3550_vm5, %vm3551_vm4 }
0x1846   : > { %v3546_v3 = vmul.f32 %v5317_v0, %v3545_v2 }
0x1848   : > { %v3547_v4 = vmul.f32 0.5, %v3546_v3 }
0x184a   : > { %v3548_v5 = vsub.f32 1.5, %v3547_v4 }
0x184c   : > { %v3549_v6 = vmul.f32 %v5317_v0, %v3548_v5 }
0x184e   : > { %v3553_v11 = vsel %vm3552_vm6, %v5317_v0, %v3549_v6  ;;  %v4135_v6 = vld [vmem:[#allocation6 + $0x38] sm:$0xff] }
0x184f   : > { %v3554_v9 = vmul.f32 %v3553_v11, %v3537_v48  ;;  %v4133_v11 = vld [vmem:[#allocation6 + $0x28] sm:$0xff] }
0x1851   : > { %v3558_v60 = vmul.f32 %v5216_v7, %v3554_v9  ;;  %v4134_v7 = vld [vmem:[#allocation6 + $0x30] sm:$0xff]  ;;  %v4132_v9 = vld [vmem:[#allocation6 + $0x20] sm:$0xff] }
0x1853   : > { %v3562_v13 = vadd.f32 %v5217_v12, %v3558_v60 }
0x1855   : > { %5001 = vmatmul.msk.f32.vlgmr.msrb.gmra.mxu1 %vm1581_vm2, %v3562_v13 }
0x18d2   : > { %v3591_v43 = vpop.f32.mrf.mxu1 }
0x18d3   : > { %v3592_v18 = vadd.f32 %v5218_v50, %v3591_v43 }
0x18d5   : > { %v3594_v20 = vmax.f32 %v3592_v18, 0.0 }
0x18d7   : > { %5002 = vmatmul.msk.f32.vlgmr.msra.gmra.mxu3 %vm2053_vm13, %v3594_v20 }
0x195a   : > { %v3627_v21 = vpop.f32.mrf.mxu3 }
0x195b   : > { %v3628_v22 = vadd.f32 %v5219_v10, %v3627_v21 }
0x195d   : > { %v3630_v23 = vadd.f32 %v3628_v22, %v3562_v13 }
0x195f   : > { %v3633_v25 = vsel %vm1581_vm2, %v3630_v23, 0.0 }
0x1960   : > { %3634 = vadd.xlane.f32.xlu2 %v3633_v25 }
0x19d3   : > { %v3635_v26 = vpop.xlane.xlu2 %3634 }
0x19d4   : > { %v3636_v28 = vmul.f32 %v3635_v26, %v6059_v8 }
0x19d6   : > { %v3637_v29 = vsub.f32 %v3630_v23, %v3636_v28 }
0x19d8   : > { %v3638_v31 = vmul.f32 %v3637_v29, %v3637_v29 }
0x19da   : > { %v3639_v32 = vsel %vm1581_vm2, %v3638_v31, 0.0 }
0x19db   : > { %3640 = vadd.xlane.f32.xlu0 %v3639_v32 }
0x1a4e   : > { %v3641_v27 = vpop.xlane.xlu0 %3640 }
0x1a4f   : > { %v3642_v37 = vmul.f32 %v3641_v27, %v6059_v8 }
0x1a51   : > { %v3643_v38 = vadd.f32 1e-05, %v3642_v37 }
0x1a53   : > { %5318 = vrsqrt.f32 %v3643_v38  ;;  %vm3650_vm10 = vweird.f32 %v3643_v38 }
0x1a59   : > { %v5319_v39 = vpop.eup %5318 }
0x1a5a   : > { %v3645_v40 = vmul.f32 %v5319_v39, %v3643_v38  ;;  %vm3651_vm9 = vweird.f32 %v5319_v39 }
0x1a5b   : > { %vm3652_vm11 = vmor %vm3650_vm10, %vm3651_vm9 }
0x1a5c   : > { %v3646_v41 = vmul.f32 %v5319_v39, %v3645_v40 }
0x1a5e   : > { %v3647_v42 = vmul.f32 0.5, %v3646_v41 }
0x1a60   : > { %v3648_v44 = vsub.f32 1.5, %v3647_v42 }
0x1a62   : > { %v3649_v45 = vmul.f32 %v5319_v39, %v3648_v44 }
0x1a64   : > { %v3653_v46 = vsel %vm3652_vm11, %v5319_v39, %v3649_v45 }
0x1a65   : > { %v3654_v47 = vmul.f32 %v3653_v46, %v3637_v29 }
0x1a67   : > { %v3658_v17 = vmul.f32 %v5220_v24, %v3654_v47 }
0x1a69   : > { %v6398_v48 = vadd.f32 %v5221_v14, %v3658_v17 }
0x1a6b   : > { %5008 = vmatmul.msk.f32.vlgmr.msra.gmra.mxu2 %vm1581_vm2, %v6398_v48 }
0x1aee   : > { %v3693_v51 = vpop.f32.mrf.mxu2 }
0x1aef   : > { %v6403_v52 = vadd.f32 %v5222_v49, %v3693_v51 }
0x1af1   : > { %3756 = vrot.lane.b32.xlu0 %v6403_v52, %s6764_s23  ;;  %3704 = vrot.lane.b32.xlu1 %v6403_v52, %s6760_s14 }
0x1af9   : > { %3864 = vrot.lane.b32.xlu0 %v6403_v52, %s6751_s11  ;;  %3782 = vrot.lane.b32.xlu1 %v6403_v52, %s6763_s24 }
0x1b01   : > { %3944 = vrot.lane.b32.xlu1 %v6403_v52, %s6765_s25 }
0x1b63   : > { %v3757_v53 = vpop.permute.xlu0 %3756  ;;  %v3705_v54 = vpop.permute.xlu1 %3704 }
0x1b64   : > { %5014 = vmatpush.xpose.msk.msra.mxu0 %vm1613_vm3, %v3705_v54  ;;  %3777 = vmatpush.msra.mxu1 %v3757_v53 }
0x1b67   : > { %5015 = vmatmul.msk.f32.vlgmr.msra.gmra.mxu0 %vm1613_vm3, %v6403_v52 }
0x1b6b   : > { %v3865_v55 = vpop.permute.xlu0 %3864  ;;  %v3783_v61 = vpop.permute.xlu1 %3782 }
0x1b6c   : > { %5020 = vmatpush.xpose.msk.msrb.mxu1 %vm1613_vm3, %v3865_v55 }
0x1b73   : > { %v3945_v3 = vpop.permute.xlu1 %3944 }
0x1be4   : > { %v3727_v30 = vpop.f32.mrf.mxu0 }
0x1be5   : > { %v3730_v56 = vmul.f32 0.35355338, %v3727_v30 }
0x1be7   : > { %v3731_v58 = vadd.f32 %v6420_v57, %v3730_v56 }
0x1be9   : > { %v3732_v59 = vsel %vm1613_vm3, %v3731_v58, -inf }
0x1bea   : > { %3733 = vmax.xlane.f32.xlu2 %v3732_v59 }
0x1c02   : > { %3784 = vrot.lane.b32.xlu2 %v6403_v52, %s6748_s22 }
0x1c0a   : > { %3862 = vrot.lane.b32.xlu2 %v6403_v52, %s6750_s16 }
0x1c5d   : > { %v3734_v62 = vpop.xlane.xlu2 %3733 }
0x1c5e   : > { %v3735_v63 = vsub.f32 %v3731_v58, %v3734_v62 }
0x1c60   : > { %v3736_v0 = vmul.f32 1.442695, %v3735_v63 }
0x1c62   : > { %5320 = vpow2.f32 %v3736_v0 }
0x1c65   : > { %v3785_v2 = vpop.permute.xlu2 %3784 }
0x1c66   : > { %5017 = vmatpush.xpose.msk.msrb.mxu2 %vm1613_vm3, %v3785_v2 }
0x1c68   : > { %v5321_v4 = vpop.eup %5320 }
0x1c69   : > { %5018 = vmatmul.msk.f32.vlgmr.msrb.gmra.mxu2 %vm1613_vm3, %v3783_v61  ;;  %v3738_v5 = vsel %vm1613_vm3, %v5321_v4, 0.0 }
0x1c6a   : > { %5023 = vmatpush.xpose.msk.msra.mxu2 %vm1613_vm3, %v3945_v3  ;;  %3739 = vadd.xlane.f32.xlu0 %v3738_v5 }
0x1c6d   : > { %v3863_v29 = vpop.permute.xlu2 %3862 }
0x1c6e   : > { %4153 = vmatpush.msrb.mxu2 %v4135_v6  ;;  %v5223_v6 = vld [vmem:[%s6772_s7 + $0x1] ss:$0 sm:$0xff] }
0x1c70   : > { %4154 = vmatpush.msrb.mxu2 %v4134_v7 }
0x1c72   : > { %4155 = vmatpush.msrb.mxu2 %v4133_v11 }
0x1c74   : > { %4156 = vmatpush.msrb.mxu2 %v4132_v9 }
0x1c7e   : > { %3942 = vrot.lane.b32.xlu0 %v6403_v52, %s6749_s0 }
0x1cdd   : > { %v3740_v12 = vpop.xlane.xlu0 %3739 }
0x1cde   : > { %5322 = vrcp.f32 %v3740_v12  ;;  %v3752_v16 = vand.u32 2147483648, %v3740_v12  ;;  %v3750_v50 = vand.u32 2147483647, %v3740_v12  ;;  %vm3746_vm14 = vweird.f32 %v3740_v12 }
0x1ce0   : > { %v3753_v18 = vor.u32 1.1754944e-38, %v3752_v16  ;;  %vm3751_vm0 = vcmp.eq.f32.partialorder %v3750_v50, 8.507059e+37 }
0x1ce4   : > { %v5323_v60 = vpop.eup %5322 }
0x1ce5   : > { %v3742_v13 = vmul.f32 %v5323_v60, %v3740_v12  ;;  %vm3747_vm12 = vweird.f32 %v5323_v60 }
0x1ce6   : > { %vm3748_vm15 = vmor %vm3746_vm14, %vm3747_vm12 }
0x1ce7   : > { %v3743_v15 = vsub.f32 1.0, %v3742_v13 }
0x1ce9   : > { %v3744_v1 = vmul.f32 %v5323_v60, %v3743_v15 }
0x1ceb   : > { %v3745_v43 = vadd.f32 %v5323_v60, %v3744_v1 }
0x1cec   : > { %v3807_v20 = vpop.f32.mrf.mxu2 }
0x1ced   : > { %v3749_v10 = vsel %vm3748_vm15, %v5323_v60, %v3745_v43  ;;  %v3810_v21 = vmul.f32 0.35355338, %v3807_v20 }
0x1cee   : > { %v3754_v22 = vsel %vm3751_vm0, %v3753_v18, %v3749_v10 }
0x1cef   : > { %v3755_v23 = vmul.f32 %v5321_v4, %v3754_v22  ;;  %v3811_v25 = vadd.f32 %v6420_v57, %v3810_v21 }
0x1cf0   : > { %v3943_v26 = vpop.permute.xlu0 %3942 }
0x1cf1   : > { %5016 = vmatmul.msk.f32.vlgmr.msra.gmra.mxu1 %vm1613_vm3, %v3755_v23  ;;  %5024 = vmatmul.msk.f32.vlgmr.msra.gmra.mxu2 %vm1613_vm3, %v3943_v26  ;;  %v3812_v28 = vsel %vm1613_vm3, %v3811_v25, -inf }
0x1cf2   : > { %3813 = vmax.xlane.f32.xlu1 %v3812_v28 }
0x1cf9   : > { %5021 = vmatmul.msk.f32.vlgmr.msrb.gmra.mxu1 %vm1613_vm3, %v3863_v29  ;;  %5032 = vmatmul.msk.f32.vlgmr.msrb.gmra.mxu2 %vm1581_vm2, %v6286_v36 }
0x1d65   : > { %v3814_v32 = vpop.xlane.xlu1 %3813 }
0x1d66   : > { %v3815_v19 = vsub.f32 %v3811_v25, %v3814_v32 }
0x1d68   : > { %v3816_v35 = vmul.f32 1.442695, %v3815_v19 }
0x1d6a   : > { %5324 = vpow2.f32 %v3816_v35 }
0x1d6e   : > { %v6441_v31 = vpop.f32.mrf.mxu1 }
0x1d70   : > { %v5325_v36 = vpop.eup %5324 }
0x1d71   : > { %v3818_v42 = vsel %vm1613_vm3, %v5325_v36, 0.0 }
0x1d74   : > { %v3967_v33 = vpop.f32.mrf.mxu2 }
0x1d75   : > { %v3970_v34 = vmul.f32 0.35355338, %v3967_v33 }
0x1d76   : > { %v3887_v27 = vpop.f32.mrf.mxu1 }
0x1d77   : > { %v3890_v37 = vmul.f32 0.35355338, %v3887_v27  ;;  %v3971_v38 = vadd.f32 %v6420_v57, %v3970_v34 }
0x1d79   : > { %v3972_v39 = vsel %vm1613_vm3, %v3971_v38, -inf  ;;  %v3891_v40 = vadd.f32 %v6420_v57, %v3890_v37 }
0x1d7a   : > { %3973 = vmax.xlane.f32.xlu0 %v3972_v39  ;;  %v4101_v39 = vld [vmem:[#allocation4 + $0x30] sm:$0xff] }
0x1d7b   : > { %v3892_v41 = vsel %vm1613_vm3, %v3891_v40, -inf }
0x1d7c   : > { %3893 = vmax.xlane.f32.xlu2 %v3892_v41  ;;  %v4158_v7 = vpop.f32.mrf.mxu2  ;;  %v4099_v41 = vld [vmem:[#allocation4 + $0x20] sm:$0xff] }
0x1d7d   : > { %v6461_v9 = vadd.f32 %v5223_v6, %v4158_v7  ;;  %v5225_v7 = vld [vmem:[%s6770_s10 + $0x1] ss:$0 sm:$0xff] }
0x1d84   : > { %3819 = vadd.xlane.f32.xlu2 %v3818_v42  ;;  %v5011_v42 = vld [vmem:[%s6766_s1 + $0x30] sm:$0xff] }
0x1d8e   : > { %3836 = vrot.lane.b32.xlu0 %v6403_v52, %s6752_s15 }
0x1ded   : > { %v3974_v44 = vpop.xlane.xlu0 %3973 }
0x1dee   : > { %v3975_v45 = vsub.f32 %v3971_v38, %v3974_v44  ;;  %v4102_v38 = vld [vmem:[#allocation4 + $0x38] sm:$0xff]  ;;  %v5010_v44 = vld [vmem:[%s6766_s1 + $0x28] sm:$0xff] }
0x1def   : > { %v3894_v24 = vpop.xlane.xlu2 %3893 }
0x1df0   : > { %v3976_v46 = vmul.f32 1.442695, %v3975_v45  ;;  %v3895_v47 = vsub.f32 %v3891_v40, %v3894_v24  ;;  %v4100_v40 = vld [vmem:[#allocation4 + $0x28] sm:$0xff]  ;;  %v5009_v45 = vld [vmem:[%s6766_s1 + $0x20] sm:$0xff] }
0x1df2   : > { %5326 = vpow2.f32 %v3976_v46  ;;  %v3896_v14 = vmul.f32 1.442695, %v3895_v47 }
0x1df4   : > { %5328 = vpow2.f32 %v3896_v14 }
0x1df7   : > { %v3820_v17 = vpop.xlane.xlu2 %3819 }
0x1df8   : > { %v5327_v49 = vpop.eup %5326  ;;  %5330 = vrcp.f32 %v3820_v17  ;;  %v3832_v58 = vand.u32 2147483648, %v3820_v17  ;;  %v3830_v61 = vand.u32 2147483647, %v3820_v17  ;;  %vm3826_vm5 = vweird.f32 %v3820_v17 }
0x1df9   : > { %v3978_v51 = vsel %vm1613_vm3, %v5327_v49, 0.0 }
0x1dfa   : > { %v6451_v53 = vpop.eup %5328  ;;  %3979 = vadd.xlane.f32.xlu2 %v3978_v51  ;;  %v3833_v63 = vor.u32 1.1754944e-38, %v3832_v58  ;;  %vm3831_vm9 = vcmp.eq.f32.partialorder %v3830_v61, 8.507059e+37 }
0x1dfb   : > { %v3898_v54 = vsel %vm1613_vm3, %v6451_v53, 0.0 }
0x1dfc   : > { %3899 = vadd.xlane.f32.xlu1 %v3898_v54 }
0x1dfe   : > { %v5331_v55 = vpop.eup %5330 }
0x1dff   : > { %v3822_v30 = vmul.f32 %v5331_v55, %v3820_v17  ;;  %vm3827_vm4 = vweird.f32 %v5331_v55 }
0x1e00   : > { %v3837_v56 = vpop.permute.xlu0 %3836  ;;  %vm3828_vm6 = vmor %vm3826_vm5, %vm3827_vm4 }
0x1e01   : > { %v3823_v57 = vsub.f32 1.0, %v3822_v30  ;;  %3857 = vmatpush.msrb.mxu0 %v3837_v56 }
0x1e03   : > { %v3824_v59 = vmul.f32 %v5331_v55, %v3823_v57 }
0x1e05   : > { %v3825_v62 = vadd.f32 %v5331_v55, %v3824_v59 }
0x1e07   : > { %v3829_v0 = vsel %vm3828_vm6, %v5331_v55, %v3825_v62 }
0x1e08   : > { %v3834_v2 = vsel %vm3831_vm9, %v3833_v63, %v3829_v0 }
0x1e09   : > { %v3835_v3 = vmul.f32 %v5325_v36, %v3834_v2  ;;  %v5012_v36 = vld [vmem:[%s6766_s1 + $0x38] sm:$0xff] }
0x1e0a   : > { %4055 = vmatpush.msra.mxu1 %v5012_v36 }
0x1e0b   : > { %5019 = vmatmul.msk.f32.vlgmr.msrb.gmra.mxu0 %vm1613_vm3, %v3835_v3 }
0x1e0c   : > { %4056 = vmatpush.msra.mxu1 %v5011_v42 }
0x1e0e   : > { %4057 = vmatpush.msra.mxu1 %v5010_v44 }
0x1e10   : > { %4058 = vmatpush.msra.mxu1 %v5009_v45 }
0x1e12   : > { %3996 = vrot.lane.b32.xlu2 %v6403_v52, %s6753_s3  ;;  %s6785_s3 = sld [smem:[#allocation59_spill]] }
0x1e15   : > { %3916 = vrot.lane.b32.xlu1 %v6403_v52, %s6756_s9  ;;  %s6782_s9 = sld [smem:[#allocation58_spill]] }
0x1e6d   : > { %v3980_v4 = vpop.xlane.xlu2 %3979 }
0x1e6e   : > { %5332 = vrcp.f32 %v3980_v4  ;;  %v3992_v1 = vand.u32 2147483648, %v3980_v4  ;;  %v3990_v50 = vand.u32 2147483647, %v3980_v4  ;;  %vm3986_vm11 = vweird.f32 %v3980_v4 }
0x1e6f   : > { %v3900_v5 = vpop.xlane.xlu1 %3899 }
0x1e70   : > { %5334 = vrcp.f32 %v3900_v5  ;;  %v3993_v10 = vor.u32 1.1754944e-38, %v3992_v1  ;;  %vm3991_vm14 = vcmp.eq.f32.partialorder %v3990_v50, 8.507059e+37  ;;  %v3912_v25 = vand.u32 2147483648, %v3900_v5  ;;  %v5227_v1 = vld [vmem:[%s6773_s17 + $0x1] ss:$0 sm:$0xff] }
0x1e71   : > { %vm3906_vm0 = vweird.f32 %v3900_v5  ;;  %v3910_v26 = vand.u32 2147483647, %v3900_v5 }
0x1e72   : > { %v3913_v32 = vor.u32 1.1754944e-38, %v3912_v25 }
0x1e73   : > { %vm3911_vm5 = vcmp.eq.f32.partialorder %v3910_v26, 8.507059e+37 }
0x1e74   : > { %v5333_v11 = vpop.eup %5332 }
0x1e75   : > { %v3982_v12 = vmul.f32 %v5333_v11, %v3980_v4  ;;  %v3997_v60 = vpop.permute.xlu2 %3996  ;;  %vm3987_vm10 = vweird.f32 %v5333_v11 }
0x1e76   : > { %v5335_v13 = vpop.eup %5334  ;;  %4017 = vmatpush.msra.mxu0 %v3997_v60  ;;  %vm3988_vm12 = vmor %vm3986_vm11, %vm3987_vm10  ;;  %v5226_v60 = vld [vmem:[%s6771_s6 + $0x1] ss:$0 sm:$0xff] }
0x1e77   : > { %v3983_v15 = vsub.f32 1.0, %v3982_v12  ;;  %v3902_v16 = vmul.f32 %v5335_v13, %v3900_v5  ;;  %vm3907_vm15 = vweird.f32 %v5335_v13 }
0x1e78   : > { %5034 = vmatpush.xpose.msk.msrb.mxu0 %vm1613_vm3, %v6461_v9  ;;  %vm3908_vm4 = vmor %vm3906_vm0, %vm3907_vm15 }
0x1e79   : > { %v3984_v52 = vmul.f32 %v5333_v11, %v3983_v15  ;;  %v3903_v43 = vsub.f32 1.0, %v3902_v16 }
0x1e7b   : > { %v3985_v18 = vadd.f32 %v5333_v11, %v3984_v52  ;;  %v3904_v20 = vmul.f32 %v5335_v13, %v3903_v43 }
0x1e7d   : > { %v3989_v21 = vsel %vm3988_vm12, %v5333_v11, %v3985_v18  ;;  %v3905_v22 = vadd.f32 %v5335_v13, %v3904_v20 }
0x1e7e   : > { %v3994_v23 = vsel %vm3991_vm14, %v3993_v10, %v3989_v21 }
0x1e7f   : > { %v3995_v28 = vmul.f32 %v5327_v49, %v3994_v23  ;;  %v3909_v29 = vsel %vm3908_vm4, %v5335_v13, %v3905_v22 }
0x1e80   : > { %v3914_v19 = vsel %vm3911_vm5, %v3913_v32, %v3909_v29 }
0x1e81   : > { %5025 = vmatmul.msk.f32.vlgmr.msra.gmra.mxu0 %vm1613_vm3, %v3995_v28  ;;  %v3915_v34 = vmul.f32 %v6451_v53, %v3914_v19  ;;  %v5224_v53 = vld [vmem:[%s6767_s2 + $0x1] ss:$0 sm:$0xff] }
0x1e87   : > { %v3917_v33 = vpop.permute.xlu1 %3916 }
0x1e88   : > { %v3859_v35 = vpop.f32.mrf.mxu0  ;;  %3937 = vmatpush.msrb.mxu3 %v3917_v33 }
0x1e89   : > { %4023 = vrot.lane.b32.xlu0 %v3859_v35, %s6758_s8  ;;  %5022 = vmatmul.msk.f32.vlgmr.msrb.gmra.mxu3 %vm1613_vm3, %v3915_v34 }
0x1e8a   : > { %4123 = vmatpush.msra.mxu3 %v4102_v38 }
0x1e8c   : > { %4124 = vmatpush.msra.mxu3 %v4101_v39 }
0x1e8e   : > { %4125 = vmatpush.msra.mxu3 %v4100_v40 }
0x1e90   : > { %4126 = vmatpush.msra.mxu3 %v4099_v41 }
0x1efb   : > { %v4024_v24 = vpop.permute.xlu0 %4023 }
0x1efc   : > { %v4034_v14 = vsel %vm1613_vm3, %v6441_v31, %v4024_v24 }
0x1efe   : > { %v4019_v27 = vpop.f32.mrf.mxu0 }
0x1eff   : > { %4031 = vrot.lane.b32.xlu0 %v4019_v27, %s6759_s13 }
0x1f07   : > { %4247 = vrot.lane.b32.xlu0 %v6461_v9, %s6763_s24 }
0x1f0c   : > { %v3939_v37 = vpop.f32.mrf.mxu3 }
0x1f0d   : > { %4027 = vrot.lane.b32.xlu1 %v3939_v37, %s6761_s19 }
0x1f0f   : > { %4405 = vrot.lane.b32.xlu0 %v6461_v9, %s6749_s0 }
0x1f71   : > { %v4032_v46 = vpop.permute.xlu0 %4031 }
0x1f79   : > { %v4248_v47 = vpop.permute.xlu0 %4247 }
0x1f7a   : > { %5037 = vmatpush.xpose.msk.msrb.mxu3 %vm1613_vm3, %v4248_v47 }
0x1f7f   : > { %v4028_v17 = vpop.permute.xlu1 %4027 }
0x1f80   : > { %v4035_v49 = vsel %vm1939_vm7, %v4034_v14, %v4028_v17 }
0x1f81   : > { %v4036_v51 = vsel %vm1941_vm8, %v4035_v49, %v4032_v46  ;;  %v4406_v16 = vpop.permute.xlu0 %4405 }
0x1f82   : > { %5026 = vmatmul.msk.f32.vlgmr.msra.gmra.mxu1 %vm1581_vm2, %v4036_v51 }
0x1fff   : > { %v4060_v54 = vpop.f32.mrf.mxu1 }
0x2000   : > { %v4061_v55 = vadd.f32 %v5224_v53, %v4060_v54 }
0x2002   : > { %v4063_v30 = vadd.f32 %v4061_v55, %v6398_v48 }
0x2004   : > { %v4068_v56 = vsel %vm1581_vm2, %v4063_v30, 0.0 }
0x2005   : > { %4069 = vadd.xlane.f32.xlu2 %v4068_v56 }
0x2078   : > { %v4070_v57 = vpop.xlane.xlu2 %4069 }
0x2079   : > { %v4071_v58 = vmul.f32 %v4070_v57, %v6059_v8 }
0x207b   : > { %v4072_v59 = vsub.f32 %v4063_v30, %v4071_v58 }
0x207d   : > { %v4073_v31 = vmul.f32 %v4072_v59, %v4072_v59 }
0x207f   : > { %v4074_v61 = vsel %vm1581_vm2, %v4073_v31, 0.0 }
0x2080   : > { %4075 = vadd.xlane.f32.xlu1 %v4074_v61 }
0x20f3   : > { %v4076_v62 = vpop.xlane.xlu1 %4075 }
0x20f4   : > { %v4077_v63 = vmul.f32 %v4076_v62, %v6059_v8 }
0x20f6   : > { %v4078_v0 = vadd.f32 1e-05, %v4077_v63 }
0x20f8   : > { %5336 = vrsqrt.f32 %v4078_v0  ;;  %vm4085_vm9 = vweird.f32 %v4078_v0 }
0x20fe   : > { %v5337_v2 = vpop.eup %5336 }
0x20ff   : > { %v4080_v48 = vmul.f32 %v5337_v2, %v4078_v0  ;;  %vm4086_vm6 = vweird.f32 %v5337_v2 }
0x2100   : > { %vm4087_vm10 = vmor %vm4085_vm9, %vm4086_vm6 }
0x2101   : > { %v4081_v3 = vmul.f32 %v5337_v2, %v4080_v48 }
0x2103   : > { %v4082_v4 = vmul.f32 0.5, %v4081_v3 }
0x2105   : > { %v4083_v5 = vsub.f32 1.5, %v4082_v4 }
0x2107   : > { %v4084_v6 = vmul.f32 %v5337_v2, %v4083_v5 }
0x2109   : > { %v4088_v11 = vsel %vm4087_vm10, %v5337_v2, %v4084_v6 }
0x210a   : > { %v4089_v12 = vmul.f32 %v4088_v11, %v4072_v59 }
0x210c   : > { %v4093_v13 = vmul.f32 %v5225_v7, %v4089_v12 }
0x210e   : > { %v6493_v15 = vadd.f32 %v5226_v60, %v4093_v13 }
0x2110   : > { %5030 = vmatmul.msk.f32.vlgmr.msra.gmra.mxu3 %vm1581_vm2, %v6493_v15 }
0x2111   : > { %5043 = vmatpush.xpose.msk.msra.mxu3 %vm1613_vm3, %v4406_v16 }
0x2193   : > { %v4128_v52 = vpop.f32.mrf.mxu3 }
0x2194   : > { %v4129_v50 = vadd.f32 %v5227_v1, %v4128_v52 }
0x2196   : > { %4324 = vrot.lane.b32.xlu2 %v4129_v50, %s6750_s16  ;;  %4245 = vrot.lane.b32.xlu0 %v4129_v50, %s6763_s24 }
0x2197   : > { %5035 = vmatmul.msk.f32.vlgmr.msrb.gmra.mxu0 %vm1613_vm3, %v4129_v50 }
0x219e   : > { %4403 = vrot.lane.b32.xlu0 %v4129_v50, %s6749_s0 }
0x21a6   : > { %4326 = vrot.lane.b32.xlu0 %v6461_v9, %s6750_s16 }
0x21f0   : > { %v4325_v23 = vpop.permute.xlu2 %4324 }
0x2208   : > { %v4246_v43 = vpop.permute.xlu0 %4245 }
0x2209   : > { %5038 = vmatmul.msk.f32.vlgmr.msrb.gmra.mxu3 %vm1613_vm3, %v4246_v43 }
0x2210   : > { %v4404_v18 = vpop.permute.xlu0 %4403 }
0x2211   : > { %5044 = vmatmul.msk.f32.vlgmr.msra.gmra.mxu3 %vm1613_vm3, %v4404_v18 }
0x2214   : > { %v4191_v20 = vpop.f32.mrf.mxu0 }
0x2215   : > { %v4194_v10 = vmul.f32 0.35355338, %v4191_v20 }
0x2217   : > { %v4195_v21 = vsel %vm1613_vm3, %v4194_v10, -inf }
0x2218   : > { %4196 = vmax.xlane.f32.xlu0 %v4195_v21  ;;  %v4327_v22 = vpop.permute.xlu0 %4326 }
0x2219   : > { %5040 = vmatpush.xpose.msk.msra.mxu0 %vm1613_vm3, %v4327_v22 }
0x221c   : > { %5041 = vmatmul.msk.f32.vlgmr.msra.gmra.mxu0 %vm1613_vm3, %v4325_v23 }
0x222c   : > { %4298 = vrot.lane.b32.xlu0 %v6461_v9, %s6748_s22 }
0x2234   : > { %4377 = vrot.lane.b32.xlu0 %v6461_v9, %s6751_s11 }
0x228b   : > { %v4197_v29 = vpop.xlane.xlu0 %4196 }
0x228c   : > { %v4270_v25 = vpop.f32.mrf.mxu3  ;;  %v4198_v33 = vsub.f32 %v4194_v10, %v4197_v29 }
0x228d   : > { %v4273_v26 = vmul.f32 0.35355338, %v4270_v25 }
0x228e   : > { %v4199_v27 = vmul.f32 1.442695, %v4198_v33 }
0x228f   : > { %v4274_v28 = vsel %vm1613_vm3, %v4273_v26, -inf }
0x2290   : > { %4275 = vmax.xlane.f32.xlu1 %v4274_v28  ;;  %5338 = vpow2.f32 %v4199_v27 }
0x2294   : > { %v4428_v32 = vpop.f32.mrf.mxu3 }
0x2295   : > { %v4431_v19 = vmul.f32 0.35355338, %v4428_v32 }
0x2296   : > { %v6517_v40 = vpop.eup %5338 }
0x2297   : > { %v4432_v34 = vsel %vm1613_vm3, %v4431_v19, -inf  ;;  %v4201_v41 = vsel %vm1613_vm3, %v6517_v40, 0.0 }
0x2298   : > { %4433 = vmax.xlane.f32.xlu1 %v4432_v34 }
0x2299   : > { %v4349_v35 = vpop.f32.mrf.mxu0 }
0x229a   : > { %v4352_v37 = vmul.f32 0.35355338, %v4349_v35 }
0x229c   : > { %v4353_v39 = vsel %vm1613_vm3, %v4352_v37, -inf }
0x229e   : > { %v4299_v38 = vpop.permute.xlu0 %4298 }
0x229f   : > { %4319 = vmatpush.msra.mxu2 %v4299_v38 }
0x22a0   : > { %4354 = vmax.xlane.f32.xlu1 %v4353_v39 }
0x22a8   : > { %4202 = vadd.xlane.f32.xlu1 %v4201_v41 }
0x2303   : > { %v4276_v36 = vpop.xlane.xlu1 %4275 }
0x2304   : > { %v4277_v42 = vsub.f32 %v4273_v26, %v4276_v36  ;;  %v4378_v36 = vpop.permute.xlu0 %4377 }
0x2306   : > { %v4278_v44 = vmul.f32 1.442695, %v4277_v42 }
0x2308   : > { %5340 = vpow2.f32 %v4278_v44 }
0x230b   : > { %v4434_v45 = vpop.xlane.xlu1 %4433 }
0x230c   : > { %v4435_v17 = vsub.f32 %v4431_v19, %v4434_v45 }
0x230e   : > { %v5341_v24 = vpop.eup %5340  ;;  %v4436_v51 = vmul.f32 1.442695, %v4435_v17  ;;  %v4165_v17 = vld [vmem:[#allocation7 + $0x38] sm:$0xff] }
0x230f   : > { %v4280_v46 = vsel %vm1613_vm3, %v5341_v24, 0.0  ;;  %4515 = vmatpush.msrb.mxu0 %v4165_v17 }
0x2310   : > { %4281 = vadd.xlane.f32.xlu2 %v4280_v46 }
0x2313   : > { %v4355_v47 = vpop.xlane.xlu1 %4354 }
0x2314   : > { %v4356_v14 = vsub.f32 %v4352_v37, %v4355_v47 }
0x2316   : > { %v4357_v49 = vmul.f32 1.442695, %v4356_v14 }
0x2318   : > { %5342 = vpow2.f32 %v4357_v49  ;;  %v4164_v49 = vld [vmem:[#allocation7 + $0x30] sm:$0xff] }
0x2319   : > { %5344 = vpow2.f32 %v4436_v51  ;;  %v4163_v51 = vld [vmem:[#allocation7 + $0x28] sm:$0xff]  ;;  %4516 = vmatpush.msrb.mxu0 %v4164_v49 }
0x231b   : > { %v4203_v58 = vpop.xlane.xlu1 %4202  ;;  %4517 = vmatpush.msrb.mxu0 %v4163_v51 }
0x231c   : > { %v4215_v23 = vand.u32 2147483648, %v4203_v58  ;;  %vm4209_vm9 = vweird.f32 %v4203_v58  ;;  %v4213_v26 = vand.u32 2147483647, %v4203_v58 }
0x231e   : > { %v6522_v53 = vpop.eup %5342  ;;  %v4216_v34 = vor.u32 1.1754944e-38, %v4215_v23 }
0x231f   : > { %v4359_v54 = vsel %vm1613_vm3, %v6522_v53, 0.0  ;;  %v5345_v55 = vpop.eup %5344 }
0x2320   : > { %4360 = vadd.xlane.f32.xlu1 %v4359_v54  ;;  %v4438_v30 = vsel %vm1613_vm3, %v5345_v55, 0.0 }
0x2328   : > { %4456 = vrot.lane.b32.xlu2 %v6461_v9, %s6765_s25  ;;  %4439 = vadd.xlane.f32.xlu1 %v4438_v30  ;;  %s6784_s25 = sld [smem:[#allocation57_spill]] }
0x2341   : > { %4219 = vrot.lane.b32.xlu1 %v6461_v9, %s6760_s14  ;;  %s6786_s14 = sld [smem:[#allocation63_spill]] }
0x2383   : > { %v4282_v56 = vpop.xlane.xlu2 %4281 }
0x2384   : > { %5346 = vrcp.f32 %v4282_v56  ;;  %v4294_v62 = vand.u32 2147483648, %v4282_v56  ;;  %v4292_v0 = vand.u32 2147483647, %v4282_v56  ;;  %vm4288_vm12 = vweird.f32 %v4282_v56 }
0x2385   : > { %5348 = vrcp.f32 %v4203_v58 }
0x2386   : > { %v4295_v48 = vor.u32 1.1754944e-38, %v4294_v62  ;;  %vm4293_vm15 = vcmp.eq.f32.partialorder %v4292_v0, 8.507059e+37 }
0x238a   : > { %v5347_v57 = vpop.eup %5346 }
0x238b   : > { %v4284_v59 = vmul.f32 %v5347_v57, %v4282_v56  ;;  %v4457_v31 = vpop.permute.xlu2 %4456  ;;  %vm4289_vm11 = vweird.f32 %v5347_v57  ;;  %v5349_v6 = vpop.eup %5348 }
0x238c   : > { %4477 = vmatpush.msrb.mxu2 %v4457_v31  ;;  %vm4290_vm14 = vmor %vm4288_vm12, %vm4289_vm11  ;;  %v4205_v11 = vmul.f32 %v5349_v6, %v4203_v58  ;;  %vm4210_vm4 = vweird.f32 %v5349_v6  ;;  %vm4214_vm12 = vcmp.eq.f32.partialorder %v4213_v26, 8.507059e+37  ;;  %v5230_v26 = vld [vmem:[%s6777_s30 + $0x1] ss:$0 sm:$0xff] }
0x238d   : > { %v4285_v61 = vsub.f32 1.0, %v4284_v59  ;;  %vm4211_vm11 = vmor %vm4209_vm9, %vm4210_vm4  ;;  %v5228_v59 = vld [vmem:[%s6774_s18 + $0x1] ss:$0 sm:$0xff] }
0x238e   : > { %v4206_v60 = vsub.f32 1.0, %v4205_v11  ;;  %v5057_v11 = vld [vmem:[%s6775_s28 + $0x70] sm:$0xff] }
0x238f   : > { %v4286_v63 = vmul.f32 %v5347_v57, %v4285_v61 }
0x2390   : > { %v4207_v1 = vmul.f32 %v5349_v6, %v4206_v60 }
0x2391   : > { %v4287_v2 = vadd.f32 %v5347_v57, %v4286_v63 }
0x2392   : > { %v4208_v10 = vadd.f32 %v5349_v6, %v4207_v1 }
0x2393   : > { %v4291_v3 = vsel %vm4290_vm14, %v5347_v57, %v4287_v2  ;;  %v4361_v4 = vpop.xlane.xlu1 %4360 }
0x2394   : > { %v4296_v9 = vsel %vm4293_vm15, %v4295_v48, %v4291_v3  ;;  %5350 = vrcp.f32 %v4361_v4  ;;  %v4212_v32 = vsel %vm4211_vm11, %v5349_v6, %v4208_v10  ;;  %v4373_v37 = vand.u32 2147483648, %v4361_v4  ;;  %v4559_v6 = vld [vmem:[#allocation9 + $0x20] sm:$0xff] }
0x2395   : > { %v4297_v5 = vmul.f32 %v5341_v24, %v4296_v9  ;;  %v4217_v35 = vsel %vm4214_vm12, %v4216_v34, %v4212_v32  ;;  %vm4367_vm15 = vweird.f32 %v4361_v4  ;;  %v4371_v38 = vand.u32 2147483647, %v4361_v4  ;;  %v4562_v9 = vld [vmem:[#allocation9 + $0x38] sm:$0xff]  ;;  %v5053_v32 = vld [vmem:[%s6775_s28 + $0x50] sm:$0xff] }
0x2396   : > { %v4218_v41 = vmul.f32 %v6517_v40, %v4217_v35  ;;  %v4374_v44 = vor.u32 1.1754944e-38, %v4373_v37  ;;  %v5231_v34 = vld [vmem:[%s6778_s26 + $0x1] ss:$0 sm:$0xff] }
0x2397   : > { %5039 = vmatmul.msk.f32.vlgmr.msra.gmra.mxu2 %vm1613_vm3, %v4297_v5  ;;  %vm4372_vm4 = vcmp.eq.f32.partialorder %v4371_v38, 8.507059e+37  ;;  %v4561_v5 = vld [vmem:[#allocation9 + $0x30] sm:$0xff]  ;;  %v5232_v38 = vld [vmem:[%s6779_s21 + $0x1] ss:$0 sm:$0xff] }
0x239a   : > { %v5351_v12 = vpop.eup %5350 }
0x239b   : > { %v4440_v7 = vpop.xlane.xlu1 %4439  ;;  %v4363_v52 = vmul.f32 %v5351_v12, %v4361_v4  ;;  %vm4368_vm14 = vweird.f32 %v5351_v12 }
0x239c   : > { %5352 = vrcp.f32 %v4440_v7  ;;  %v4452_v43 = vand.u32 2147483648, %v4440_v7  ;;  %v4450_v20 = vand.u32 2147483647, %v4440_v7  ;;  %vm4446_vm5 = vweird.f32 %v4440_v7 }
0x239d   : > { %v4364_v21 = vsub.f32 1.0, %v4363_v52  ;;  %v5054_v52 = vld [vmem:[%s6775_s28 + $0x58] sm:$0xff] }
0x239e   : > { %v4453_v25 = vor.u32 1.1754944e-38, %v4452_v43  ;;  %vm4451_vm10 = vcmp.eq.f32.partialorder %v4450_v20, 8.507059e+37 }
0x239f   : > { %v4365_v19 = vmul.f32 %v5351_v12, %v4364_v21 }
0x23a1   : > { %v4366_v27 = vadd.f32 %v5351_v12, %v4365_v19  ;;  %v5052_v19 = vld [vmem:[%s6775_s28 + $0x48] sm:$0xff] }
0x23a2   : > { %v5353_v13 = vpop.eup %5352 }
0x23a3   : > { %v4442_v16 = vmul.f32 %v5353_v13, %v4440_v7  ;;  %vm4447_vm0 = vweird.f32 %v5353_v13  ;;  %v5058_v7 = vld [vmem:[%s6775_s28 + $0x78] sm:$0xff] }
0x23a4   : > { %vm4448_vm6 = vmor %vm4446_vm5, %vm4447_vm0  ;;  %4617 = vmatpush.msrb.mxu3 %v5058_v7 }
0x23a5   : > { %v4443_v50 = vsub.f32 1.0, %v4442_v16  ;;  %vm4369_vm0 = vmor %vm4367_vm15, %vm4368_vm14  ;;  %v5055_v16 = vld [vmem:[%s6775_s28 + $0x60] sm:$0xff] }
0x23a6   : > { %v4370_v42 = vsel %vm4369_vm0, %v5351_v12, %v4366_v27  ;;  %v5056_v12 = vld [vmem:[%s6775_s28 + $0x68] sm:$0xff]  ;;  %4618 = vmatpush.msrb.mxu3 %v5057_v11 }
0x23a7   : > { %v4444_v18 = vmul.f32 %v5353_v13, %v4443_v50  ;;  %v4375_v45 = vsel %vm4372_vm4, %v4374_v44, %v4370_v42 }
0x23a8   : > { %v4376_v24 = vmul.f32 %v6522_v53, %v4375_v45  ;;  %v4162_v53 = vld [vmem:[#allocation7 + $0x20] sm:$0xff]  ;;  %4619 = vmatpush.msrb.mxu3 %v5056_v12 }
0x23a9   : > { %v4445_v22 = vadd.f32 %v5353_v13, %v4444_v18  ;;  %4518 = vmatpush.msrb.mxu0 %v4162_v53 }
0x23aa   : > { %4620 = vmatpush.msrb.mxu3 %v5055_v16 }
0x23ab   : > { %v4449_v28 = vsel %vm4448_vm6, %v5353_v13, %v4445_v22  ;;  %v5229_v22 = vld [vmem:[%s6776_s29 + $0x1] ss:$0 sm:$0xff] }
0x23ac   : > { %v4454_v29 = vsel %vm4451_vm10, %v4453_v25, %v4449_v28  ;;  %4621 = vmatpush.msrb.mxu3 %v5054_v52 }
0x23ad   : > { %v4455_v33 = vmul.f32 %v5345_v55, %v4454_v29 }
0x23ae   : > { %4622 = vmatpush.msrb.mxu3 %v5053_v32 }
0x23af   : > { %5045 = vmatmul.msk.f32.vlgmr.msrb.gmra.mxu2 %vm1613_vm3, %v4455_v33  ;;  %v5051_v33 = vld [vmem:[%s6775_s28 + $0x40] sm:$0xff] }
0x23b0   : > { %4623 = vmatpush.msrb.mxu3 %v5052_v19 }
0x23b2   : > { %4624 = vmatpush.msrb.mxu3 %v5051_v33 }
0x23b3   : > { %v4220_v39 = vpop.permute.xlu1 %4219 }
0x23b4   : > { %4240 = vmatpush.msrb.mxu1 %v4220_v39 }
0x23b5   : > { %5036 = vmatmul.msk.f32.vlgmr.msrb.gmra.mxu1 %vm1613_vm3, %v4218_v41 }
0x23b6   : > { %4398 = vmatpush.msra.mxu1 %v4378_v36 }
0x23b8   : > { %4583 = vmatpush.msrb.mxu1 %v4562_v9  ;;  %v4698_v9 = vld [vmem:[%s6782_s9 + $0x10] sm:$0xff] }
0x23ba   : > { %4584 = vmatpush.msrb.mxu1 %v4561_v5  ;;  %v4697_v5 = vld [vmem:[%s6782_s9 + $0x8] sm:$0xff] }
0x23bd   : > { %5042 = vmatmul.msk.f32.vlgmr.msra.gmra.mxu1 %vm1613_vm3, %v4376_v24 }
0x241a   : > { %v4321_v46 = vpop.f32.mrf.mxu2 }
0x241b   : > { %4483 = vrot.lane.b32.xlu0 %v4321_v46, %s6758_s8 }
0x2432   : > { %v4242_v47 = vpop.f32.mrf.mxu1  ;;  %v4479_v14 = vpop.f32.mrf.mxu2 }
0x2433   : > { %4491 = vrot.lane.b32.xlu0 %v4479_v14, %s6759_s13  ;;  %s6783_s13 = sld [smem:[#allocation56_spill]] }
0x243a   : > { %v4400_v40 = vpop.f32.mrf.mxu1 }
0x243b   : > { %4487 = vrot.lane.b32.xlu1 %v4400_v40, %s6761_s19  ;;  %s6787_s19 = sld [smem:[#allocation60_spill]] }
0x2441   : > { %s1499_s24 = scalar_lea.vmem %s6787_s19, %s6786_s14 }
0x248d   : > { %v4484_v54 = vpop.permute.xlu0 %4483 }
0x248e   : > { %v4494_v55 = vsel %vm1613_vm3, %v4242_v47, %v4484_v54 }
0x24a5   : > { %v4492_v56 = vpop.permute.xlu0 %4491 }
0x24ad   : > { %v4488_v30 = vpop.permute.xlu1 %4487 }
0x24ae   : > { %v4495_v57 = vsel %vm1939_vm7, %v4494_v55, %v4488_v30 }
0x24af   : > { %v4496_v58 = vsel %vm1941_vm8, %v4495_v57, %v4492_v56  ;;  %v5233_v56 = vld [vmem:[%s6780_s27 + $0x1] ss:$0 sm:$0xff] }
0x24b0   : > { %5046 = vmatmul.msk.f32.vlgmr.msrb.gmra.mxu0 %vm1581_vm2, %v4496_v58 }
0x252d   : > { %v4520_v31 = vpop.f32.mrf.mxu0 }
0x252e   : > { %v4521_v61 = vadd.f32 %v5228_v59, %v4520_v31  ;;  %v5234_v59 = vld [vmem:[%s6781_s4 + $0x1] ss:$0 sm:$0xff] }
0x2530   : > { %v4523_v62 = vadd.f32 %v4521_v61, %v6493_v15  ;;  %v4560_v15 = vld [vmem:[#allocation9 + $0x28] sm:$0xff] }
0x2531   : > { %4585 = vmatpush.msrb.mxu1 %v4560_v15  ;;  %v4696_v15 = vld [vmem:[%s6782_s9] sm:$0xff] }
0x2532   : > { %v4528_v63 = vsel %vm1581_vm2, %v4523_v62, 0.0 }
0x2533   : > { %4529 = vadd.xlane.f32.xlu1 %v4528_v63  ;;  %4586 = vmatpush.msrb.mxu1 %v4559_v6 }
0x25a6   : > { %v4530_v0 = vpop.xlane.xlu1 %4529 }
0x25a7   : > { %v4531_v2 = vmul.f32 %v4530_v0, %v6059_v8 }
0x25a9   : > { %v4532_v48 = vsub.f32 %v4523_v62, %v4531_v2 }
0x25ab   : > { %v4533_v3 = vmul.f32 %v4532_v48, %v4532_v48 }
0x25ad   : > { %v4534_v4 = vsel %vm1581_vm2, %v4533_v3, 0.0 }
0x25ae   : > { %4535 = vadd.xlane.f32.xlu2 %v4534_v4  ;;  %v4699_v4 = vld [vmem:[%s6782_s9 + $0x18] sm:$0xff] }
0x25af   : > { %4719 = vmatpush.msra.mxu2 %v4699_v4 }
0x25b1   : > { %4720 = vmatpush.msra.mxu2 %v4698_v9 }
0x25b3   : > { %4721 = vmatpush.msra.mxu2 %v4697_v5 }
0x25b5   : > { %4722 = vmatpush.msra.mxu2 %v4696_v15 }
0x2621   : > { %v4536_v60 = vpop.xlane.xlu2 %4535 }
0x2622   : > { %v4537_v13 = vmul.f32 %v4536_v60, %v6059_v8 }
0x2624   : > { %v4538_v1 = vadd.f32 1e-05, %v4537_v13 }
0x2626   : > { %5354 = vrsqrt.f32 %v4538_v1  ;;  %vm4545_vm7 = vweird.f32 %v4538_v1 }
0x262c   : > { %v5355_v50 = vpop.eup %5354 }
0x262d   : > { %v4540_v43 = vmul.f32 %v5355_v50, %v4538_v1  ;;  %vm4546_vm3 = vweird.f32 %v5355_v50 }
0x262e   : > { %vm4547_vm8 = vmor %vm4545_vm7, %vm4546_vm3 }
0x262f   : > { %v4541_v18 = vmul.f32 %v5355_v50, %v4540_v43 }
0x2631   : > { %v4542_v20 = vmul.f32 0.5, %v4541_v18 }
0x2633   : > { %v4543_v10 = vsub.f32 1.5, %v4542_v20  ;;  %v5236_v20 = vld [vmem:[%s6784_s25] ss:$0 sm:$0xff] }
0x2635   : > { %v4544_v21 = vmul.f32 %v5355_v50, %v4543_v10 }
0x2637   : > { %v4548_v23 = vsel %vm4547_vm8, %v5355_v50, %v4544_v21  ;;  %v5235_v50 = vld [vmem:[%s6783_s13] ss:$0 sm:$0xff] }
0x2638   : > { %v4549_v25 = vmul.f32 %v4548_v23, %v4532_v48  ;;  %v5237_v21 = vld [vmem:[%s6785_s3] ss:$0 sm:$0xff] }
0x263a   : > { %v4553_v28 = vmul.f32 %v5229_v22, %v4549_v25 }
0x263c   : > { %v4557_v29 = vadd.f32 %v5230_v26, %v4553_v28 }
0x263e   : > { %5050 = vmatmul.msk.f32.vlgmr.msrb.gmra.mxu1 %vm1581_vm2, %v4557_v29 }
0x26bb   : > { %v4588_v35 = vpop.f32.mrf.mxu1 }
0x26bc   : > { %v4589_v27 = vadd.f32 %v5231_v34, %v4588_v35 }
0x26be   : > { %v4591_v37 = vmax.f32 %v4589_v27, 0.0 }
0x26c0   : > { %5060 = vmatmul.msk.f32.vlgmr.msrb.gmra.mxu3 %vm2053_vm13, %v4591_v37 }
0x2743   : > { %v4626_v39 = vpop.f32.mrf.mxu3 }
0x2744   : > { %v4627_v41 = vadd.f32 %v5232_v38, %v4626_v39 }
0x2746   : > { %v4629_v36 = vadd.f32 %v4627_v41, %v4557_v29 }
0x2748   : > { %v4634_v42 = vsel %vm1581_vm2, %v4629_v36, 0.0 }
0x2749   : > { %4635 = vadd.xlane.f32.xlu0 %v4634_v42 }
0x27bc   : > { %v4636_v44 = vpop.xlane.xlu0 %4635 }
0x27bd   : > { %v4637_v45 = vmul.f32 %v4636_v44, %v6059_v8 }
0x27bf   : > { %v4638_v24 = vsub.f32 %v4629_v36, %v4637_v45 }
0x27c1   : > { %v4639_v46 = vmul.f32 %v4638_v24, %v4638_v24 }
0x27c3   : > { %v4640_v47 = vsel %vm1581_vm2, %v4639_v46, 0.0 }
0x27c4   : > { %4641 = vadd.xlane.f32.xlu1 %v4640_v47 }
0x2837   : > { %v4642_v14 = vpop.xlane.xlu1 %4641 }
0x2838   : > { %v4643_v40 = vmul.f32 %v4642_v14, %v6059_v8 }
0x283a   : > { %v4644_v17 = vadd.f32 1e-05, %v4643_v40 }
0x283c   : > { %5356 = vrsqrt.f32 %v4644_v17  ;;  %vm4651_vm5 = vweird.f32 %v4644_v17 }
0x2842   : > { %v5357_v49 = vpop.eup %5356 }
0x2843   : > { %v4646_v51 = vmul.f32 %v5357_v49, %v4644_v17  ;;  %vm4652_vm13 = vweird.f32 %v5357_v49 }
0x2844   : > { %vm4653_vm6 = vmor %vm4651_vm5, %vm4652_vm13 }
0x2845   : > { %v4647_v53 = vmul.f32 %v5357_v49, %v4646_v51 }
0x2847   : > { %v4648_v54 = vmul.f32 0.5, %v4647_v53 }
0x2849   : > { %v4649_v55 = vsub.f32 1.5, %v4648_v54 }
0x284b   : > { %v4650_v30 = vmul.f32 %v5357_v49, %v4649_v55 }
0x284d   : > { %v4654_v57 = vsel %vm4653_vm6, %v5357_v49, %v4650_v30 }
0x284e   : > { %v4655_v58 = vmul.f32 %v4654_v57, %v4638_v24 }
0x2850   : > { %v4659_v31 = vmul.f32 %v5233_v56, %v4655_v58 }
0x2852   : > { %v4663_v61 = vadd.f32 %v5234_v59, %v4659_v31 }
0x2854   : > { %v4666_v62 = vsel %vm1581_vm2, %v4663_v61, 0.0 }
0x2855   : > { %4667 = vadd.xlane.f32.xlu2 %v4666_v62 }
0x28c8   : > { %v4668_v63 = vpop.xlane.xlu2 %4667 }
0x28c9   : > { %v4669_v0 = vmul.f32 %v4668_v63, %v6059_v8 }
0x28cb   : > { %v4670_v2 = vsub.f32 %v4663_v61, %v4669_v0 }
0x28cd   : > { %v4671_v48 = vmul.f32 %v4670_v2, %v4670_v2 }
0x28cf   : > { %v4672_v3 = vsel %vm1581_vm2, %v4671_v48, 0.0 }
0x28d0   : > { %4673 = vadd.xlane.f32.xlu0 %v4672_v3 }
0x2943   : > { %v4674_v6 = vpop.xlane.xlu0 %4673 }
0x2944   : > { %v4675_v7 = vmul.f32 %v4674_v6, %v6059_v8 }
0x2946   : > { %v4676_v11 = vadd.f32 1e-05, %v4675_v7 }
0x2948   : > { %5358 = vrsqrt.f32 %v4676_v11  ;;  %vm4683_vm10 = vweird.f32 %v4676_v11 }
0x294e   : > { %v5359_v12 = vpop.eup %5358 }
0x294f   : > { %v4678_v60 = vmul.f32 %v5359_v12, %v4676_v11  ;;  %vm4684_vm9 = vweird.f32 %v5359_v12 }
0x2950   : > { %vm4685_vm11 = vmor %vm4683_vm10, %vm4684_vm9 }
0x2951   : > { %v4679_v13 = vmul.f32 %v5359_v12, %v4678_v60 }
0x2953   : > { %v4680_v16 = vmul.f32 0.5, %v4679_v13 }
0x2955   : > { %v4681_v1 = vsub.f32 1.5, %v4680_v16 }
0x2957   : > { %v4682_v52 = vmul.f32 %v5359_v12, %v4681_v1 }
0x2959   : > { %v4686_v43 = vsel %vm4685_vm11, %v5359_v12, %v4682_v52 }
0x295a   : > { %v4687_v18 = vmul.f32 %v4686_v43, %v4670_v2 }
0x295c   : > { %v4691_v10 = vmul.f32 %v5235_v50, %v4687_v18 }
0x295e   : > { %v4695_v8 = vadd.f32 %v5236_v20, %v4691_v10 }
0x2960   : > { %5063 = vmatmul.msk.f32.vlgmr.msra.gmra.mxu2 %vm1581_vm2, %v4695_v8 }
0x29e3   : > { %v4724_v22 = vpop.f32.mrf.mxu2 }
0x29e4   : > { %v4725_v23 = vadd.f32 %v5237_v21, %v4724_v22 }
0x29e6   : > { %4727 = vst.msk [vmem:[%s1499_s24] sm:$0xff] %vm1506_vm1, %v4725_v23 }
0x29e7 PF: > { %s6788_s0 = sld [smem:[#allocation61_spill]] }
0x29ed   : > { %s108_s22 = sadd.s32 1, %s6788_s0  }
0x29ee   : > { %p105_p2 = scmp.ge.s32.totalorder %s108_s22, 4  }
0x29f0   :  { %107 = sbr.rel (!%p105_p2) target bundleno = 106 (0x6a), region = 341 }
0x29f5   :  { %4747 = vsyncpa [#allocation3], 1 }
0x29f6   :  { %4749 = vsyncpa [#allocation3 + $0x1], 1 }
0x29f7   :  { %4750 = vsyncpa [#allocation5], 1 }
0x29f8   :  { %4751 = vsyncpa [#allocation8], 1 }

</bundles_post_ra>
